<compile_context>
chip_gen: v7x
topology: tpu7x:2x2x1
jax: 0.10.0
libtpu: 0.0.40
codegen_flags: <defaults>
</compile_context>

<pallas_src>
import functools
import math

import jax
import jax.numpy as jnp
from jax.experimental import pallas as pl
from jax.experimental.pallas import tpu as pltpu

EPS = 1e-5
LEAKY_SLOPE = 0.2


def _round_up(x, m):
    return ((x + m - 1) // m) * m


# ----------------------------- fused Pallas kernel ------------------------------


def _simple_block_kernel(xp_ref, w1_ref, wsc_ref, w3_ref, w2_ref, b_ref, mask_ref,
                         out_ref, h1_ref, h2_ref, *, cin, cout, ho, wp, l2, slope):
    """One image: C1/BN1/LeakyReLU -> C3/BN3 -> C2/BN2 (+shortcut residual) -> LeakyReLU.

    Activations are kept row-flattened with row period `wp` (= Wo + 2, the padded width of
    the half-res grid), so every conv tap is a contiguous row-slice and every conv is a
    sum of 9 (M, C) @ (C, Cout) matmuls.  Pseudo-output rows carry 2 junk columns per
    spatial row (j in {Wo, Wo+1}) that `mask` zeroes before re-use as padded input.
    """
    m = ho * wp                       # pseudo-output rows
    mask = mask_ref[...]              # (m, 1) f32: 1.0 at valid cols, 0.0 at junk cols

    def conv3x3(tap_fn, w_ref, kdim):
        # 9 shifted-slice matmuls accumulated in f32 (consecutive MXU pushes; on v7x the
        # partial sums stay in the MXU result buffer, on v5e/v6e they live in vregs).
        acc = jnp.zeros((m, cout), jnp.float32)
        for kh in range(3):
            for kw in range(3):
                t = kh * 3 + kw
                wk = w_ref[t * kdim:(t + 1) * kdim, :]              # (kdim, cout) bf16
                acc = acc + jnp.dot(tap_fn(kh, kw), wk,
                                    preferred_element_type=jnp.float32)
        return acc

    # ---- C1: 3x3 stride-2 pad-1 conv, folded BN1, LeakyReLU -------------------------
    # Tap (kh, kw) of the stride-2 conv == contiguous row-slice of polyphase plane
    # (kh%2, kw%2) at row offset (kh//2)*wp + (kw//2).
    def x_tap(kh, kw):
        off = ((kh % 2) * 2 + (kw % 2)) * l2 + (kh // 2) * wp + (kw // 2)
        return xp_ref[off:off + m, :]

    h1 = conv3x3(x_tap, w1_ref, cin) + b_ref[0:1, :]
    h1 = jnp.maximum(h1, slope * h1)                                # LeakyReLU(0.2)
    h1 = h1 * mask                                                  # zero junk cols
    h1_ref[...] = jnp.zeros(h1_ref.shape, h1_ref.dtype)
    h1_ref[wp + 1:wp + 1 + m, :] = h1.astype(h1_ref.dtype)          # re-embed zero-padded

    # ---- shortcut: 1x1 stride-2 conv (= center-tap polyphase plane), folded BNsc ----
    sh = jnp.dot(xp_ref[3 * l2:3 * l2 + m, :], wsc_ref[...],
                 preferred_element_type=jnp.float32) + b_ref[1:2, :]

    # ---- C3: 3x3 stride-1 pad-1 conv, folded BN3 (no activation in forward) ---------
    def h1_tap(kh, kw):
        return h1_ref[kh * wp + kw:kh * wp + kw + m, :]

    h2 = (conv3x3(h1_tap, w3_ref, cout) + b_ref[2:3, :]) * mask
    h2_ref[...] = jnp.zeros(h2_ref.shape, h2_ref.dtype)
    h2_ref[wp + 1:wp + 1 + m, :] = h2.astype(h2_ref.dtype)

    # ---- C2: 3x3 stride-1 pad-1 conv, folded BN2, + residual, LeakyReLU -------------
    def h2_tap(kh, kw):
        return h2_ref[kh * wp + kw:kh * wp + kw + m, :]

    y = conv3x3(h2_tap, w2_ref, cout) + b_ref[3:4, :] + sh
    y = jnp.maximum(y, slope * y)
    out_ref[...] = y.astype(out_ref.dtype)


# --------------------------- parameter folding helpers --------------------------


def fold_bn(bn, eps=EPS):
    scale = bn["gamma"] / jnp.sqrt(bn["var"] + eps)
    bias = bn["beta"] - bn["mean"] * scale
    return scale, bias


def _fold_conv(w_oihw, scale):
    """OIHW conv weight * per-out-channel BN scale -> (KH*KW*Cin, Cout) bf16, tap-major rows."""
    Cout, Cin, KH, KW = w_oihw.shape
    w = jnp.transpose(w_oihw, (2, 3, 1, 0)).reshape(KH * KW * Cin, Cout)
    return (w * scale[None, :]).astype(jnp.bfloat16)


def init_simple_block_params(key, indim, outdim):
    """Deterministic init matching init_layer: conv ~ N(0, sqrt(2/(kh*kw*out))), BN w=1 b=0."""
    k1, k2, k3, k4 = jax.random.split(key, 4)
    std3 = math.sqrt(2.0 / (3 * 3 * outdim))
    std1 = math.sqrt(2.0 / (1 * 1 * outdim))
    p = {
        "W1": jax.random.normal(k1, (outdim, indim, 3, 3), jnp.float32) * std3,
        "W3": jax.random.normal(k2, (outdim, outdim, 3, 3), jnp.float32) * std3,
        "W2": jax.random.normal(k3, (outdim, outdim, 3, 3), jnp.float32) * std3,
        "Wsc": jax.random.normal(k4, (outdim, indim, 1, 1), jnp.float32) * std1,
    }
    ones = jnp.ones((outdim,), jnp.float32)
    zeros = jnp.zeros((outdim,), jnp.float32)
    for name in ("BN1", "BN3", "BN2", "BNsc"):
        p[name] = {"gamma": ones, "beta": zeros, "mean": zeros, "var": ones}
    return p


# ------------------------------- forward pass ------------------------------------


@functools.partial(jax.jit, static_argnames=("half_res",))
def simple_block_forward(x_nchw, params, *, half_res=True):
    """SimpleBlock.forward (eval mode).  x_nchw: (N, indim, H, W) -> (N, outdim, H/2, W/2)."""
    # maml shortcut conv is hard-wired to stride 2; half_res=False would make the residual
    # shapes mismatch in the PyTorch module as well.
    assert half_res, "SimpleBlock (maml, 1x1 shortcut) only supports half_res=True"
    N, Cin, H, W = x_nchw.shape
    Cout = params["W1"].shape[0]
    assert H % 2 == 0 and W % 2 == 0, "even spatial dims required for the stride-2 split"

    Ho, Wo = H // 2, W // 2
    Wp = Wo + 2                       # row period of the padded half-res grid
    Hp = Ho + 2
    L2 = Hp * Wp                      # flat length of a polyphase plane / padded activation
    M = Ho * Wp                       # pseudo-output rows (junk cols at j in {Wo, Wo+1})
    PADROWS = _round_up(L2 + 2, 8)    # padded-activation scratch (+2 keeps tap slices in-bounds)

    # ---- XLA-side prep: 1x input traffic, no im2col slab ----
    x = jnp.transpose(x_nchw.astype(jnp.bfloat16), (0, 2, 3, 1))      # bf16 NHWC
    xpad = jnp.pad(x, ((0, 0), (1, 3), (1, 3), (0, 0)))               # pad-1 + polyphase slack
    planes = [xpad[:, a::2, b::2, :] for a in (0, 1) for b in (0, 1)]  # each (N, Hp, Wp, Cin)
    xpoly = jnp.stack(planes, axis=1).reshape(N, 4 * L2, Cin)

    s1, b1 = fold_bn(params["BN1"])
    s3, b3 = fold_bn(params["BN3"])
    s2, b2 = fold_bn(params["BN2"])
    ssc, bsc = fold_bn(params["BNsc"])
    w1f = _fold_conv(params["W1"], s1)                                # (9*Cin, Cout) bf16
    wscf = _fold_conv(params["Wsc"], ssc)                             # (Cin, Cout)  bf16
    w3f = _fold_conv(params["W3"], s3)                                # (9*Cout, Cout) bf16
    w2f = _fold_conv(params["W2"], s2)                                # (9*Cout, Cout) bf16
    biases = jnp.stack([b1, bsc, b3, b2]).astype(jnp.float32)         # (4, Cout)
    mask = (jnp.arange(M) % Wp < Wo).astype(jnp.float32).reshape(M, 1)

    kernel = functools.partial(_simple_block_kernel, cin=Cin, cout=Cout,
                               ho=Ho, wp=Wp, l2=L2, slope=LEAKY_SLOPE)
    const = lambda shape: pl.BlockSpec(shape, lambda n: (0, 0))       # weights/bias/mask

    out_pseudo = pl.pallas_call(
        kernel,
        out_shape=jax.ShapeDtypeStruct((N, M, Cout), jnp.float32),
        grid=(N,),
        in_specs=[pl.BlockSpec((None, 4 * L2, Cin), lambda n: (n, 0, 0)),
                  const((9 * Cin, Cout)),
                  const((Cin, Cout)),
                  const((9 * Cout, Cout)),
                  const((9 * Cout, Cout)),
                  const((4, Cout)),
                  const((M, 1))],
        out_specs=pl.BlockSpec((None, M, Cout), lambda n: (n, 0, 0)),
        scratch_shapes=[pltpu.VMEM((PADROWS, Cout), jnp.bfloat16),    # h1 (padded, bf16)
                        pltpu.VMEM((PADROWS, Cout), jnp.bfloat16)],   # h2 (padded, bf16)
        compiler_params=pltpu.CompilerParams(
            dimension_semantics=("parallel",),        # one image per TensorCore on megacore
            vmem_limit_bytes=32 * 1024 * 1024),       # explicit (v5e default is only 16 MiB)
    )(xpoly, w1f, wscf, w3f, w2f, biases, mask)

    out = out_pseudo.reshape(N, Ho, Wp, Cout)[:, :, :Wo, :]           # drop junk columns
    return jnp.transpose(out, (0, 3, 1, 2))                           # NHWC -> NCHW


# ------------------------------ pure-JAX reference ------------------------------


def _ref_conv_bn(x, w, scale, bias, stride, padding, residual=None, slope=None):
    y = jax.lax.conv_general_dilated(
        x, w, window_strides=(stride, stride),
        padding=[(padding, padding), (padding, padding)],
        dimension_numbers=("NHWC", "OIHW", "NHWC"))
    y = y * scale.reshape(1, 1, 1, -1) + bias.reshape(1, 1, 1, -1)
    if residual is not None:
        y = y + residual
    if slope is not None:
        y = jnp.where(y > 0, y, slope * y)
    return y


def simple_block_reference(x_nchw, params, *, half_res=True):
    x = jnp.transpose(x_nchw, (0, 2, 3, 1)).astype(jnp.float32)
    s1, b1 = fold_bn(params["BN1"])
    s3, b3 = fold_bn(params["BN3"])
    s2, b2 = fold_bn(params["BN2"])
    ssc, bsc = fold_bn(params["BNsc"])
    stride1 = 2 if half_res else 1
    h = _ref_conv_bn(x, params["W1"], s1, b1, stride1, 1, slope=LEAKY_SLOPE)
    h = _ref_conv_bn(h, params["W3"], s3, b3, 1, 1)
    sh = _ref_conv_bn(x, params["Wsc"], ssc, bsc, 2, 0)
    out = _ref_conv_bn(h, params["W2"], s2, b2, 1, 1, residual=sh, slope=LEAKY_SLOPE)
    return jnp.transpose(out, (0, 3, 1, 2))


# ----------------------------------- main ---------------------------------------


if __name__ == "__main__":
    key = jax.random.PRNGKey(0)
    kx, kp = jax.random.split(key)

    indim, outdim, half_res = 4, 8, True          # outdim != 64 -> C3/BN3 + 1x1 shortcut path
    N, H, W = 2, 16, 16
    x = jax.random.normal(kx, (N, indim, H, W), jnp.float32)   # PyTorch NCHW input

    params = init_simple_block_params(kp, indim, outdim)

    out = jax.block_until_ready(simple_block_forward(x, params, half_res=half_res))
    ref = jax.block_until_ready(simple_block_reference(x, params, half_res=half_res))

    assert out.shape == (N, outdim, H // 2, W // 2), out.shape
    # bf16 MXU operands (f32 accumulation) across three chained convs -> relaxed tolerance.
    max_err = float(jnp.max(jnp.abs(out - ref)))
    assert jnp.allclose(out, ref, rtol=2e-2, atol=2e-2), max_err

    print("KERNEL_OK")
</pallas_src>

<mosaic_0001>
module attributes {stable_mosaic.version = 11 : i64} {
  func.func @_simple_block_kernel(%arg0: i32, %arg1: memref<1x400x4xbf16, #tpu.memory_space<vmem>>, %arg2: memref<36x8xbf16, #tpu.memory_space<vmem>>, %arg3: memref<4x8xbf16, #tpu.memory_space<vmem>>, %arg4: memref<72x8xbf16, #tpu.memory_space<vmem>>, %arg5: memref<72x8xbf16, #tpu.memory_space<vmem>>, %arg6: memref<4x8xf32, #tpu.memory_space<vmem>>, %arg7: memref<80x1xf32, #tpu.memory_space<vmem>>, %arg8: memref<1x80x8xf32, #tpu.memory_space<vmem>>, %arg9: memref<104x8xbf16, #tpu.memory_space<vmem>>, %arg10: memref<104x8xbf16, #tpu.memory_space<vmem>>) attributes {dimension_semantics = [#tpu.dimension_semantics<parallel>], iteration_bounds = array<i64: 2>, scalar_prefetch = 0 : i64, scratch_operands = 2 : i64, tpu.core_type = #tpu.core_type<tc>, window_params = [{transform_indices = @transform_0, window_bounds = array<i64: 1, 400, 4>}, {pipeline_mode = #tpu.pipeline_mode<synchronous>, transform_indices = @transform_1, window_bounds = array<i64: 36, 8>}, {pipeline_mode = #tpu.pipeline_mode<synchronous>, transform_indices = @transform_2, window_bounds = array<i64: 4, 8>}, {pipeline_mode = #tpu.pipeline_mode<synchronous>, transform_indices = @transform_3, window_bounds = array<i64: 72, 8>}, {pipeline_mode = #tpu.pipeline_mode<synchronous>, transform_indices = @transform_4, window_bounds = array<i64: 72, 8>}, {pipeline_mode = #tpu.pipeline_mode<synchronous>, transform_indices = @transform_5, window_bounds = array<i64: 4, 8>}, {pipeline_mode = #tpu.pipeline_mode<synchronous>, transform_indices = @transform_6, window_bounds = array<i64: 80, 1>}, {transform_indices = @transform_7, window_bounds = array<i64: 1, 80, 8>}]} {
    %c0 = arith.constant 0 : index
    %c0_0 = arith.constant 0 : index
    %0 = vector.load %arg7[%c0, %c0_0] : memref<80x1xf32, #tpu.memory_space<vmem>>, vector<80x1xf32>
    %cst = arith.constant 0.000000e+00 : f32
    %1 = vector.broadcast %cst : f32 to vector<80x8xf32>
    %c0_1 = arith.constant 0 : index
    %c0_2 = arith.constant 0 : index
    %2 = vector.load %arg2[%c0_1, %c0_2] : memref<36x8xbf16, #tpu.memory_space<vmem>>, vector<4x8xbf16>
    %c0_3 = arith.constant 0 : index
    %c0_4 = arith.constant 0 : index
    %c0_5 = arith.constant 0 : index
    %3 = vector.load %arg1[%c0_3, %c0_4, %c0_5] : memref<1x400x4xbf16, #tpu.memory_space<vmem>>, vector<1x80x4xbf16>
    %4 = vector.shape_cast %3 : vector<1x80x4xbf16> to vector<80x4xbf16>
    %cst_6 = arith.constant dense<0.000000e+00> : vector<80x8xf32>
    %5 = tpu.matmul %4, %2, %cst_6 {dimension_numbers = #tpu.dot_dimension_numbers<[1], [0], [0], [1], [0, 0, 1, 1], [], []>} : vector<80x4xbf16>, vector<4x8xbf16>, vector<80x8xf32> -> vector<80x8xf32>
    %6 = arith.addf %1, %5 : vector<80x8xf32>
    %c4 = arith.constant 4 : index
    %c0_7 = arith.constant 0 : index
    %7 = vector.load %arg2[%c4, %c0_7] : memref<36x8xbf16, #tpu.memory_space<vmem>>, vector<4x8xbf16>
    %c0_8 = arith.constant 0 : index
    %c100 = arith.constant 100 : index
    %c0_9 = arith.constant 0 : index
    %8 = vector.load %arg1[%c0_8, %c100, %c0_9] : memref<1x400x4xbf16, #tpu.memory_space<vmem>>, vector<1x80x4xbf16>
    %9 = vector.shape_cast %8 : vector<1x80x4xbf16> to vector<80x4xbf16>
    %cst_10 = arith.constant dense<0.000000e+00> : vector<80x8xf32>
    %10 = tpu.matmul %9, %7, %cst_10 {dimension_numbers = #tpu.dot_dimension_numbers<[1], [0], [0], [1], [0, 0, 1, 1], [], []>} : vector<80x4xbf16>, vector<4x8xbf16>, vector<80x8xf32> -> vector<80x8xf32>
    %11 = arith.addf %6, %10 : vector<80x8xf32>
    %c8 = arith.constant 8 : index
    %c0_11 = arith.constant 0 : index
    %12 = vector.load %arg2[%c8, %c0_11] : memref<36x8xbf16, #tpu.memory_space<vmem>>, vector<4x8xbf16>
    %c0_12 = arith.constant 0 : index
    %c1 = arith.constant 1 : index
    %c0_13 = arith.constant 0 : index
    %13 = vector.load %arg1[%c0_12, %c1, %c0_13] : memref<1x400x4xbf16, #tpu.memory_space<vmem>>, vector<1x80x4xbf16>
    %14 = vector.shape_cast %13 : vector<1x80x4xbf16> to vector<80x4xbf16>
    %cst_14 = arith.constant dense<0.000000e+00> : vector<80x8xf32>
    %15 = tpu.matmul %14, %12, %cst_14 {dimension_numbers = #tpu.dot_dimension_numbers<[1], [0], [0], [1], [0, 0, 1, 1], [], []>} : vector<80x4xbf16>, vector<4x8xbf16>, vector<80x8xf32> -> vector<80x8xf32>
    %16 = arith.addf %11, %15 : vector<80x8xf32>
    %c12 = arith.constant 12 : index
    %c0_15 = arith.constant 0 : index
    %17 = vector.load %arg2[%c12, %c0_15] : memref<36x8xbf16, #tpu.memory_space<vmem>>, vector<4x8xbf16>
    %c0_16 = arith.constant 0 : index
    %c200 = arith.constant 200 : index
    %c0_17 = arith.constant 0 : index
    %18 = vector.load %arg1[%c0_16, %c200, %c0_17] : memref<1x400x4xbf16, #tpu.memory_space<vmem>>, vector<1x80x4xbf16>
    %19 = vector.shape_cast %18 : vector<1x80x4xbf16> to vector<80x4xbf16>
    %cst_18 = arith.constant dense<0.000000e+00> : vector<80x8xf32>
    %20 = tpu.matmul %19, %17, %cst_18 {dimension_numbers = #tpu.dot_dimension_numbers<[1], [0], [0], [1], [0, 0, 1, 1], [], []>} : vector<80x4xbf16>, vector<4x8xbf16>, vector<80x8xf32> -> vector<80x8xf32>
    %21 = arith.addf %16, %20 : vector<80x8xf32>
    %c16 = arith.constant 16 : index
    %c0_19 = arith.constant 0 : index
    %22 = vector.load %arg2[%c16, %c0_19] : memref<36x8xbf16, #tpu.memory_space<vmem>>, vector<4x8xbf16>
    %c0_20 = arith.constant 0 : index
    %c300 = arith.constant 300 : index
    %c0_21 = arith.constant 0 : index
    %23 = vector.load %arg1[%c0_20, %c300, %c0_21] : memref<1x400x4xbf16, #tpu.memory_space<vmem>>, vector<1x80x4xbf16>
    %24 = vector.shape_cast %23 : vector<1x80x4xbf16> to vector<80x4xbf16>
    %cst_22 = arith.constant dense<0.000000e+00> : vector<80x8xf32>
    %25 = tpu.matmul %24, %22, %cst_22 {dimension_numbers = #tpu.dot_dimension_numbers<[1], [0], [0], [1], [0, 0, 1, 1], [], []>} : vector<80x4xbf16>, vector<4x8xbf16>, vector<80x8xf32> -> vector<80x8xf32>
    %26 = arith.addf %21, %25 : vector<80x8xf32>
    %c20 = arith.constant 20 : index
    %c0_23 = arith.constant 0 : index
    %27 = vector.load %arg2[%c20, %c0_23] : memref<36x8xbf16, #tpu.memory_space<vmem>>, vector<4x8xbf16>
    %c0_24 = arith.constant 0 : index
    %c201 = arith.constant 201 : index
    %c0_25 = arith.constant 0 : index
    %28 = vector.load %arg1[%c0_24, %c201, %c0_25] : memref<1x400x4xbf16, #tpu.memory_space<vmem>>, vector<1x80x4xbf16>
    %29 = vector.shape_cast %28 : vector<1x80x4xbf16> to vector<80x4xbf16>
    %cst_26 = arith.constant dense<0.000000e+00> : vector<80x8xf32>
    %30 = tpu.matmul %29, %27, %cst_26 {dimension_numbers = #tpu.dot_dimension_numbers<[1], [0], [0], [1], [0, 0, 1, 1], [], []>} : vector<80x4xbf16>, vector<4x8xbf16>, vector<80x8xf32> -> vector<80x8xf32>
    %31 = arith.addf %26, %30 : vector<80x8xf32>
    %c24 = arith.constant 24 : index
    %c0_27 = arith.constant 0 : index
    %32 = vector.load %arg2[%c24, %c0_27] : memref<36x8xbf16, #tpu.memory_space<vmem>>, vector<4x8xbf16>
    %c0_28 = arith.constant 0 : index
    %c10 = arith.constant 10 : index
    %c0_29 = arith.constant 0 : index
    %33 = vector.load %arg1[%c0_28, %c10, %c0_29] : memref<1x400x4xbf16, #tpu.memory_space<vmem>>, vector<1x80x4xbf16>
    %34 = vector.shape_cast %33 : vector<1x80x4xbf16> to vector<80x4xbf16>
    %cst_30 = arith.constant dense<0.000000e+00> : vector<80x8xf32>
    %35 = tpu.matmul %34, %32, %cst_30 {dimension_numbers = #tpu.dot_dimension_numbers<[1], [0], [0], [1], [0, 0, 1, 1], [], []>} : vector<80x4xbf16>, vector<4x8xbf16>, vector<80x8xf32> -> vector<80x8xf32>
    %36 = arith.addf %31, %35 : vector<80x8xf32>
    %c28 = arith.constant 28 : index
    %c0_31 = arith.constant 0 : index
    %37 = vector.load %arg2[%c28, %c0_31] : memref<36x8xbf16, #tpu.memory_space<vmem>>, vector<4x8xbf16>
    %c0_32 = arith.constant 0 : index
    %c110 = arith.constant 110 : index
    %c0_33 = arith.constant 0 : index
    %38 = vector.load %arg1[%c0_32, %c110, %c0_33] : memref<1x400x4xbf16, #tpu.memory_space<vmem>>, vector<1x80x4xbf16>
    %39 = vector.shape_cast %38 : vector<1x80x4xbf16> to vector<80x4xbf16>
    %cst_34 = arith.constant dense<0.000000e+00> : vector<80x8xf32>
    %40 = tpu.matmul %39, %37, %cst_34 {dimension_numbers = #tpu.dot_dimension_numbers<[1], [0], [0], [1], [0, 0, 1, 1], [], []>} : vector<80x4xbf16>, vector<4x8xbf16>, vector<80x8xf32> -> vector<80x8xf32>
    %41 = arith.addf %36, %40 : vector<80x8xf32>
    %c32 = arith.constant 32 : index
    %c0_35 = arith.constant 0 : index
    %42 = vector.load %arg2[%c32, %c0_35] : memref<36x8xbf16, #tpu.memory_space<vmem>>, vector<4x8xbf16>
    %c0_36 = arith.constant 0 : index
    %c11 = arith.constant 11 : index
    %c0_37 = arith.constant 0 : index
    %43 = vector.load %arg1[%c0_36, %c11, %c0_37] : memref<1x400x4xbf16, #tpu.memory_space<vmem>>, vector<1x80x4xbf16>
    %44 = vector.shape_cast %43 : vector<1x80x4xbf16> to vector<80x4xbf16>
    %cst_38 = arith.constant dense<0.000000e+00> : vector<80x8xf32>
    %45 = tpu.matmul %44, %42, %cst_38 {dimension_numbers = #tpu.dot_dimension_numbers<[1], [0], [0], [1], [0, 0, 1, 1], [], []>} : vector<80x4xbf16>, vector<4x8xbf16>, vector<80x8xf32> -> vector<80x8xf32>
    %46 = arith.addf %41, %45 : vector<80x8xf32>
    %c0_39 = arith.constant 0 : index
    %c0_40 = arith.constant 0 : index
    %47 = vector.load %arg6[%c0_39, %c0_40] : memref<4x8xf32, #tpu.memory_space<vmem>>, vector<1x8xf32>
    %48 = vector.broadcast %47 : vector<1x8xf32> to vector<80x8xf32>
    %49 = arith.addf %46, %48 : vector<80x8xf32>
    %cst_41 = arith.constant 2.000000e-01 : f32
    %50 = vector.broadcast %cst_41 : f32 to vector<80x8xf32>
    %51 = arith.mulf %50, %49 : vector<80x8xf32>
    %52 = arith.maximumf %49, %51 : vector<80x8xf32>
    %53 = vector.broadcast %0 : vector<80x1xf32> to vector<80x8xf32>
    %54 = arith.mulf %52, %53 : vector<80x8xf32>
    %cst_42 = arith.constant 0.000000e+00 : bf16
    %55 = vector.broadcast %cst_42 : bf16 to vector<104x8xbf16>
    %c0_43 = arith.constant 0 : index
    %c0_44 = arith.constant 0 : index
    %56 = vector.load %arg9[%c0_43, %c0_44] : memref<104x8xbf16, #tpu.memory_space<vmem>>, vector<104x8xbf16>
    tpu.vector_store %arg9[%c0_43, %c0_44], %55 {strides = array<i32>} : memref<104x8xbf16, #tpu.memory_space<vmem>>, vector<104x8xbf16>,
    %57 = arith.truncf %54 : vector<80x8xf32> to vector<80x8xbf16>
    %c11_45 = arith.constant 11 : index
    %c0_46 = arith.constant 0 : index
    %58 = vector.load %arg9[%c11_45, %c0_46] : memref<104x8xbf16, #tpu.memory_space<vmem>>, vector<80x8xbf16>
    tpu.vector_store %arg9[%c11_45, %c0_46], %57 {strides = array<i32>} : memref<104x8xbf16, #tpu.memory_space<vmem>>, vector<80x8xbf16>,
    %c0_47 = arith.constant 0 : index
    %c300_48 = arith.constant 300 : index
    %c0_49 = arith.constant 0 : index
    %59 = vector.load %arg1[%c0_47, %c300_48, %c0_49] : memref<1x400x4xbf16, #tpu.memory_space<vmem>>, vector<1x80x4xbf16>
    %60 = vector.shape_cast %59 : vector<1x80x4xbf16> to vector<80x4xbf16>
    %c0_50 = arith.constant 0 : index
    %c0_51 = arith.constant 0 : index
    %61 = vector.load %arg3[%c0_50, %c0_51] : memref<4x8xbf16, #tpu.memory_space<vmem>>, vector<4x8xbf16>
    %cst_52 = arith.constant dense<0.000000e+00> : vector<80x8xf32>
    %62 = tpu.matmul %60, %61, %cst_52 {dimension_numbers = #tpu.dot_dimension_numbers<[1], [0], [0], [1], [0, 0, 1, 1], [], []>} : vector<80x4xbf16>, vector<4x8xbf16>, vector<80x8xf32> -> vector<80x8xf32>
    %c1_53 = arith.constant 1 : index
    %c0_54 = arith.constant 0 : index
    %63 = vector.load %arg6[%c1_53, %c0_54] : memref<4x8xf32, #tpu.memory_space<vmem>>, vector<1x8xf32>
    %64 = vector.broadcast %63 : vector<1x8xf32> to vector<80x8xf32>
    %65 = arith.addf %62, %64 : vector<80x8xf32>
    %cst_55 = arith.constant 0.000000e+00 : f32
    %66 = vector.broadcast %cst_55 : f32 to vector<80x8xf32>
    %c0_56 = arith.constant 0 : index
    %c0_57 = arith.constant 0 : index
    %67 = vector.load %arg4[%c0_56, %c0_57] : memref<72x8xbf16, #tpu.memory_space<vmem>>, vector<8x8xbf16>
    %c0_58 = arith.constant 0 : index
    %c0_59 = arith.constant 0 : index
    %68 = vector.load %arg9[%c0_58, %c0_59] : memref<104x8xbf16, #tpu.memory_space<vmem>>, vector<80x8xbf16>
    %cst_60 = arith.constant dense<0.000000e+00> : vector<80x8xf32>
    %69 = tpu.matmul %68, %67, %cst_60 {dimension_numbers = #tpu.dot_dimension_numbers<[1], [0], [0], [1], [0, 0, 1, 1], [], []>} : vector<80x8xbf16>, vector<8x8xbf16>, vector<80x8xf32> -> vector<80x8xf32>
    %70 = arith.addf %66, %69 : vector<80x8xf32>
    %c8_61 = arith.constant 8 : index
    %c0_62 = arith.constant 0 : index
    %71 = vector.load %arg4[%c8_61, %c0_62] : memref<72x8xbf16, #tpu.memory_space<vmem>>, vector<8x8xbf16>
    %c1_63 = arith.constant 1 : index
    %c0_64 = arith.constant 0 : index
    %72 = vector.load %arg9[%c1_63, %c0_64] : memref<104x8xbf16, #tpu.memory_space<vmem>>, vector<80x8xbf16>
    %cst_65 = arith.constant dense<0.000000e+00> : vector<80x8xf32>
    %73 = tpu.matmul %72, %71, %cst_65 {dimension_numbers = #tpu.dot_dimension_numbers<[1], [0], [0], [1], [0, 0, 1, 1], [], []>} : vector<80x8xbf16>, vector<8x8xbf16>, vector<80x8xf32> -> vector<80x8xf32>
    %74 = arith.addf %70, %73 : vector<80x8xf32>
    %c16_66 = arith.constant 16 : index
    %c0_67 = arith.constant 0 : index
    %75 = vector.load %arg4[%c16_66, %c0_67] : memref<72x8xbf16, #tpu.memory_space<vmem>>, vector<8x8xbf16>
    %c2 = arith.constant 2 : index
    %c0_68 = arith.constant 0 : index
    %76 = vector.load %arg9[%c2, %c0_68] : memref<104x8xbf16, #tpu.memory_space<vmem>>, vector<80x8xbf16>
    %cst_69 = arith.constant dense<0.000000e+00> : vector<80x8xf32>
    %77 = tpu.matmul %76, %75, %cst_69 {dimension_numbers = #tpu.dot_dimension_numbers<[1], [0], [0], [1], [0, 0, 1, 1], [], []>} : vector<80x8xbf16>, vector<8x8xbf16>, vector<80x8xf32> -> vector<80x8xf32>
    %78 = arith.addf %74, %77 : vector<80x8xf32>
    %c24_70 = arith.constant 24 : index
    %c0_71 = arith.constant 0 : index
    %79 = vector.load %arg4[%c24_70, %c0_71] : memref<72x8xbf16, #tpu.memory_space<vmem>>, vector<8x8xbf16>
    %c10_72 = arith.constant 10 : index
    %c0_73 = arith.constant 0 : index
    %80 = vector.load %arg9[%c10_72, %c0_73] : memref<104x8xbf16, #tpu.memory_space<vmem>>, vector<80x8xbf16>
    %cst_74 = arith.constant dense<0.000000e+00> : vector<80x8xf32>
    %81 = tpu.matmul %80, %79, %cst_74 {dimension_numbers = #tpu.dot_dimension_numbers<[1], [0], [0], [1], [0, 0, 1, 1], [], []>} : vector<80x8xbf16>, vector<8x8xbf16>, vector<80x8xf32> -> vector<80x8xf32>
    %82 = arith.addf %78, %81 : vector<80x8xf32>
    %c32_75 = arith.constant 32 : index
    %c0_76 = arith.constant 0 : index
    %83 = vector.load %arg4[%c32_75, %c0_76] : memref<72x8xbf16, #tpu.memory_space<vmem>>, vector<8x8xbf16>
    %c11_77 = arith.constant 11 : index
    %c0_78 = arith.constant 0 : index
    %84 = vector.load %arg9[%c11_77, %c0_78] : memref<104x8xbf16, #tpu.memory_space<vmem>>, vector<80x8xbf16>
    %cst_79 = arith.constant dense<0.000000e+00> : vector<80x8xf32>
    %85 = tpu.matmul %84, %83, %cst_79 {dimension_numbers = #tpu.dot_dimension_numbers<[1], [0], [0], [1], [0, 0, 1, 1], [], []>} : vector<80x8xbf16>, vector<8x8xbf16>, vector<80x8xf32> -> vector<80x8xf32>
    %86 = arith.addf %82, %85 : vector<80x8xf32>
    %c40 = arith.constant 40 : index
    %c0_80 = arith.constant 0 : index
    %87 = vector.load %arg4[%c40, %c0_80] : memref<72x8xbf16, #tpu.memory_space<vmem>>, vector<8x8xbf16>
    %c12_81 = arith.constant 12 : index
    %c0_82 = arith.constant 0 : index
    %88 = vector.load %arg9[%c12_81, %c0_82] : memref<104x8xbf16, #tpu.memory_space<vmem>>, vector<80x8xbf16>
    %cst_83 = arith.constant dense<0.000000e+00> : vector<80x8xf32>
    %89 = tpu.matmul %88, %87, %cst_83 {dimension_numbers = #tpu.dot_dimension_numbers<[1], [0], [0], [1], [0, 0, 1, 1], [], []>} : vector<80x8xbf16>, vector<8x8xbf16>, vector<80x8xf32> -> vector<80x8xf32>
    %90 = arith.addf %86, %89 : vector<80x8xf32>
    %c48 = arith.constant 48 : index
    %c0_84 = arith.constant 0 : index
    %91 = vector.load %arg4[%c48, %c0_84] : memref<72x8xbf16, #tpu.memory_space<vmem>>, vector<8x8xbf16>
    %c20_85 = arith.constant 20 : index
    %c0_86 = arith.constant 0 : index
    %92 = vector.load %arg9[%c20_85, %c0_86] : memref<104x8xbf16, #tpu.memory_space<vmem>>, vector<80x8xbf16>
    %cst_87 = arith.constant dense<0.000000e+00> : vector<80x8xf32>
    %93 = tpu.matmul %92, %91, %cst_87 {dimension_numbers = #tpu.dot_dimension_numbers<[1], [0], [0], [1], [0, 0, 1, 1], [], []>} : vector<80x8xbf16>, vector<8x8xbf16>, vector<80x8xf32> -> vector<80x8xf32>
    %94 = arith.addf %90, %93 : vector<80x8xf32>
    %c56 = arith.constant 56 : index
    %c0_88 = arith.constant 0 : index
    %95 = vector.load %arg4[%c56, %c0_88] : memref<72x8xbf16, #tpu.memory_space<vmem>>, vector<8x8xbf16>
    %c21 = arith.constant 21 : index
    %c0_89 = arith.constant 0 : index
    %96 = vector.load %arg9[%c21, %c0_89] : memref<104x8xbf16, #tpu.memory_space<vmem>>, vector<80x8xbf16>
    %cst_90 = arith.constant dense<0.000000e+00> : vector<80x8xf32>
    %97 = tpu.matmul %96, %95, %cst_90 {dimension_numbers = #tpu.dot_dimension_numbers<[1], [0], [0], [1], [0, 0, 1, 1], [], []>} : vector<80x8xbf16>, vector<8x8xbf16>, vector<80x8xf32> -> vector<80x8xf32>
    %98 = arith.addf %94, %97 : vector<80x8xf32>
    %c64 = arith.constant 64 : index
    %c0_91 = arith.constant 0 : index
    %99 = vector.load %arg4[%c64, %c0_91] : memref<72x8xbf16, #tpu.memory_space<vmem>>, vector<8x8xbf16>
    %c22 = arith.constant 22 : index
    %c0_92 = arith.constant 0 : index
    %100 = vector.load %arg9[%c22, %c0_92] : memref<104x8xbf16, #tpu.memory_space<vmem>>, vector<80x8xbf16>
    %cst_93 = arith.constant dense<0.000000e+00> : vector<80x8xf32>
    %101 = tpu.matmul %100, %99, %cst_93 {dimension_numbers = #tpu.dot_dimension_numbers<[1], [0], [0], [1], [0, 0, 1, 1], [], []>} : vector<80x8xbf16>, vector<8x8xbf16>, vector<80x8xf32> -> vector<80x8xf32>
    %102 = arith.addf %98, %101 : vector<80x8xf32>
    %c2_94 = arith.constant 2 : index
    %c0_95 = arith.constant 0 : index
    %103 = vector.load %arg6[%c2_94, %c0_95] : memref<4x8xf32, #tpu.memory_space<vmem>>, vector<1x8xf32>
    %104 = vector.broadcast %103 : vector<1x8xf32> to vector<80x8xf32>
    %105 = arith.addf %102, %104 : vector<80x8xf32>
    %106 = vector.broadcast %0 : vector<80x1xf32> to vector<80x8xf32>
    %107 = arith.mulf %105, %106 : vector<80x8xf32>
    %cst_96 = arith.constant 0.000000e+00 : bf16
    %108 = vector.broadcast %cst_96 : bf16 to vector<104x8xbf16>
    %c0_97 = arith.constant 0 : index
    %c0_98 = arith.constant 0 : index
    %109 = vector.load %arg10[%c0_97, %c0_98] : memref<104x8xbf16, #tpu.memory_space<vmem>>, vector<104x8xbf16>
    tpu.vector_store %arg10[%c0_97, %c0_98], %108 {strides = array<i32>} : memref<104x8xbf16, #tpu.memory_space<vmem>>, vector<104x8xbf16>,
    %110 = arith.truncf %107 : vector<80x8xf32> to vector<80x8xbf16>
    %c11_99 = arith.constant 11 : index
    %c0_100 = arith.constant 0 : index
    %111 = vector.load %arg10[%c11_99, %c0_100] : memref<104x8xbf16, #tpu.memory_space<vmem>>, vector<80x8xbf16>
    tpu.vector_store %arg10[%c11_99, %c0_100], %110 {strides = array<i32>} : memref<104x8xbf16, #tpu.memory_space<vmem>>, vector<80x8xbf16>,
    %cst_101 = arith.constant 0.000000e+00 : f32
    %112 = vector.broadcast %cst_101 : f32 to vector<80x8xf32>
    %c0_102 = arith.constant 0 : index
    %c0_103 = arith.constant 0 : index
    %113 = vector.load %arg5[%c0_102, %c0_103] : memref<72x8xbf16, #tpu.memory_space<vmem>>, vector<8x8xbf16>
    %c0_104 = arith.constant 0 : index
    %c0_105 = arith.constant 0 : index
    %114 = vector.load %arg10[%c0_104, %c0_105] : memref<104x8xbf16, #tpu.memory_space<vmem>>, vector<80x8xbf16>
    %cst_106 = arith.constant dense<0.000000e+00> : vector<80x8xf32>
    %115 = tpu.matmul %114, %113, %cst_106 {dimension_numbers = #tpu.dot_dimension_numbers<[1], [0], [0], [1], [0, 0, 1, 1], [], []>} : vector<80x8xbf16>, vector<8x8xbf16>, vector<80x8xf32> -> vector<80x8xf32>
    %116 = arith.addf %112, %115 : vector<80x8xf32>
    %c8_107 = arith.constant 8 : index
    %c0_108 = arith.constant 0 : index
    %117 = vector.load %arg5[%c8_107, %c0_108] : memref<72x8xbf16, #tpu.memory_space<vmem>>, vector<8x8xbf16>
    %c1_109 = arith.constant 1 : index
    %c0_110 = arith.constant 0 : index
    %118 = vector.load %arg10[%c1_109, %c0_110] : memref<104x8xbf16, #tpu.memory_space<vmem>>, vector<80x8xbf16>
    %cst_111 = arith.constant dense<0.000000e+00> : vector<80x8xf32>
    %119 = tpu.matmul %118, %117, %cst_111 {dimension_numbers = #tpu.dot_dimension_numbers<[1], [0], [0], [1], [0, 0, 1, 1], [], []>} : vector<80x8xbf16>, vector<8x8xbf16>, vector<80x8xf32> -> vector<80x8xf32>
    %120 = arith.addf %116, %119 : vector<80x8xf32>
    %c16_112 = arith.constant 16 : index
    %c0_113 = arith.constant 0 : index
    %121 = vector.load %arg5[%c16_112, %c0_113] : memref<72x8xbf16, #tpu.memory_space<vmem>>, vector<8x8xbf16>
    %c2_114 = arith.constant 2 : index
    %c0_115 = arith.constant 0 : index
    %122 = vector.load %arg10[%c2_114, %c0_115] : memref<104x8xbf16, #tpu.memory_space<vmem>>, vector<80x8xbf16>
    %cst_116 = arith.constant dense<0.000000e+00> : vector<80x8xf32>
    %123 = tpu.matmul %122, %121, %cst_116 {dimension_numbers = #tpu.dot_dimension_numbers<[1], [0], [0], [1], [0, 0, 1, 1], [], []>} : vector<80x8xbf16>, vector<8x8xbf16>, vector<80x8xf32> -> vector<80x8xf32>
    %124 = arith.addf %120, %123 : vector<80x8xf32>
    %c24_117 = arith.constant 24 : index
    %c0_118 = arith.constant 0 : index
    %125 = vector.load %arg5[%c24_117, %c0_118] : memref<72x8xbf16, #tpu.memory_space<vmem>>, vector<8x8xbf16>
    %c10_119 = arith.constant 10 : index
    %c0_120 = arith.constant 0 : index
    %126 = vector.load %arg10[%c10_119, %c0_120] : memref<104x8xbf16, #tpu.memory_space<vmem>>, vector<80x8xbf16>
    %cst_121 = arith.constant dense<0.000000e+00> : vector<80x8xf32>
    %127 = tpu.matmul %126, %125, %cst_121 {dimension_numbers = #tpu.dot_dimension_numbers<[1], [0], [0], [1], [0, 0, 1, 1], [], []>} : vector<80x8xbf16>, vector<8x8xbf16>, vector<80x8xf32> -> vector<80x8xf32>
    %128 = arith.addf %124, %127 : vector<80x8xf32>
    %c32_122 = arith.constant 32 : index
    %c0_123 = arith.constant 0 : index
    %129 = vector.load %arg5[%c32_122, %c0_123] : memref<72x8xbf16, #tpu.memory_space<vmem>>, vector<8x8xbf16>
    %c11_124 = arith.constant 11 : index
    %c0_125 = arith.constant 0 : index
    %130 = vector.load %arg10[%c11_124, %c0_125] : memref<104x8xbf16, #tpu.memory_space<vmem>>, vector<80x8xbf16>
    %cst_126 = arith.constant dense<0.000000e+00> : vector<80x8xf32>
    %131 = tpu.matmul %130, %129, %cst_126 {dimension_numbers = #tpu.dot_dimension_numbers<[1], [0], [0], [1], [0, 0, 1, 1], [], []>} : vector<80x8xbf16>, vector<8x8xbf16>, vector<80x8xf32> -> vector<80x8xf32>
    %132 = arith.addf %128, %131 : vector<80x8xf32>
    %c40_127 = arith.constant 40 : index
    %c0_128 = arith.constant 0 : index
    %133 = vector.load %arg5[%c40_127, %c0_128] : memref<72x8xbf16, #tpu.memory_space<vmem>>, vector<8x8xbf16>
    %c12_129 = arith.constant 12 : index
    %c0_130 = arith.constant 0 : index
    %134 = vector.load %arg10[%c12_129, %c0_130] : memref<104x8xbf16, #tpu.memory_space<vmem>>, vector<80x8xbf16>
    %cst_131 = arith.constant dense<0.000000e+00> : vector<80x8xf32>
    %135 = tpu.matmul %134, %133, %cst_131 {dimension_numbers = #tpu.dot_dimension_numbers<[1], [0], [0], [1], [0, 0, 1, 1], [], []>} : vector<80x8xbf16>, vector<8x8xbf16>, vector<80x8xf32> -> vector<80x8xf32>
    %136 = arith.addf %132, %135 : vector<80x8xf32>
    %c48_132 = arith.constant 48 : index
    %c0_133 = arith.constant 0 : index
    %137 = vector.load %arg5[%c48_132, %c0_133] : memref<72x8xbf16, #tpu.memory_space<vmem>>, vector<8x8xbf16>
    %c20_134 = arith.constant 20 : index
    %c0_135 = arith.constant 0 : index
    %138 = vector.load %arg10[%c20_134, %c0_135] : memref<104x8xbf16, #tpu.memory_space<vmem>>, vector<80x8xbf16>
    %cst_136 = arith.constant dense<0.000000e+00> : vector<80x8xf32>
    %139 = tpu.matmul %138, %137, %cst_136 {dimension_numbers = #tpu.dot_dimension_numbers<[1], [0], [0], [1], [0, 0, 1, 1], [], []>} : vector<80x8xbf16>, vector<8x8xbf16>, vector<80x8xf32> -> vector<80x8xf32>
    %140 = arith.addf %136, %139 : vector<80x8xf32>
    %c56_137 = arith.constant 56 : index
    %c0_138 = arith.constant 0 : index
    %141 = vector.load %arg5[%c56_137, %c0_138] : memref<72x8xbf16, #tpu.memory_space<vmem>>, vector<8x8xbf16>
    %c21_139 = arith.constant 21 : index
    %c0_140 = arith.constant 0 : index
    %142 = vector.load %arg10[%c21_139, %c0_140] : memref<104x8xbf16, #tpu.memory_space<vmem>>, vector<80x8xbf16>
    %cst_141 = arith.constant dense<0.000000e+00> : vector<80x8xf32>
    %143 = tpu.matmul %142, %141, %cst_141 {dimension_numbers = #tpu.dot_dimension_numbers<[1], [0], [0], [1], [0, 0, 1, 1], [], []>} : vector<80x8xbf16>, vector<8x8xbf16>, vector<80x8xf32> -> vector<80x8xf32>
    %144 = arith.addf %140, %143 : vector<80x8xf32>
    %c64_142 = arith.constant 64 : index
    %c0_143 = arith.constant 0 : index
    %145 = vector.load %arg5[%c64_142, %c0_143] : memref<72x8xbf16, #tpu.memory_space<vmem>>, vector<8x8xbf16>
    %c22_144 = arith.constant 22 : index
    %c0_145 = arith.constant 0 : index
    %146 = vector.load %arg10[%c22_144, %c0_145] : memref<104x8xbf16, #tpu.memory_space<vmem>>, vector<80x8xbf16>
    %cst_146 = arith.constant dense<0.000000e+00> : vector<80x8xf32>
    %147 = tpu.matmul %146, %145, %cst_146 {dimension_numbers = #tpu.dot_dimension_numbers<[1], [0], [0], [1], [0, 0, 1, 1], [], []>} : vector<80x8xbf16>, vector<8x8xbf16>, vector<80x8xf32> -> vector<80x8xf32>
    %148 = arith.addf %144, %147 : vector<80x8xf32>
    %c3 = arith.constant 3 : index
    %c0_147 = arith.constant 0 : index
    %149 = vector.load %arg6[%c3, %c0_147] : memref<4x8xf32, #tpu.memory_space<vmem>>, vector<1x8xf32>
    %150 = vector.broadcast %149 : vector<1x8xf32> to vector<80x8xf32>
    %151 = arith.addf %148, %150 : vector<80x8xf32>
    %152 = arith.addf %151, %65 : vector<80x8xf32>
    %cst_148 = arith.constant 2.000000e-01 : f32
    %153 = vector.broadcast %cst_148 : f32 to vector<80x8xf32>
    %154 = arith.mulf %153, %152 : vector<80x8xf32>
    %155 = arith.maximumf %152, %154 : vector<80x8xf32>
    %c0_149 = arith.constant 0 : index
    %c0_150 = arith.constant 0 : index
    %c0_151 = arith.constant 0 : index
    %156 = vector.load %arg8[%c0_149, %c0_150, %c0_151] : memref<1x80x8xf32, #tpu.memory_space<vmem>>, vector<1x80x8xf32>
    %157 = vector.shape_cast %156 : vector<1x80x8xf32> to vector<80x8xf32>
    %158 = vector.shape_cast %155 : vector<80x8xf32> to vector<1x80x8xf32>
    tpu.vector_store %arg8[%c0_149, %c0_150, %c0_151], %158 {strides = array<i32>} : memref<1x80x8xf32, #tpu.memory_space<vmem>>, vector<1x80x8xf32>,
    return
  }
  func.func @transform_0(%arg0: i32) -> (i32, i32, i32) {
    %c0_i32 = arith.constant 0 : i32
    %c0_i32_0 = arith.constant 0 : i32
    %c0_i32_1 = arith.constant 0 : i32
    return %arg0, %c0_i32, %c0_i32_0 : i32, i32, i32
  }
  func.func @transform_1(%arg0: i32) -> (i32, i32) {
    %c0_i32 = arith.constant 0 : i32
    %c0_i32_0 = arith.constant 0 : i32
    %c0_i32_1 = arith.constant 0 : i32
    return %c0_i32, %c0_i32_0 : i32, i32
  }
  func.func @transform_2(%arg0: i32) -> (i32, i32) {
    %c0_i32 = arith.constant 0 : i32
    %c0_i32_0 = arith.constant 0 : i32
    %c0_i32_1 = arith.constant 0 : i32
    return %c0_i32, %c0_i32_0 : i32, i32
  }
  func.func @transform_3(%arg0: i32) -> (i32, i32) {
    %c0_i32 = arith.constant 0 : i32
    %c0_i32_0 = arith.constant 0 : i32
    %c0_i32_1 = arith.constant 0 : i32
    return %c0_i32, %c0_i32_0 : i32, i32
  }
  func.func @transform_4(%arg0: i32) -> (i32, i32) {
    %c0_i32 = arith.constant 0 : i32
    %c0_i32_0 = arith.constant 0 : i32
    %c0_i32_1 = arith.constant 0 : i32
    return %c0_i32, %c0_i32_0 : i32, i32
  }
  func.func @transform_5(%arg0: i32) -> (i32, i32) {
    %c0_i32 = arith.constant 0 : i32
    %c0_i32_0 = arith.constant 0 : i32
    %c0_i32_1 = arith.constant 0 : i32
    return %c0_i32, %c0_i32_0 : i32, i32
  }
  func.func @transform_6(%arg0: i32) -> (i32, i32) {
    %c0_i32 = arith.constant 0 : i32
    %c0_i32_0 = arith.constant 0 : i32
    %c0_i32_1 = arith.constant 0 : i32
    return %c0_i32, %c0_i32_0 : i32, i32
  }
  func.func @transform_7(%arg0: i32) -> (i32, i32, i32) {
    %c0_i32 = arith.constant 0 : i32
    %c0_i32_0 = arith.constant 0 : i32
    %c0_i32_1 = arith.constant 0 : i32
    return %arg0, %c0_i32, %c0_i32_0 : i32, i32, i32
  }
}

</mosaic_0001>

<bundles_post_ra>
// kernel: simple_block_forward.1
= control target key start
LH: loop header
LB: loop body
LE: loop exit
PB: predicated region body
PF: predicated region fallthrough
CT: control target
= control target key end

     0   :  { %s6347_s24 = smov 0   ;;  %s7761_s0 = inlined_call_operand.vmem [shape: bf16[2,400,4], index: 0, kind: input, shape index: {}]   ;;  %s7762_s1 = inlined_call_operand.vmem [shape: bf16[36,8], index: 1, kind: input, shape index: {}]   ;;  %s7763_s2 = inlined_call_operand.vmem [shape: bf16[4,8], index: 2, kind: input, shape index: {}]   ;;  %s7764_s3 = inlined_call_operand.vmem [shape: bf16[72,8], index: 3, kind: input, shape index: {}]   ;;  %s7765_s4 = inlined_call_operand.vmem [shape: bf16[72,8], index: 4, kind: input, shape index: {}]   ;;  %s7766_s5 = inlined_call_operand.vmem [shape: f32[4,8], index: 5, kind: input, shape index: {}]   ;;  %s7767_s6 = inlined_call_operand.vmem [shape: f32[80,1], index: 6, kind: input, shape index: {}]   ;;  %s7768_s7 = inlined_call_operand.vmem [shape: f32[2,80,8], index: 7, kind: output, shape index: {}]  }
   0x1 LB: > { %s4899_s25 = sadd.s32 4294967295, %s6302_s24   ;;  %p4903_p0 = scmp.ge.s32.totalorder %s6302_s24, 1  ;;  %s6302_s24 = sphi %s6347_s24, %s17_s24  }
   0x2   : > { %p237_p1 = scmp.lt.s32.totalorder %s6302_s24, 3 }
   0x4   : > { %p238_p2 = pnand %p4903_p0, %p237_p1 }
   0x5   : > { %v6194_v0 = vld [vmem:[%s7762_s1] ss:$0 sps:$4 sm:$0xcc] (!%p238_p2)   ;;  %v6304_v1 = vmov (!%p238_p2), 0.0   ;;  %vm373_vm0 = vcmask (!%p238_p2), 1041408   ;;  %p269_p3 = scmp.lt.s32.totalorder (!%p238_p2), %s4899_s25, 1 }
   0x6   : > { %241 = sbr.rel (%p238_p2) target bundleno = 1579 (0x62b), region = 48  ;;  %5363 = vmatprep.subr.bf16.mxu0 (!%p238_p2), %v6304_v1  ;;  %5561 = vmatprep.subr.bf16.mxu1 (!%p238_p2), %v6304_v1  ;;  %v356_v2 = vrot.slane (!%p238_p2), %v6194_v0, 2  ;;  %vm6305_vm1 = vmmov (!%p238_p2), 0   ;;  %v290_v4 = vld [vmem:[%s7762_s1] sm:$0x3] (!%p238_p2)  ;;  %vm341_vm2 = vcmask (!%p238_p2), 1045504  }
   0x7   : > { %5365 = vmatprep.mubr.msk.bf16.mxu0 (!%p238_p2), %vm6305_vm1, %v6304_v1  ;;  %5563 = vmatprep.mubr.msk.bf16.mxu1 (!%p238_p2), %vm6305_vm1, %v6304_v1  ;;  %vm357_vm3 = vcmask (!%p238_p2), 31744   ;;  %v491_v10 = vsel (!%p238_p2), %vm373_vm0, %v290_v4, 0  ;;  %v566_v23 = vld [vmem:[%s7762_s1 + $0x4] sm:$0x3] (!%p238_p2)  ;;  %vm606_vm4 = vsmask.f32 (!%p238_p2), 7424 }
   0x8   : > { %v375_v3 = vsel (!%p238_p2), %vm373_vm0, %v356_v2, 0  ;;  %v667_v25 = vsel (!%p238_p2), %vm373_vm0, %v566_v23, 0  ;;  %v6208_v36 = vld [vmem:[%s7762_s1 + $0x4] ss:$0 sps:$4 sm:$0xcc] (!%p238_p2)   ;;  %vm1274_vm5 = vcmask (!%p238_p2), 1046528  }
   0x9   : > { %5364 = vmatpush3.bf16.msra.mxu0 (!%p238_p2), %v375_v3  ;;  %v791_v40 = vrot.slane (!%p238_p2), %v6208_v36, 2  ;;  %v893_v3 = vld [vmem:[%s7762_s1 + $0x8] sm:$0x3] (!%p238_p2)  ;;  %vm1427_vm6 = vcmask (!%p238_p2), 1044480   ;;  %vm1549_vm7 = vsmask.f32 (!%p238_p2), 6400 }
   0xa   : > { %5385 = vmatprep.subr.bf16.mxu0 (!%p238_p2), %v6304_v1  ;;  %vm1799_vm8 = vcmask (!%p238_p2), 60416   ;;  %vm2224_vm9 = vcmask (!%p238_p2), 1043456   ;;  %vm1956_vm10 = vcmask (!%p238_p2), 60417   ;;  %vm1957_vm11 = vsmask.f32 (!%p238_p2), 7942 }
   0xb   : > { %v808_v44 = vsel (!%p238_p2), %vm373_vm0, %v791_v40, 0  ;;  %vm1843_vm12 = vsmask.f32 (!%p238_p2), 1280  ;;  %vm1844_vm13 = vsmask.f32 (!%p238_p2), 5392  ;;  %vm6909_vm14 = vmand (!%p238_p2), %vm1956_vm10, %vm1957_vm11 }
   0xc   : > { %vm6916_vm15 = vmor (!%p238_p2), %vm1843_vm12, %vm1844_vm13  ;;  %vm3089_vm11 = vsmask.f32 (!%p238_p2), 5376 }
   0xd   : > { %s7776_s25 = smov (!%p269_p3, %s4899_s25), 1 }
   0xe   : > { %s6179_s28 = smul.u32 200, %s7776_s25 }
  0x10   : > { %s6372_s8 = scalar_lea.vmem %s7761_s0, %s6179_s28 }
  0x11   : > { %v6195_v5 = vld [vmem:[%s6372_s8 + $0x30] sm:$0xfc]   ;;  %v6196_v6 = vld [vmem:[%s6372_s8 + $0x38] sm:$0xff]   ;;  %v6197_v7 = vld [vmem:[%s6372_s8 + $0x40] sm:$0xff]  }
  0x12   : > { %v342_v8 = vrot.slane %v6195_v5, 2  ;;  %v343_v9 = vrot.slane %v6196_v6, 2  ;;  %v345_v12 = vrot.slane %v6197_v7, 2  ;;  %v6198_v14 = vld [vmem:[%s6372_s8 + $0x48] sm:$0xff]   ;;  %v6199_v17 = vld [vmem:[%s6372_s8 + $0x50] sm:$0xff]   ;;  %v6201_v24 = vld [vmem:[%s6372_s8] sm:$0xff]  }
  0x13   : > { %v347_v15 = vrot.slane %v6198_v14, 2  ;;  %v349_v18 = vrot.slane %v6199_v17, 2  ;;  %v6200_v19 = vld [vmem:[%s6372_s8 + $0x58] ss:$0 sps:$4 sm:$0x33]   ;;  %v6202_v26 = vld [vmem:[%s6372_s8 + $0x8] sm:$0xff]  }
  0x14   : > { %v344_v11 = vsel %vm341_vm2, %v342_v8, %v343_v9  ;;  %v346_v13 = vsel %vm341_vm2, %v343_v9, %v345_v12  ;;  %v351_v21 = vrot.slane %v6200_v19, 2  ;;  %v6203_v27 = vld [vmem:[%s6372_s8 + $0x10] sm:$0xff]   ;;  %v6204_v28 = vld [vmem:[%s6372_s8 + $0x18] sm:$0xff]   ;;  %v6206_v29 = vld [vmem:[%s6372_s8] sm:$0xff]   ;;  %v960_v5 = vsel %vm373_vm0, %v893_v3, 0 }
  0x15   : > { %5366 = vmatmul.mubr.msk.bf16.vlgmr.msra.gmra.mrb[0].mxu0 %vm357_vm3, %v344_v11  ;;  %v348_v16 = vsel %vm341_vm2, %v345_v12, %v347_v15  ;;  %v350_v20 = vsel %vm341_vm2, %v347_v15, %v349_v18  ;;  %v6207_v30 = vld [vmem:[%s6372_s8 + $0x8] sm:$0xff]   ;;  %v610_v31 = vshll.u32 %v6206_v29, 16  ;;  %v6205_v32 = vld [vmem:[%s6372_s8 + $0x20] sm:$0xff]   ;;  %v608_v33 = vshrl.u32 %v6206_v29, 16  ;;  %v6209_v39 = vld [vmem:[%s6372_s8 + $0x10] sm:$0xff]  }
  0x16   : > { %5386 = vmatpush3.bf16.msra.mxu0 %v491_v10  ;;  %5369 = vmatprep.mubr.msk.bf16.mxu0 %vm6305_vm1, %v6304_v1  ;;  %v352_v22 = vsel %vm341_vm2, %v349_v18, %v351_v21  ;;  %v615_v35 = vshll.u32 %v6207_v30, 16  ;;  %v619_v42 = vshrl.u32 %v6207_v30, 16  ;;  %v623_v43 = vshll.u32 %v6209_v39, 16  ;;  %v6210_v47 = vld [vmem:[%s6372_s8 + $0x18] sm:$0xff]   ;;  %v6211_v53 = vld [vmem:[%s6372_s8 + $0x20] sm:$0xff]   ;;  %v6214_v6 = vld [vmem:[%s6372_s8 + $0x6c] sm:$0xff]  }
  0x17   : > { %5407 = vmatprep.subr.bf16.mxu0 %v6304_v1  ;;  %v612_v34 = vrot.slane %v610_v31, 1  ;;  %v627_v49 = vshrl.u32 %v6209_v39, 16  ;;  %v631_v50 = vshll.u32 %v6210_v47, 16  ;;  %v635_v55 = vshrl.u32 %v6210_v47, 16  ;;  %v6213_v4 = vld [vmem:[%s6372_s8 + $0x64] sm:$0xff]   ;;  %v6215_v7 = vld [vmem:[%s6372_s8 + $0x74] sm:$0xff]  }
  0x18   : > { %v617_v38 = vrot.slane %v615_v35, 1  ;;  %v625_v46 = vrot.slane %v623_v43, 1  ;;  %v639_v56 = vshll.u32 %v6211_v53, 16  ;;  %v6212_v59 = vld [vmem:[%s6372_s8 + $0x28] ss:$0 sps:$4 sm:$0x11]  }
  0x19   : > { %v613_v37 = vor.u32 %v612_v34, %v608_v33  ;;  %v633_v52 = vrot.slane %v631_v50, 1  ;;  %v643_v61 = vshrl.u32 %v6211_v53, 16  ;;  %v647_v62 = vshll.u32 %v6212_v59, 16  ;;  %v6216_v8 = vld [vmem:[%s6372_s8 + $0x7c] sm:$0xff]   ;;  %v6217_v9 = vld [vmem:[%s6372_s8 + $0x84] sm:$0xff]   ;;  %v6222_v21 = vld [vmem:[%s6372_s8 + $0xac] sm:$0xff]  }
  0x1a   : > { %v621_v45 = vor.u32 %v619_v42, %v617_v38  ;;  %v629_v51 = vor.u32 %v627_v49, %v625_v46  ;;  %v641_v58 = vrot.slane %v639_v56, 1  ;;  %v6218_v10 = vld [vmem:[%s6372_s8 + $0x94] sm:$0xfc]   ;;  %v6219_v11 = vld [vmem:[%s6372_s8 + $0x9c] sm:$0xff]   ;;  %v6221_v17 = vld [vmem:[%s6372_s8 + $0xa4] sm:$0xff]  }
  0x1b   : > { %v618_v41 = vsel %vm606_vm4, %v613_v37, %v617_v38  ;;  %v637_v57 = vor.u32 %v635_v55, %v633_v52  ;;  %v649_v0 = vrot.slane %v647_v62, 1  ;;  %v6220_v12 = vld [vmem:[%s7762_s1 + $0x8] ss:$0 sps:$4 sm:$0xcc]   ;;  %v934_v14 = vrot.slane %v6219_v11, 2  ;;  %v6226_v30 = vld [vmem:[%s6372_s8 + $0x6c] sm:$0xff]  }
  0x1c   : > { %v626_v48 = vsel %vm606_vm4, %v621_v45, %v625_v46  ;;  %v634_v54 = vsel %vm606_vm4, %v629_v51, %v633_v52  ;;  %v645_v63 = vor.u32 %v643_v61, %v641_v58  ;;  %v1132_v15 = vrot.slane %v6220_v12, 2  ;;  %v6227_v38 = vld [vmem:[%s6372_s8 + $0x74] sm:$0xff]   ;;  %v1234_v39 = vld [vmem:[%s7762_s1 + $0xc] sm:$0x3]  ;;  %v6228_v46 = vld [vmem:[%s6372_s8 + $0x7c] sm:$0xff]  }
  0x1d   : > { %5370 = vmatmul.mubr.msk.bf16.gmra.mrb[4].mxu0 %vm357_vm3, %v346_v13  ;;  %v642_v60 = vsel %vm606_vm4, %v637_v57, %v641_v58  ;;  %v933_v13 = vrot.slane %v6218_v10, 2  ;;  %v936_v19 = vrot.slane %v6221_v17, 2  ;;  %v1093_v35 = vshll.u32 %v6226_v30, 16  ;;  %v6229_v52 = vld [vmem:[%s6372_s8 + $0x84] sm:$0xff]  }
  0x1e   : > { %5373 = vmatprep.mubr.msk.bf16.mxu0 %vm6305_vm1, %v6304_v1  ;;  %v650_v2 = vsel %vm606_vm4, %v645_v63, %v649_v0  ;;  %v1149_v18 = vsel %vm373_vm0, %v1132_v15, 0  ;;  %v1101_v42 = vshll.u32 %v6227_v38, 16  ;;  %v1302_v43 = vsel %vm373_vm0, %v1234_v39, 0  ;;  %v6230_v62 = vld [vmem:[%s6372_s8 + $0x8c] ss:$0 sps:$4 sm:$0x11]  }
  0x1f   : > { %v1095_v37 = vrot.slane %v1093_v35, 1  ;;  %v1109_v49 = vshll.u32 %v6228_v46, 16  ;;  %v1113_v57 = vshrl.u32 %v6228_v46, 16  ;;  %v1117_v58 = vshll.u32 %v6229_v52, 16 }
  0x20   : > { %v1103_v45 = vrot.slane %v1101_v42, 1 }
  0x21   : > { %v1111_v51 = vrot.slane %v1109_v49, 1  ;;  %v1119_v61 = vrot.slane %v1117_v58, 1  ;;  %v6237_v49 = vld [vmem:[%s6372_s8 + $0x2c] ss:$0 sps:$4 sm:$0x11]  }
  0x22   : > { %v6238_v58 = vld [vmem:[%s6372_s8 + $0x34] sm:$0xf8]  }
  0x25   : > { %5374 = vmatmul.mubr.msk.bf16.gmra.mrb[8].mxu0 %vm357_vm3, %v348_v16  ;;  %v935_v16 = vsel %vm341_vm2, %v933_v13, %v934_v14  ;;  %v6550_v13 = vld [vmem:[%s6372_s8 + $0x4] sm:$0xfe]  }
  0x26   : > { %5377 = vmatprep.mubr.msk.bf16.mxu0 %vm6305_vm1, %v6304_v1  ;;  %v1275_v17 = vrot.slane %v6550_v13, 1 }
  0x2d   : > { %5378 = vmatmul.mubr.msk.bf16.gmra.mrb[12].mxu0 %vm357_vm3, %v350_v20  ;;  %v937_v20 = vsel %vm341_vm2, %v934_v14, %v936_v19  ;;  %v6553_v14 = vld [vmem:[%s6372_s8 + $0xc] sm:$0xff]  }
  0x2e   : > { %5381 = vmatprep.mubr.msk.bf16.mxu0 %vm6305_vm1, %v6304_v1 }
  0x35   : > { %5382 = vmatmul.mubr.msk.bf16.gmra.mrb[16].mxu0 %vm357_vm3, %v352_v22  ;;  %v938_v22 = vrot.slane %v6222_v21, 2 }
  0x36   : > { %5387 = vmatprep.mubr.msk.bf16.mxu0 %vm6305_vm1, %v6304_v1 }
  0x37   : > { %v939_v23 = vsel %vm341_vm2, %v936_v19, %v938_v22 }
  0x3d   : > { %5388 = vmatmul.mubr.msk.bf16.vlgmr.msra.gmra.mrb[20].mxu0 %vm357_vm3, %v6201_v24  ;;  %v6223_v24 = vld [vmem:[%s6372_s8 + $0xb4] sm:$0xff]  }
  0x3e   : > { %5408 = vmatpush3.bf16.msra.mxu0 %v667_v25  ;;  %5391 = vmatprep.mubr.msk.bf16.mxu0 %vm6305_vm1, %v6304_v1  ;;  %v940_v25 = vrot.slane %v6223_v24, 2  ;;  %v6569_v24 = vld [vmem:[%s6372_s8 + $0x14] sm:$0xff]  }
  0x3f   : > { %5429 = vmatprep.subr.bf16.mxu0 %v6304_v1 }
  0x45   : > { %5392 = vmatmul.mubr.msk.bf16.gmra.mrb[24].mxu0 %vm357_vm3, %v6202_v26  ;;  %v941_v26 = vsel %vm341_vm2, %v938_v22, %v940_v25 }
  0x46   : > { %5395 = vmatprep.mubr.msk.bf16.mxu0 %vm6305_vm1, %v6304_v1 }
  0x4d   : > { %5396 = vmatmul.mubr.msk.bf16.gmra.mrb[28].mxu0 %vm357_vm3, %v6203_v27  ;;  %v6224_v27 = vld [vmem:[%s6372_s8 + $0xbc] ss:$0 sps:$4 sm:$0x33]  }
  0x4e   : > { %5399 = vmatprep.mubr.msk.bf16.mxu0 %vm6305_vm1, %v6304_v1  ;;  %v942_v29 = vrot.slane %v6224_v27, 2  ;;  %v1278_v27 = vrot.slane %v6569_v24, 1 }
  0x55   : > { %5400 = vmatmul.mubr.msk.bf16.gmra.mrb[32].mxu0 %vm357_vm3, %v6204_v28  ;;  %v6225_v28 = vld [vmem:[%s6372_s8 + $0x64] sm:$0xff]  }
  0x56   : > { %5403 = vmatprep.mubr.msk.bf16.mxu0 %vm6305_vm1, %v6304_v1  ;;  %v1088_v31 = vshll.u32 %v6225_v28, 16  ;;  %v1086_v33 = vshrl.u32 %v6225_v28, 16 }
  0x58   : > { %v1090_v34 = vrot.slane %v1088_v31, 1 }
  0x5a   : > { %v1091_v36 = vor.u32 %v1090_v34, %v1086_v33 }
  0x5c   : > { %v1096_v40 = vsel %vm606_vm4, %v1091_v36, %v1095_v37 }
  0x5d   : > { %5404 = vmatmul.mubr.msk.bf16.gmra.mrb[36].mxu0 %vm357_vm3, %v6205_v32  ;;  %v943_v32 = vsel %vm341_vm2, %v940_v25, %v942_v29 }
  0x5e   : > { %5409 = vmatprep.mubr.msk.bf16.mxu0 %vm6305_vm1, %v6304_v1 }
  0x65   : > { %5410 = vmatmul.mubr.msk.bf16.vlgmr.msra.gmra.mrb[40].mxu0 %vm357_vm3, %v618_v41  ;;  %v1097_v41 = vshrl.u32 %v6226_v30, 16 }
  0x66   : > { %5430 = vmatpush3.bf16.msra.mxu0 %v808_v44  ;;  %5413 = vmatprep.mubr.msk.bf16.mxu0 %vm6305_vm1, %v6304_v1 }
  0x67   : > { %5451 = vmatprep.subr.bf16.mxu0 %v6304_v1  ;;  %v1099_v44 = vor.u32 %v1097_v41, %v1095_v37 }
  0x69   : > { %v1104_v47 = vsel %vm606_vm4, %v1099_v44, %v1103_v45 }
  0x6d   : > { %5414 = vmatmul.mubr.msk.bf16.gmra.mrb[44].mxu0 %vm357_vm3, %v626_v48  ;;  %v1105_v48 = vshrl.u32 %v6227_v38, 16 }
  0x6e   : > { %5417 = vmatprep.mubr.msk.bf16.mxu0 %vm6305_vm1, %v6304_v1 }
  0x6f   : > { %v1107_v50 = vor.u32 %v1105_v48, %v1103_v45 }
  0x71   : > { %v1112_v56 = vsel %vm606_vm4, %v1107_v50, %v1111_v51 }
  0x75   : > { %5418 = vmatmul.mubr.msk.bf16.gmra.mrb[48].mxu0 %vm357_vm3, %v634_v54 }
  0x76   : > { %5421 = vmatprep.mubr.msk.bf16.mxu0 %vm6305_vm1, %v6304_v1 }
  0x7d   : > { %5422 = vmatmul.mubr.msk.bf16.gmra.mrb[52].mxu0 %vm357_vm3, %v642_v60  ;;  %v1115_v60 = vor.u32 %v1113_v57, %v1111_v51 }
  0x7e   : > { %5425 = vmatprep.mubr.msk.bf16.mxu0 %vm6305_vm1, %v6304_v1 }
  0x7f   : > { %v1120_v3 = vsel %vm606_vm4, %v1115_v60, %v1119_v61  ;;  %v6306_v60 = vmov 0  }
  0x80   : > { %6192 = vset.pattern.permute.xlu0 %v6306_v60  ;;  %6193 = vset.pattern.permute.xlu1 %v6306_v60  ;;  %1801 = vst.msk [vmem:[#allocation2 + $0x4] sm:$0xf] %vm1799_vm8, %v6306_v60  ;;  %1800 = vst.msk [vmem:[#allocation2] sm:$0xf] %vm1799_vm8, %v6306_v60 }
  0x81   : > { %1802 = vst.msk [vmem:[#allocation2 + $0x8] sm:$0xf] %vm1799_vm8, %v6306_v60  ;;  %1803 = vst.msk [vmem:[#allocation2 + $0xc] sm:$0xf] %vm1799_vm8, %v6306_v60 }
  0x82   : > { %1804 = vst.msk [vmem:[#allocation2 + $0x10] sm:$0xf] %vm1799_vm8, %v6306_v60  ;;  %1805 = vst.msk [vmem:[#allocation2 + $0x14] sm:$0xf] %vm1799_vm8, %v6306_v60 }
  0x83   : > { %1806 = vst.msk [vmem:[#allocation2 + $0x18] sm:$0xf] %vm1799_vm8, %v6306_v60  ;;  %1807 = vst.msk [vmem:[#allocation2 + $0x1c] sm:$0xf] %vm1799_vm8, %v6306_v60 }
  0x84   : > { %1808 = vst.msk [vmem:[#allocation2 + $0x20] sm:$0xf] %vm1799_vm8, %v6306_v60  ;;  %1809 = vst.msk [vmem:[#allocation2 + $0x24] sm:$0xf] %vm1799_vm8, %v6306_v60 }
  0x85   : > { %5426 = vmatmul.mubr.msk.bf16.gmra.mrb[56].mxu0 %vm357_vm3, %v650_v2  ;;  %1810 = vst.msk [vmem:[#allocation2 + $0x28] sm:$0xf] %vm1799_vm8, %v6306_v60  ;;  %1811 = vst.msk [vmem:[#allocation2 + $0x2c] sm:$0xf] %vm1799_vm8, %v6306_v60 }
  0x86   : > { %5431 = vmatprep.mubr.msk.bf16.mxu0 %vm6305_vm1, %v6304_v1  ;;  %1812 = vst.msk [vmem:[#allocation2 + $0x30] sm:$0xf] %vm1799_vm8, %v6306_v60  ;;  %3386 = vst.msk [vmem:[#allocation3] sm:$0xf] %vm1799_vm8, %v6306_v60 }
  0x87   : > { %3387 = vst.msk [vmem:[#allocation3 + $0x4] sm:$0xf] %vm1799_vm8, %v6306_v60  ;;  %3388 = vst.msk [vmem:[#allocation3 + $0x8] sm:$0xf] %vm1799_vm8, %v6306_v60 }
  0x88   : > { %3389 = vst.msk [vmem:[#allocation3 + $0xc] sm:$0xf] %vm1799_vm8, %v6306_v60  ;;  %3390 = vst.msk [vmem:[#allocation3 + $0x10] sm:$0xf] %vm1799_vm8, %v6306_v60 }
  0x89   : > { %3391 = vst.msk [vmem:[#allocation3 + $0x14] sm:$0xf] %vm1799_vm8, %v6306_v60  ;;  %3392 = vst.msk [vmem:[#allocation3 + $0x18] sm:$0xf] %vm1799_vm8, %v6306_v60 }
  0x8a   : > { %3393 = vst.msk [vmem:[#allocation3 + $0x1c] sm:$0xf] %vm1799_vm8, %v6306_v60  ;;  %3394 = vst.msk [vmem:[#allocation3 + $0x20] sm:$0xf] %vm1799_vm8, %v6306_v60 }
  0x8b   : > { %3395 = vst.msk [vmem:[#allocation3 + $0x24] sm:$0xf] %vm1799_vm8, %v6306_v60  ;;  %3396 = vst.msk [vmem:[#allocation3 + $0x28] sm:$0xf] %vm1799_vm8, %v6306_v60 }
  0x8c   : > { %3397 = vst.msk [vmem:[#allocation3 + $0x2c] sm:$0xf] %vm1799_vm8, %v6306_v60  ;;  %3398 = vst.msk [vmem:[#allocation3 + $0x30] sm:$0xf] %vm1799_vm8, %v6306_v60 }
  0x8d   : > { %5432 = vmatmul.mubr.msk.bf16.vlgmr.msra.gmra.mrb[60].mxu0 %vm357_vm3, %v6213_v4  ;;  %v1121_v4 = vshrl.u32 %v6229_v52, 16  ;;  %v1284_v52 = vrot.slane %v6237_v49, 1 }
  0x8e   : > { %5452 = vmatpush3.bf16.msra.mxu0 %v960_v5  ;;  %5435 = vmatprep.mubr.msk.bf16.mxu0 %vm6305_vm1, %v6304_v1  ;;  %v1125_v5 = vshll.u32 %v6230_v62, 16 }
  0x8f   : > { %5473 = vmatprep.subr.bf16.mxu0 %v6304_v1 }
  0x95   : > { %5436 = vmatmul.mubr.msk.bf16.gmra.mrb[64].mxu0 %vm357_vm3, %v6214_v6 }
  0x96   : > { %5439 = vmatprep.mubr.msk.bf16.mxu0 %vm6305_vm1, %v6304_v1 }
  0x9d   : > { %5440 = vmatmul.mubr.msk.bf16.gmra.mrb[68].mxu0 %vm357_vm3, %v6215_v7  ;;  %v1123_v7 = vor.u32 %v1121_v4, %v1119_v61  ;;  %v280_v61 = vld [vmem:[%s7767_s6] sm:$0xff] }
  0x9e   : > { %5443 = vmatprep.mubr.msk.bf16.mxu0 %vm6305_vm1, %v6304_v1  ;;  %1741 = vperm.xlu0 %6192, %v280_v61   ;;  %v1562_v61 = vshll.u32 %v6553_v14, 16 }
  0xa5   : > { %5444 = vmatmul.mubr.msk.bf16.gmra.mrb[72].mxu0 %vm357_vm3, %v6216_v8  ;;  %v1127_v8 = vrot.slane %v1125_v5, 1  ;;  %v1544_v5 = vld [vmem:[%s7762_s1 + $0x10] sm:$0x3] }
  0xa6   : > { %5447 = vmatprep.mubr.msk.bf16.mxu0 %vm6305_vm1, %v6304_v1 }
  0xa7   : > { %v1128_v12 = vsel %vm606_vm4, %v1123_v7, %v1127_v8 }
  0xad   : > { %5448 = vmatmul.mubr.msk.bf16.gmra.mrb[76].mxu0 %vm357_vm3, %v6217_v9 }
  0xae   : > { %5453 = vmatprep.mubr.msk.bf16.mxu0 %vm6305_vm1, %v6304_v1 }
  0xb5   : > { %5454 = vmatmul.mubr.msk.bf16.vlgmr.msra.gmra.mrb[80].mxu0 %vm357_vm3, %v935_v16  ;;  %v6233_v16 = vld [vmem:[%s7762_s1 + $0xc] ss:$0 sps:$4 sm:$0xcc]  }
  0xb6   : > { %5474 = vmatpush3.bf16.msra.mxu0 %v1149_v18  ;;  %5457 = vmatprep.mubr.msk.bf16.mxu0 %vm6305_vm1, %v6304_v1  ;;  %v1276_v18 = vrot.slane %v6553_v14, 1  ;;  %v1442_v19 = vrot.slane %v6233_v16, 2 }
  0xb7   : > { %5495 = vmatprep.subr.bf16.mxu0 %v6304_v1 }
  0xb8   : > { %v1279_v31 = vsel %vm1274_vm5, %v1276_v18, %v1278_v27 }
  0xbd   : > { %5458 = vmatmul.mubr.msk.bf16.gmra.mrb[84].mxu0 %vm357_vm3, %v937_v20 }
  0xbe   : > { %5461 = vmatprep.mubr.msk.bf16.mxu0 %vm6305_vm1, %v6304_v1 }
  0xc5   : > { %5462 = vmatmul.mubr.msk.bf16.gmra.mrb[88].mxu0 %vm357_vm3, %v939_v23  ;;  %v1277_v23 = vsel %vm1274_vm5, %v1275_v17, %v1276_v18  ;;  %v1619_v17 = vsel %vm373_vm0, %v1544_v5, 0  ;;  %v283_v18 = vld [vmem:[%s7767_s6 + $0x18] sm:$0xff] }
  0xc6   : > { %5465 = vmatprep.mubr.msk.bf16.mxu0 %vm6305_vm1, %v6304_v1 }
  0xcd   : > { %5466 = vmatmul.mubr.msk.bf16.gmra.mrb[92].mxu0 %vm357_vm3, %v941_v26  ;;  %v1459_v26 = vsel %vm373_vm0, %v1442_v19, 0  ;;  %v286_v19 = vld [vmem:[%s7767_s6 + $0x30] sm:$0xff] }
  0xce   : > { %5469 = vmatprep.mubr.msk.bf16.mxu0 %vm6305_vm1, %v6304_v1 }
  0xd5   : > { %5470 = vmatmul.mubr.msk.bf16.gmra.mrb[96].mxu0 %vm357_vm3, %v943_v32  ;;  %v6583_v32 = vld [vmem:[%s6372_s8 + $0x1c] sm:$0xff]  }
  0xd6   : > { %5475 = vmatprep.mubr.msk.bf16.mxu0 %vm6305_vm1, %v6304_v1  ;;  %v1280_v34 = vrot.slane %v6583_v32, 1 }
  0xd8   : > { %v1281_v39 = vsel %vm1274_vm5, %v1278_v27, %v1280_v34 }
  0xdd   : > { %5476 = vmatmul.mubr.msk.bf16.vlgmr.msra.gmra.mrb[100].mxu0 %vm357_vm3, %v1096_v40  ;;  %v6593_v40 = vld [vmem:[%s6372_s8 + $0x24] sm:$0xff]  }
  0xde   : > { %5496 = vmatpush3.bf16.msra.mxu0 %v1302_v43  ;;  %5479 = vmatprep.mubr.msk.bf16.mxu0 %vm6305_vm1, %v6304_v1  ;;  %v1282_v43 = vrot.slane %v6593_v40, 1 }
  0xdf   : > { %5517 = vmatprep.subr.bf16.mxu0 %v6304_v1 }
  0xe0   : > { %v1283_v48 = vsel %vm1274_vm5, %v1280_v34, %v1282_v43  ;;  %v1285_v57 = vsel %vm1274_vm5, %v1282_v43, %v1284_v52  ;;  %v6243_v52 = vld [vmem:[%s6372_s8 + $0x5c] ss:$0 sps:$4 sm:$0x77]  }
  0xe5   : > { %5480 = vmatmul.mubr.msk.bf16.gmra.mrb[104].mxu0 %vm357_vm3, %v1104_v47 }
  0xe6   : > { %5483 = vmatprep.mubr.msk.bf16.mxu0 %vm6305_vm1, %v6304_v1 }
  0xe8   : > { %v411_v53 = vpop.f32.mrb[0].mxu0 }
  0xe9   : > { %v5367_v54 = vpop.f32.mrb[1].mxu0 }
  0xea   : > { %v6535_v55 = vpop.f32.mrb[2].mxu0 }
  0xeb   : > { %v5368_v59 = vpop.f32.mrb[3].mxu0 }
  0xec   : > { %v6239_v59 = vld [vmem:[%s6372_s8 + $0x3c] sm:$0xff]  }
  0xed   : > { %5484 = vmatmul.mubr.msk.bf16.gmra.mrb[108].mxu0 %vm357_vm3, %v1112_v56 }
  0xee   : > { %5487 = vmatprep.mubr.msk.bf16.mxu0 %vm6305_vm1, %v6304_v1 }
  0xf0   : > { %v419_v63 = vpop.f32.mrb[4].mxu0 }
  0xf1   : > { %v5371_v0 = vpop.f32.mrb[5].mxu0 }
  0xf2   : > { %v422_v2 = vpop.f32.mrb[6].mxu0  ;;  %v281_v0 = vld [vmem:[%s7767_s6 + $0x8] sm:$0xff] }
  0xf3   : > { %v5372_v6 = vpop.f32.mrb[7].mxu0  ;;  %1746 = vperm.xlu0 %6192, %v281_v0  }
  0xf4   : > { %v282_v6 = vld [vmem:[%s7767_s6 + $0x10] sm:$0xff] }
  0xf5   : > { %5488 = vmatmul.mubr.msk.bf16.gmra.mrb[112].mxu0 %vm357_vm3, %v1120_v3  ;;  %v1429_v3 = vrot.slane %v6239_v59, 3  ;;  %1751 = vperm.xlu1 %6193, %v282_v6   ;;  %v1559_v59 = vshrl.u32 %v6553_v14, 16 }
  0xf6   : > { %5491 = vmatprep.mubr.msk.bf16.mxu0 %vm6305_vm1, %v6304_v1 }
  0xf7   : > { %v1561_v6 = vrot.slane %v1559_v59, 1 }
  0xf8   : > { %v427_v9 = vpop.f32.mrb[8].mxu0 }
  0xf9   : > { %v5375_v10 = vpop.f32.mrb[9].mxu0  ;;  %1756 = vperm.xlu1 %6193, %v283_v18  }
  0xfa   : > { %v6546_v11 = vpop.f32.mrb[10].mxu0 }
  0xfb   : > { %v5376_v15 = vpop.f32.mrb[11].mxu0 }
  0xfd   : > { %5492 = vmatmul.mubr.msk.bf16.gmra.mrb[116].mxu0 %vm357_vm3, %v1128_v12  ;;  %v284_v12 = vld [vmem:[%s7767_s6 + $0x20] sm:$0xff] }
  0xfe   : > { %5497 = vmatprep.mubr.msk.bf16.mxu0 %vm6305_vm1, %v6304_v1  ;;  %1761 = vperm.xlu0 %6192, %v284_v12  }
 0x100   : > { %v6563_v20 = vpop.f32.mrb[12].mxu0 }
 0x101   : > { %v5379_v21 = vpop.f32.mrb[13].mxu0 }
 0x102   : > { %v6565_v22 = vpop.f32.mrb[14].mxu0  ;;  %1771 = vperm.xlu0 %6192, %v286_v19  }
 0x103   : > { %v5380_v25 = vpop.f32.mrb[15].mxu0 }
 0x105   : > { %5498 = vmatmul.mubr.msk.bf16.vlgmr.msra.gmra.mrb[120].mxu0 %vm357_vm3, %v1277_v23 }
 0x106   : > { %5518 = vmatpush3.bf16.msra.mxu0 %v1459_v26  ;;  %5501 = vmatprep.mubr.msk.bf16.mxu0 %vm6305_vm1, %v6304_v1 }
 0x107   : > { %5539 = vmatprep.subr.bf16.mxu0 %v6304_v1 }
 0x108   : > { %v6577_v28 = vpop.f32.mrb[16].mxu0 }
 0x109   : > { %v5383_v29 = vpop.f32.mrb[17].mxu0 }
 0x10a   : > { %v6579_v30 = vpop.f32.mrb[18].mxu0  ;;  %v6241_v29 = vld [vmem:[%s6372_s8 + $0x4c] sm:$0xff]  }
 0x10b   : > { %v5384_v33 = vpop.f32.mrb[19].mxu0 }
 0x10d   : > { %5502 = vmatmul.mubr.msk.bf16.gmra.mrb[124].mxu0 %vm357_vm3, %v1279_v31  ;;  %v288_v31 = vld [vmem:[%s7767_s6 + $0x40] sm:$0xff] }
 0x10e   : > { %5505 = vmatprep.mubr.msk.bf16.mxu0 %vm6305_vm1, %v6304_v1  ;;  %1781 = vperm.xlu0 %6192, %v288_v31  }
 0x110   : > { %v527_v35 = vpop.f32.mrb[20].mxu0 }
 0x111   : > { %v5389_v36 = vpop.f32.mrb[21].mxu0  ;;  %v6589_v37 = vadd.f32 %v527_v35, %v411_v53  ;;  %v1433_v35 = vrot.slane %v6241_v29, 3 }
 0x112   : > { %v530_v38 = vpop.f32.mrb[22].mxu0 }
 0x113   : > { %v5390_v41 = vpop.f32.mrb[23].mxu0  ;;  %v6596_v42 = vadd.f32 %v530_v38, %v6535_v55 }
 0x115   : > { %5506 = vmatmul.mubr.msk.bf16.gmra.mrb[128].mxu0 %vm357_vm3, %v1281_v39 }
 0x116   : > { %5509 = vmatprep.mubr.msk.bf16.mxu0 %vm6305_vm1, %v6304_v1 }
 0x118   : > { %v535_v44 = vpop.f32.mrb[24].mxu0 }
 0x119   : > { %v6602_v45 = vadd.f32 %v535_v44, %v419_v63  ;;  %v5393_v46 = vpop.f32.mrb[25].mxu0  ;;  %v6242_v44 = vld [vmem:[%s6372_s8 + $0x54] sm:$0xff]  }
 0x11a   : > { %v538_v47 = vpop.f32.mrb[26].mxu0 }
 0x11b   : > { %v6606_v50 = vadd.f32 %v538_v47, %v422_v2  ;;  %v5394_v51 = vpop.f32.mrb[27].mxu0  ;;  %v1428_v2 = vrot.slane %v6238_v58, 3  ;;  %v1551_v58 = vshrl.u32 %v6550_v13, 16 }
 0x11d   : > { %5510 = vmatmul.mubr.msk.bf16.gmra.mrb[132].mxu0 %vm357_vm3, %v1283_v48  ;;  %v1430_v10 = vsel %vm1427_vm6, %v1428_v2, %v1429_v3  ;;  %v1435_v48 = vrot.slane %v6242_v44, 3 }
 0x11e   : > { %5513 = vmatprep.mubr.msk.bf16.mxu0 %vm6305_vm1, %v6304_v1 }
 0x120   : > { %v543_v53 = vpop.f32.mrb[28].mxu0 }
 0x121   : > { %v6611_v54 = vadd.f32 %v543_v53, %v427_v9  ;;  %v5397_v55 = vpop.f32.mrb[29].mxu0 }
 0x122   : > { %v546_v56 = vpop.f32.mrb[30].mxu0  ;;  %v1436_v55 = vsel %vm1427_vm6, %v1433_v35, %v1435_v48 }
 0x123   : > { %v6622_v62 = vadd.f32 %v546_v56, %v6546_v11  ;;  %v5398_v63 = vpop.f32.mrb[31].mxu0  ;;  %v6240_v11 = vld [vmem:[%s6372_s8 + $0x44] sm:$0xff]  }
 0x125   : > { %5514 = vmatmul.mubr.msk.bf16.gmra.mrb[136].mxu0 %vm357_vm3, %v1285_v57  ;;  %v1437_v57 = vrot.slane %v6243_v52, 3 }
 0x126   : > { %5519 = vmatprep.mubr.msk.bf16.mxu0 %vm6305_vm1, %v6304_v1 }
 0x127   : > { %v1438_v2 = vsel %vm1427_vm6, %v1435_v48, %v1437_v57 }
 0x128   : > { %v551_v4 = vpop.f32.mrb[32].mxu0 }
 0x129   : > { %v6637_v7 = vadd.f32 %v551_v4, %v6563_v20  ;;  %v5401_v8 = vpop.f32.mrb[33].mxu0  ;;  %v1431_v20 = vrot.slane %v6240_v11, 3  ;;  %v1553_v4 = vrot.slane %v1551_v58, 1  ;;  %v1571_v11 = vshll.u32 %v6569_v24, 16 }
 0x12a   : > { %v554_v9 = vpop.f32.mrb[34].mxu0  ;;  %v1564_v8 = vrot.slane %v1562_v61, 2 }
 0x12b   : > { %v6645_v15 = vadd.f32 %v554_v9, %v6565_v22  ;;  %v5402_v16 = vpop.f32.mrb[35].mxu0  ;;  %v285_v22 = vld [vmem:[%s7767_s6 + $0x28] sm:$0xff]  ;;  %v1432_v27 = vsel %vm1427_vm6, %v1429_v3, %v1431_v20  ;;  %v1434_v43 = vsel %vm1427_vm6, %v1431_v20, %v1433_v35  ;;  %v1573_v20 = vrot.slane %v1571_v11, 2 }
 0x12c   : > { %1766 = vperm.xlu1 %6193, %v285_v22  }
 0x12d   : > { %5520 = vmatmul.mubr.msk.bf16.vlgmr.msra.gmra.mrb[140].mxu0 %vm357_vm3, %v1430_v10  ;;  %v1568_v10 = vshrl.u32 %v6569_v24, 16 }
 0x12e   : > { %5540 = vmatpush3.bf16.msra.mxu0 %v1619_v17  ;;  %5523 = vmatprep.mubr.msk.bf16.mxu0 %vm6305_vm1, %v6304_v1 }
 0x12f   : > { %5583 = vmatprep.subr.bf16.mxu0 %v6304_v1  ;;  %v1570_v19 = vrot.slane %v1568_v10, 1 }
 0x130   : > { %v559_v21 = vpop.f32.mrb[36].mxu0 }
 0x131   : > { %v6662_v23 = vadd.f32 %v559_v21, %v6577_v28  ;;  %v5405_v25 = vpop.f32.mrb[37].mxu0  ;;  %v287_v28 = vld [vmem:[%s7767_s6 + $0x38] sm:$0xff]  ;;  %v1574_v24 = vor.u32 %v1573_v20, %v1570_v19 }
 0x132   : > { %v562_v26 = vpop.f32.mrb[38].mxu0  ;;  %1776 = vperm.xlu1 %6193, %v287_v28   ;;  %v1577_v25 = vshrl.u32 %v6583_v32, 16 }
 0x133   : > { %v6670_v33 = vadd.f32 %v562_v26, %v6579_v30  ;;  %v5406_v34 = vpop.f32.mrb[39].mxu0  ;;  %v289_v30 = vld [vmem:[%s7767_s6 + $0x48] sm:$0xff] }
 0x134   : > { %v1579_v28 = vrot.slane %v1577_v25, 1 }
 0x135   : > { %5524 = vmatmul.mubr.msk.bf16.gmra.mrb[144].mxu0 %vm357_vm3, %v1432_v27 }
 0x136   : > { %5527 = vmatprep.mubr.msk.bf16.mxu0 %vm6305_vm1, %v6304_v1  ;;  %1786 = vperm.xlu1 %6193, %v289_v30  }
 0x138   : > { %v703_v36 = vpop.f32.mrb[40].mxu0 }
 0x139   : > { %v6682_v38 = vadd.f32 %v703_v36, %v6589_v37  ;;  %v5411_v39 = vpop.f32.mrb[41].mxu0 }
 0x13a   : > { %v706_v41 = vpop.f32.mrb[42].mxu0 }
 0x13b   : > { %v6687_v46 = vadd.f32 %v706_v41, %v6596_v42  ;;  %v5412_v47 = vpop.f32.mrb[43].mxu0 }
 0x13d   : > { %5528 = vmatmul.mubr.msk.bf16.gmra.mrb[148].mxu0 %vm357_vm3, %v1434_v43 }
 0x13e   : > { %5531 = vmatprep.mubr.msk.bf16.mxu0 %vm6305_vm1, %v6304_v1 }
 0x140   : > { %v711_v49 = vpop.f32.mrb[44].mxu0 }
 0x141   : > { %v6693_v37 = vadd.f32 %v711_v49, %v6602_v45  ;;  %v5415_v51 = vpop.f32.mrb[45].mxu0  ;;  %v1554_v45 = vshll.u32 %v6550_v13, 16  ;;  %v6244_v49 = vld [vmem:[%s6372_s8 + $0x2c] ss:$0 sps:$4 sm:$0x33]  }
 0x142   : > { %v714_v53 = vpop.f32.mrb[46].mxu0 }
 0x143   : > { %v6698_v56 = vadd.f32 %v714_v53, %v6606_v50  ;;  %v5416_v42 = vpop.f32.mrb[47].mxu0  ;;  %v1556_v5 = vrot.slane %v1554_v45, 2 }
 0x145   : > { %5532 = vmatmul.mubr.msk.bf16.gmra.mrb[152].mxu0 %vm357_vm3, %v1436_v55  ;;  %v1557_v14 = vor.u32 %v1556_v5, %v1553_v4  ;;  %v1598_v55 = vshll.u32 %v6244_v49, 16 }
 0x146   : > { %5535 = vmatprep.mubr.msk.bf16.mxu0 %vm6305_vm1, %v6304_v1 }
 0x147   : > { %v1600_v61 = vrot.slane %v1598_v55, 2 }
 0x148   : > { %v719_v63 = vpop.f32.mrb[48].mxu0 }
 0x149   : > { %v6708_v0 = vadd.f32 %v719_v63, %v6611_v54  ;;  %v5419_v50 = vpop.f32.mrb[49].mxu0  ;;  %v1565_v54 = vor.u32 %v1564_v8, %v1561_v6 }
 0x14a   : > { %v722_v3 = vpop.f32.mrb[50].mxu0 }
 0x14b   : > { %v6712_v9 = vadd.f32 %v722_v3, %v6622_v62  ;;  %v5420_v13 = vpop.f32.mrb[51].mxu0  ;;  %v1566_v18 = vsel %vm1549_vm7, %v1557_v14, %v1565_v54  ;;  %v1575_v34 = vsel %vm1549_vm7, %v1565_v54, %v1574_v24 }
 0x14d   : > { %5536 = vmatmul.mubr.msk.bf16.gmra.mrb[156].mxu0 %vm357_vm3, %v1438_v2 }
 0x14e   : > { %5541 = vmatprep.mubr.msk.bf16.mxu0 %vm6305_vm1, %v6304_v1 }
 0x150   : > { %v727_v12 = vpop.f32.mrb[52].mxu0 }
 0x151   : > { %v6720_v16 = vadd.f32 %v727_v12, %v6637_v7  ;;  %v5423_v17 = vpop.f32.mrb[53].mxu0  ;;  %v1580_v7 = vshll.u32 %v6583_v32, 16  ;;  %v1586_v32 = vshrl.u32 %v6593_v40, 16 }
 0x152   : > { %v730_v62 = vpop.f32.mrb[54].mxu0 }
 0x153   : > { %v749_v21 = vadd.f32 %v730_v62, %v6645_v15  ;;  %v5424_v22 = vpop.f32.mrb[55].mxu0  ;;  %v1582_v15 = vrot.slane %v1580_v7, 2  ;;  %v1588_v48 = vrot.slane %v1586_v32, 1 }
 0x155   : > { %5542 = vmatmul.mubr.msk.bf16.vlgmr.msra.gmra.mrb[160].mxu0 %vm357_vm3, %v1566_v18  ;;  %v1583_v30 = vor.u32 %v1582_v15, %v1579_v28 }
 0x156   : > { %5545 = vmatprep.mubr.msk.bf16.mxu0 %vm6305_vm1, %v6304_v1 }
 0x157   : > { %v1584_v47 = vsel %vm1549_vm7, %v1574_v24, %v1583_v30 }
 0x158   : > { %v735_v26 = vpop.f32.mrb[56].mxu0 }
 0x159   : > { %v750_v27 = vadd.f32 %v735_v26, %v6662_v23  ;;  %v5427_v29 = vpop.f32.mrb[57].mxu0  ;;  %v1589_v23 = vshll.u32 %v6593_v40, 16  ;;  %v1595_v40 = vshrl.u32 %v6244_v49, 16 }
 0x15a   : > { %v738_v31 = vpop.f32.mrb[58].mxu0 }
 0x15b   : > { %v751_v35 = vadd.f32 %v738_v31, %v6670_v33  ;;  %v5428_v36 = vpop.f32.mrb[59].mxu0  ;;  %v1591_v33 = vrot.slane %v1589_v23, 2  ;;  %v1597_v59 = vrot.slane %v1595_v40, 1 }
 0x15c   : > { %v6245_v36 = vld [vmem:[%s6372_s8 + $0x94] sm:$0xfc]  }
 0x15d   : > { %5546 = vmatmul.mubr.msk.bf16.gmra.mrb[164].mxu0 %vm357_vm3, %v1575_v34  ;;  %v1592_v53 = vor.u32 %v1591_v33, %v1588_v48  ;;  %v1601_v50 = vor.u32 %v1600_v61, %v1597_v59 }
 0x15e   : > { %5549 = vmatprep.mubr.msk.bf16.mxu0 %vm6305_vm1, %v6304_v1 }
 0x15f   : > { %v1593_v45 = vsel %vm1549_vm7, %v1583_v30, %v1592_v53  ;;  %v1602_v5 = vsel %vm1549_vm7, %v1592_v53, %v1601_v50  ;;  %v6246_v30 = vld [vmem:[%s6372_s8 + $0x9c] sm:$0xff]  }
 0x160   : > { %v844_v39 = vpop.f32.mrb[60].mxu0 }
 0x161   : > { %v883_v41 = vadd.f32 %v844_v39, %v6682_v38  ;;  %v5433_v43 = vpop.f32.mrb[61].mxu0 }
 0x162   : > { %v847_v44 = vpop.f32.mrb[62].mxu0  ;;  %v2021_v43 = vrot.slane %v6245_v36, 2 }
 0x163   : > { %v884_v51 = vadd.f32 %v847_v44, %v6687_v46  ;;  %v5434_v52 = vpop.f32.mrb[63].mxu0  ;;  %v2022_v44 = vrot.slane %v6246_v30, 2 }
 0x165   : > { %5550 = vmatmul.mubr.msk.bf16.gmra.mrb[168].mxu0 %vm357_vm3, %v1584_v47  ;;  %v2023_v47 = vsel %vm341_vm2, %v2021_v43, %v2022_v44 }
 0x166   : > { %5553 = vmatprep.mubr.msk.bf16.mxu0 %vm6305_vm1, %v6304_v1 }
 0x168   : > { %v852_v42 = vpop.f32.mrb[64].mxu0 }
 0x169   : > { %v885_v38 = vadd.f32 %v852_v42, %v6693_v37  ;;  %v5437_v57 = vpop.f32.mrb[65].mxu0 }
 0x16a   : > { %v855_v58 = vpop.f32.mrb[66].mxu0 }
 0x16b   : > { %v886_v46 = vadd.f32 %v855_v58, %v6698_v56  ;;  %v5438_v63 = vpop.f32.mrb[67].mxu0 }
 0x16d   : > { %5554 = vmatmul.mubr.msk.bf16.gmra.mrb[172].mxu0 %vm357_vm3, %v1593_v45  ;;  %v6248_v45 = vld [vmem:[%s6372_s8 + $0xac] sm:$0xff]  }
 0x16e   : > { %5557 = vmatprep.mubr.msk.bf16.mxu0 %vm6305_vm1, %v6304_v1  ;;  %v2026_v63 = vrot.slane %v6248_v45, 2 }
 0x170   : > { %v860_v2 = vpop.f32.mrb[68].mxu0 }
 0x171   : > { %v887_v3 = vadd.f32 %v860_v2, %v6708_v0  ;;  %v5441_v4 = vpop.f32.mrb[69].mxu0 }
 0x172   : > { %v863_v37 = vpop.f32.mrb[70].mxu0 }
 0x173   : > { %v888_v6 = vadd.f32 %v863_v37, %v6712_v9  ;;  %v5442_v8 = vpop.f32.mrb[71].mxu0 }
 0x175   : > { %5558 = vmatmul.mubr.msk.bf16.gmra.mrb[176].mxu0 %vm357_vm3, %v1602_v5  ;;  %v6249_v5 = vld [vmem:[%s6372_s8 + $0xb4] sm:$0xff]  }
 0x176   : > { %5585 = vmatprep.mubr.msk.bf16.mxu0 %vm6305_vm1, %v6304_v1 }
 0x178   : > { %v868_v56 = vpop.f32.mrb[72].mxu0 }
 0x179   : > { %v889_v13 = vadd.f32 %v868_v56, %v6720_v16  ;;  %v5445_v14 = vpop.f32.mrb[73].mxu0  ;;  %v2028_v56 = vrot.slane %v6249_v5, 2 }
 0x17a   : > { %v871_v54 = vpop.f32.mrb[74].mxu0 }
 0x17b   : > { %v890_v10 = vadd.f32 %v871_v54, %v749_v21  ;;  %v5446_v11 = vpop.f32.mrb[75].mxu0 }
 0x180   : > { %v876_v0 = vpop.f32.mrb[76].mxu0 }
 0x181   : > { %v891_v12 = vadd.f32 %v876_v0, %v750_v27  ;;  %v5449_v17 = vpop.f32.mrb[77].mxu0 }
 0x182   : > { %v879_v62 = vpop.f32.mrb[78].mxu0  ;;  %v2134_v17 = vld [vmem:[%s7764_s3 + $0x4] sm:$0xf] }
 0x183   : > { %v892_v18 = vadd.f32 %v879_v62, %v751_v35  ;;  %v5450_v19 = vpop.f32.mrb[79].mxu0  ;;  %v1987_v35 = vld [vmem:[%s7763_s2] sm:$0x3] }
 0x184   : > { %v2048_v23 = vsel %vm373_vm0, %v1987_v35, 0  ;;  %vm2208_vm0 = vcmask 64512  }
 0x185   : > { %5562 = vmatpush3.bf16.msra.mxu1 %v2048_v23 }
 0x186   : > { %5605 = vmatprep.subr.bf16.mxu1 %v6304_v1 }
 0x188   : > { %v996_v9 = vpop.f32.mrb[80].mxu0  ;;  %5564 = vmatmul.mubr.msk.bf16.vlgmr.msra.gmra.mrb[0].mxu1 %vm357_vm3, %v2023_v47 }
 0x189   : > { %v1035_v20 = vadd.f32 %v996_v9, %v883_v41  ;;  %v5455_v22 = vpop.f32.mrb[81].mxu0  ;;  %5567 = vmatprep.mubr.msk.bf16.mxu1 %vm6305_vm1, %v6304_v1 }
 0x18a   : > { %v999_v24 = vpop.f32.mrb[82].mxu0 }
 0x18b   : > { %v6757_v25 = vadd.f32 %v999_v24, %v884_v51  ;;  %v5456_v7 = vpop.f32.mrb[83].mxu0  ;;  %v6247_v51 = vld [vmem:[%s6372_s8 + $0xa4] sm:$0xff]  }
 0x18c   : > { %v2024_v55 = vrot.slane %v6247_v51, 2 }
 0x18e   : > { %v2025_v42 = vsel %vm341_vm2, %v2022_v44, %v2024_v55  ;;  %v2027_v50 = vsel %vm341_vm2, %v2024_v55, %v2026_v63 }
 0x190   : > { %v1004_v16 = vpop.f32.mrb[84].mxu0  ;;  %5568 = vmatmul.mubr.msk.bf16.gmra.mrb[4].mxu1 %vm357_vm3, %v2025_v42 }
 0x191   : > { %v6759_v26 = vadd.f32 %v1004_v16, %v885_v38  ;;  %v5459_v21 = vpop.f32.mrb[85].mxu0  ;;  %5571 = vmatprep.mubr.msk.bf16.mxu1 %vm6305_vm1, %v6304_v1  ;;  %v2123_v16 = vld [vmem:[%s7764_s3] sm:$0xf] }
 0x192   : > { %v1007_v29 = vpop.f32.mrb[86].mxu0 }
 0x193   : > { %v6761_v31 = vadd.f32 %v1007_v29, %v886_v46  ;;  %v5460_v27 = vpop.f32.mrb[87].mxu0 }
 0x198   : > { %v1012_v34 = vpop.f32.mrb[88].mxu0  ;;  %5572 = vmatmul.mubr.msk.bf16.gmra.mrb[8].mxu1 %vm357_vm3, %v2027_v50 }
 0x199   : > { %v6763_v28 = vadd.f32 %v1012_v34, %v887_v3  ;;  %v5463_v15 = vpop.f32.mrb[89].mxu0  ;;  %5575 = vmatprep.mubr.msk.bf16.mxu1 %vm6305_vm1, %v6304_v1 }
 0x19a   : > { %v1015_v32 = vpop.f32.mrb[90].mxu0 }
 0x19b   : > { %v6771_v39 = vadd.f32 %v1015_v32, %v888_v6  ;;  %v5464_v41 = vpop.f32.mrb[91].mxu0 }
 0x1a0   : > { %v1020_v48 = vpop.f32.mrb[92].mxu0 }
 0x1a1   : > { %v6778_v33 = vadd.f32 %v1020_v48, %v889_v13  ;;  %v5467_v49 = vpop.f32.mrb[93].mxu0  ;;  %v2029_v13 = vsel %vm341_vm2, %v2026_v63, %v2028_v56 }
 0x1a2   : > { %v1023_v52 = vpop.f32.mrb[94].mxu0  ;;  %5576 = vmatmul.mubr.msk.bf16.gmra.mrb[12].mxu1 %vm357_vm3, %v2029_v13 }
 0x1a3   : > { %v6781_v53 = vadd.f32 %v1023_v52, %v890_v10  ;;  %v5468_v40 = vpop.f32.mrb[95].mxu0  ;;  %5579 = vmatprep.mubr.msk.bf16.mxu1 %vm6305_vm1, %v6304_v1 }
 0x1a8   : > { %v1028_v38 = vpop.f32.mrb[96].mxu0 }
 0x1a9   : > { %v6787_v57 = vadd.f32 %v1028_v38, %v891_v12  ;;  %v5471_v58 = vpop.f32.mrb[97].mxu0  ;;  %v6250_v12 = vld [vmem:[%s6372_s8 + $0xbc] ss:$0 sps:$4 sm:$0x33]   ;;  %s6180_s8 = smul.u32 80, %s7776_s25 }
 0x1aa   : > { %v1031_v59 = vpop.f32.mrb[98].mxu0  ;;  %v2030_v62 = vrot.slane %v6250_v12, 2 }
 0x1ab   : > { %v6790_v61 = vadd.f32 %v1031_v59, %v892_v18  ;;  %v5472_v46 = vpop.f32.mrb[99].mxu0  ;;  %v2226_v18 = vsel %vm2224_vm9, %v2134_v17, 0  ;;  %s7720_s11 = scalar_lea.vmem %s7768_s7, %s6180_s8 }
 0x1ac   : > { %5584 = vmatpush3.bf16.msra.mxu0 %v2226_v18  ;;  %v2031_v9 = vsel %vm341_vm2, %v2028_v56, %v2030_v62 }
 0x1ad   : > { %5580 = vmatmul.mubr.msk.bf16.gmra.mrb[16].mxu1 %vm357_vm3, %v2031_v9  ;;  %5627 = vmatprep.subr.bf16.mxu0 %v6304_v1  ;;  %vm1971_vm3 = vcmask 58368  }
 0x1ae   : > { %5607 = vmatprep.mubr.msk.bf16.mxu1 %vm6305_vm1, %v6304_v1  ;;  %vm7026_vm10 = vmand %vm1971_vm3, %vm1843_vm12 }
 0x1b0   : > { %v1185_v2 = vpop.f32.mrb[100].mxu0 }
 0x1b1   : > { %v6796_v3 = vadd.f32 %v1185_v2, %v1035_v20  ;;  %v5477_v4 = vpop.f32.mrb[101].mxu0 }
 0x1b2   : > { %v1188_v37 = vpop.f32.mrb[102].mxu0 }
 0x1b3   : > { %v1225_v6 = vadd.f32 %v1188_v37, %v6757_v25  ;;  %v5478_v8 = vpop.f32.mrb[103].mxu0 }
 0x1b8   : > { %v1193_v14 = vpop.f32.mrb[104].mxu0 }
 0x1b9   : > { %v1226_v54 = vadd.f32 %v1193_v14, %v6759_v26  ;;  %v5481_v10 = vpop.f32.mrb[105].mxu0  ;;  %v2312_v26 = vsel %vm2224_vm9, %v2123_v16, 0 }
 0x1ba   : > { %v1196_v11 = vpop.f32.mrb[106].mxu0  ;;  %5606 = vmatpush3.bf16.msra.mxu1 %v2312_v26 }
 0x1bb   : > { %v1227_v0 = vadd.f32 %v1196_v11, %v6761_v31  ;;  %v5482_v60 = vpop.f32.mrb[107].mxu0  ;;  %5649 = vmatprep.subr.bf16.mxu1 %v6304_v1 }
 0x1c0   : > { %v1201_v19 = vpop.f32.mrb[108].mxu0 }
 0x1c1   : > { %v1228_v20 = vadd.f32 %v1201_v19, %v6763_v28  ;;  %v5485_v22 = vpop.f32.mrb[109].mxu0 }
 0x1c2   : > { %v1204_v24 = vpop.f32.mrb[110].mxu0 }
 0x1c3   : > { %v1229_v25 = vadd.f32 %v1204_v24, %v6771_v39  ;;  %v5486_v7 = vpop.f32.mrb[111].mxu0 }
 0x1c8   : > { %v1209_v21 = vpop.f32.mrb[112].mxu0 }
 0x1c9   : > { %v1230_v29 = vadd.f32 %v1209_v21, %v6778_v33  ;;  %v5489_v31 = vpop.f32.mrb[113].mxu0 }
 0x1ca   : > { %v1212_v27 = vpop.f32.mrb[114].mxu0 }
 0x1cb   : > { %v1231_v34 = vadd.f32 %v1212_v27, %v6781_v53  ;;  %v5490_v28 = vpop.f32.mrb[115].mxu0 }
 0x1d0   : > { %v1217_v15 = vpop.f32.mrb[116].mxu0 }
 0x1d1   : > { %v1232_v35 = vadd.f32 %v1217_v15, %v6787_v57  ;;  %v5493_v36 = vpop.f32.mrb[117].mxu0 }
 0x1d2   : > { %v1220_v30 = vpop.f32.mrb[118].mxu0 }
 0x1d3   : > { %v1233_v32 = vadd.f32 %v1220_v30, %v6790_v61  ;;  %v5494_v23 = vpop.f32.mrb[119].mxu0 }
 0x1d8   : > { %v1338_v39 = vpop.f32.mrb[120].mxu0 }
 0x1d9   : > { %v1377_v41 = vadd.f32 %v1338_v39, %v6796_v3  ;;  %v5499_v43 = vpop.f32.mrb[121].mxu0 }
 0x1da   : > { %v1341_v44 = vpop.f32.mrb[122].mxu0 }
 0x1db   : > { %v1378_v47 = vadd.f32 %v1341_v44, %v1225_v6  ;;  %v5500_v48 = vpop.f32.mrb[123].mxu0 }
 0x1dc   : > { %v6898_v48 = vpop.permute.xlu0 %1741 }
 0x1e0   : > { %v1346_v33 = vpop.f32.mrb[124].mxu0 }
 0x1e1   : > { %v1379_v49 = vadd.f32 %v1346_v33, %v1226_v54  ;;  %v5503_v51 = vpop.f32.mrb[125].mxu0 }
 0x1e2   : > { %v1349_v52 = vpop.f32.mrb[126].mxu0 }
 0x1e3   : > { %v1380_v53 = vadd.f32 %v1349_v52, %v1227_v0  ;;  %v5504_v40 = vpop.f32.mrb[127].mxu0 }
 0x1e8   : > { %v1354_v55 = vpop.f32.mrb[128].mxu0 }
 0x1e9   : > { %v1381_v42 = vadd.f32 %v1354_v55, %v1228_v20  ;;  %v5507_v38 = vpop.f32.mrb[129].mxu0 }
 0x1ea   : > { %v1357_v57 = vpop.f32.mrb[130].mxu0 }
 0x1eb   : > { %v1382_v58 = vadd.f32 %v1357_v57, %v1229_v25  ;;  %v5508_v45 = vpop.f32.mrb[131].mxu0  ;;  %v6902_v57 = vpop.permute.xlu0 %1746 }
 0x1f0   : > { %v1362_v59 = vpop.f32.mrb[132].mxu0 }
 0x1f1   : > { %v1383_v61 = vadd.f32 %v1362_v59, %v1230_v29  ;;  %v5511_v46 = vpop.f32.mrb[133].mxu0 }
 0x1f2   : > { %v1365_v63 = vpop.f32.mrb[134].mxu0 }
 0x1f3   : > { %v1384_v50 = vadd.f32 %v1365_v63, %v1231_v34  ;;  %v5512_v2 = vpop.f32.mrb[135].mxu0 }
 0x1f8   : > { %v1370_v3 = vpop.f32.mrb[136].mxu0 }
 0x1f9   : > { %v1385_v4 = vadd.f32 %v1370_v3, %v1232_v35  ;;  %v5515_v37 = vpop.f32.mrb[137].mxu0 }
 0x1fa   : > { %v1373_v5 = vpop.f32.mrb[138].mxu0 }
 0x1fb   : > { %v1386_v6 = vadd.f32 %v1373_v5, %v1233_v32  ;;  %v5516_v8 = vpop.f32.mrb[139].mxu0  ;;  %v6895_v32 = vld [vmem:[%s7766_s5] ss:$0 sm:$0xff] }
 0x200   : > { %v1495_v56 = vpop.f32.mrb[140].mxu0 }
 0x201   : > { %v1534_v13 = vadd.f32 %v1495_v56, %v1377_v41  ;;  %v5521_v14 = vpop.f32.mrb[141].mxu0 }
 0x202   : > { %v1498_v54 = vpop.f32.mrb[142].mxu0 }
 0x203   : > { %v1535_v10 = vadd.f32 %v1498_v54, %v1378_v47  ;;  %v5522_v11 = vpop.f32.mrb[143].mxu0  ;;  %v1959_v54 = vld [vmem:[#allocation2 + $0x4] sm:$0xe] }
 0x208   : > { %v1503_v0 = vpop.f32.mrb[144].mxu0 }
 0x209   : > { %v1536_v60 = vadd.f32 %v1503_v0, %v1379_v49  ;;  %v5525_v12 = vpop.f32.mrb[145].mxu0 }
 0x20a   : > { %v1506_v17 = vpop.f32.mrb[146].mxu0 }
 0x20b   : > { %v1537_v62 = vadd.f32 %v1506_v17, %v1380_v53  ;;  %v5526_v18 = vpop.f32.mrb[147].mxu0 }
 0x210   : > { %v1511_v19 = vpop.f32.mrb[148].mxu0 }
 0x211   : > { %v6880_v9 = vadd.f32 %v1511_v19, %v1381_v42  ;;  %v5529_v20 = vpop.f32.mrb[149].mxu0 }
 0x212   : > { %v1514_v22 = vpop.f32.mrb[150].mxu0 }
 0x213   : > { %v6882_v24 = vadd.f32 %v1514_v22, %v1382_v58  ;;  %v5530_v25 = vpop.f32.mrb[151].mxu0 }
 0x218   : > { %v1519_v7 = vpop.f32.mrb[152].mxu0 }
 0x219   : > { %v6884_v16 = vadd.f32 %v1519_v7, %v1383_v61  ;;  %v5533_v26 = vpop.f32.mrb[153].mxu0 }
 0x21a   : > { %v1522_v21 = vpop.f32.mrb[154].mxu0 }
 0x21b   : > { %v6886_v29 = vadd.f32 %v1522_v21, %v1384_v50  ;;  %v5534_v31 = vpop.f32.mrb[155].mxu0  ;;  %v6906_v50 = vpop.permute.xlu1 %1751 }
 0x21f   : > { %v6923_v31 = vpop.permute.xlu1 %1756 }
 0x220   : > { %v1527_v27 = vpop.f32.mrb[156].mxu0 }
 0x221   : > { %v6888_v34 = vadd.f32 %v1527_v27, %v1385_v4  ;;  %v5537_v28 = vpop.f32.mrb[157].mxu0 }
 0x222   : > { %v1530_v15 = vpop.f32.mrb[158].mxu0 }
 0x223   : > { %v6890_v35 = vadd.f32 %v1530_v15, %v1386_v6  ;;  %v5538_v36 = vpop.f32.mrb[159].mxu0 }
 0x228   : > { %v1655_v30 = vpop.f32.mrb[160].mxu0 }
 0x229   : > { %v1694_v23 = vadd.f32 %v1655_v30, %v1534_v13  ;;  %v5543_v39 = vpop.f32.mrb[161].mxu0 }
 0x22a   : > { %v1658_v41 = vpop.f32.mrb[162].mxu0 }
 0x22b   : > { %v1709_v43 = vadd.f32 %v6895_v32, %v1694_v23  ;;  %v1695_v44 = vadd.f32 %v1658_v41, %v1535_v10  ;;  %v5544_v47 = vpop.f32.mrb[163].mxu0 }
 0x22c   : > { %v2504_v47 = vld [vmem:[%s7764_s3 + $0xc] sm:$0xf] }
 0x22d   : > { %v1719_v33 = vmul.f32 0.2, %v1709_v43  ;;  %v1710_v49 = vadd.f32 %v6895_v32, %v1695_v44 }
 0x22f   : > { %v1729_v51 = vmax.f32 %v1709_v43, %v1719_v33  ;;  %v1720_v52 = vmul.f32 0.2, %v1710_v49 }
 0x230   : > { %v1663_v53 = vpop.f32.mrb[164].mxu0 }
 0x231   : > { %v1789_v40 = vmul.f32 %v6898_v48, %v1729_v51  ;;  %v1730_v55 = vmax.f32 %v1710_v49, %v1720_v52  ;;  %v1696_v42 = vadd.f32 %v1663_v53, %v1536_v60  ;;  %v5547_v38 = vpop.f32.mrb[165].mxu0  ;;  %v6935_v49 = vpop.permute.xlu0 %1761 }
 0x232   : > { %v1666_v58 = vpop.f32.mrb[166].mxu0 }
 0x233   : > { %v5175_v45 = vpack.c.bf16 %v1789_v40, %v1789_v40  ;;  %v1790_v59 = vmul.f32 %v6902_v57, %v1730_v55  ;;  %v1711_v61 = vadd.f32 %v6895_v32, %v1696_v42  ;;  %v1697_v46 = vadd.f32 %v1666_v58, %v1537_v62  ;;  %v5548_v63 = vpop.f32.mrb[167].mxu0 }
 0x235   : > { %v1847_v2 = vshrl.u32 %v5175_v45, 16  ;;  %v1850_v3 = vshll.u32 %v5175_v45, 16  ;;  %v5176_v4 = vpack.c.bf16 %v1790_v59, %v1790_v59  ;;  %v1721_v37 = vmul.f32 0.2, %v1711_v61  ;;  %v2124_v45 = vld [vmem:[#allocation2] sm:$0xf] }
 0x236   : > { %v1712_v5 = vadd.f32 %v6895_v32, %v1697_v46  ;;  %v2571_v59 = vsel %vm2224_vm9, %v2504_v47, 0 }
 0x237   : > { %v1849_v6 = vrot.slane %v1847_v2, 6  ;;  %v1852_v8 = vrot.slane %v1850_v3, 7  ;;  %v1856_v56 = vshrl.u32 %v5176_v4, 16  ;;  %v1859_v13 = vshll.u32 %v5176_v4, 16 }
 0x238   : > { %v1731_v10 = vmax.f32 %v1711_v61, %v1721_v37  ;;  %v1722_v11 = vmul.f32 0.2, %v1712_v5  ;;  %v1671_v0 = vpop.f32.mrb[168].mxu0 }
 0x239   : > { %v1853_v60 = vor.u32 %v1852_v8, %v1849_v6  ;;  %v1858_v12 = vrot.slane %v1856_v56, 6  ;;  %v1861_v17 = vrot.slane %v1859_v13, 7  ;;  %v1698_v62 = vadd.f32 %v1671_v0, %v6880_v9  ;;  %v5551_v18 = vpop.f32.mrb[169].mxu0  ;;  %v6944_v13 = vpop.permute.xlu1 %1766 }
 0x23a   : > { %v1791_v20 = vmul.f32 %v6906_v50, %v1731_v10  ;;  %v1732_v22 = vmax.f32 %v1712_v5, %v1722_v11  ;;  %v1674_v25 = vpop.f32.mrb[170].mxu0 }
 0x23b   : > { %v1854_v7 = vrot.slane %v1853_v60, 4  ;;  %v1960_v26 = vsel %vm6909_vm14, %v1853_v60, %v1959_v54  ;;  %v1862_v21 = vor.u32 %v1861_v17, %v1858_v12  ;;  %v1713_v9 = vadd.f32 %v6895_v32, %v1698_v62  ;;  %v5552_v27 = vpop.f32.mrb[171].mxu0 }
 0x23c   : > { %1961 = vst [vmem:[#allocation2 + $0x4] sm:$0xe] %v1960_v26  ;;  %v5177_v28 = vpack.c.bf16 %v1791_v20, %v1791_v20  ;;  %v1792_v15 = vmul.f32 %v6923_v31, %v1732_v22  ;;  %v1699_v36 = vadd.f32 %v1674_v25, %v6882_v24 }
 0x23d   : > { %v1863_v30 = vsel %vm6916_vm15, %v1854_v7, %v1862_v21  ;;  %v1723_v23 = vmul.f32 0.2, %v1713_v9  ;;  %v1864_v61 = vrot.slane %v1862_v21, 4  ;;  %v6961_v7 = vpop.permute.xlu0 %1771  ;;  %v6970_v47 = vpop.permute.xlu1 %1776 }
 0x23e   : > { %1962 = vst.msk [vmem:[#allocation2 + $0x8] sm:$0xf] %vm1799_vm8, %v1863_v30  ;;  %v1866_v39 = vshrl.u32 %v5177_v28, 16  ;;  %v1869_v41 = vshll.u32 %v5177_v28, 16  ;;  %v5178_v43 = vpack.c.bf16 %v1792_v15, %v1792_v15  ;;  %v1714_v44 = vadd.f32 %v6895_v32, %v1699_v36 }
 0x23f   : > { %v1733_v33 = vmax.f32 %v1713_v9, %v1723_v23 }
 0x240   : > { %v1868_v24 = vrot.slane %v1866_v39, 6  ;;  %v1871_v51 = vrot.slane %v1869_v41, 7  ;;  %v1876_v52 = vshrl.u32 %v5178_v43, 16  ;;  %v1879_v53 = vshll.u32 %v5178_v43, 16  ;;  %v1679_v40 = vpop.f32.mrb[172].mxu0 }
 0x241   : > { %v1793_v55 = vmul.f32 %v6935_v49, %v1733_v33  ;;  %v1724_v42 = vmul.f32 0.2, %v1714_v44  ;;  %v1700_v38 = vadd.f32 %v1679_v40, %v6884_v16  ;;  %v5555_v58 = vpop.f32.mrb[173].mxu0 }
 0x242   : > { %v1872_v46 = vor.u32 %v1871_v51, %v1868_v24  ;;  %v1878_v63 = vrot.slane %v1876_v52, 6  ;;  %v1881_v2 = vrot.slane %v1879_v53, 7  ;;  %v1682_v3 = vpop.f32.mrb[174].mxu0 }
 0x243   : > { %v5179_v4 = vpack.c.bf16 %v1793_v55, %v1793_v55  ;;  %v1734_v37 = vmax.f32 %v1714_v44, %v1724_v42  ;;  %v1715_v5 = vadd.f32 %v6895_v32, %v1700_v38  ;;  %v1701_v6 = vadd.f32 %v1682_v3, %v6886_v29  ;;  %v5556_v8 = vpop.f32.mrb[175].mxu0  ;;  %v6942_v56 = vld [vmem:[#allocation2 + $0x4] sm:$0xf]  ;;  %v2387_v44 = vld [vmem:[%s7764_s3 + $0x8] sm:$0xf] }
 0x244   : > { %v1873_v16 = vsel %vm6916_vm15, %v1864_v61, %v1872_v46  ;;  %v1874_v54 = vrot.slane %v1872_v46, 4  ;;  %v1882_v10 = vor.u32 %v1881_v2, %v1878_v63  ;;  %v6949_v11 = vcombine.low %v2124_v45, %v6942_v56 }
 0x245   : > { %1963 = vst.msk [vmem:[#allocation2 + $0xc] sm:$0xf] %vm1799_vm8, %v1873_v16  ;;  %v1886_v0 = vshrl.u32 %v5179_v4, 16  ;;  %v1889_v60 = vshll.u32 %v5179_v4, 16  ;;  %v1794_v12 = vmul.f32 %v6944_v13, %v1734_v37  ;;  %v1725_v29 = vmul.f32 0.2, %v1715_v5 }
 0x246   : > { %v1883_v17 = vsel %vm6916_vm15, %v1874_v54, %v1882_v10  ;;  %v1716_v62 = vadd.f32 %v6895_v32, %v1701_v6  ;;  %5608 = vmatmul.mubr.msk.bf16.vlgmr.msra.gmra.mrb[20].mxu1 %vm2208_vm0, %v6949_v11  ;;  %v1884_v26 = vrot.slane %v1882_v10, 4  ;;  %v2167_v27 = vshll.u32 %v6949_v11, 16 }
 0x247   : > { %1964 = vst.msk [vmem:[#allocation2 + $0x10] sm:$0xf] %vm1799_vm8, %v1883_v17  ;;  %v1888_v18 = vrot.slane %v1886_v0, 6  ;;  %v1891_v20 = vrot.slane %v1889_v60, 7  ;;  %v5180_v22 = vpack.c.bf16 %v1794_v12, %v1794_v12  ;;  %v1735_v25 = vmax.f32 %v1715_v5, %v1725_v29  ;;  %5611 = vmatprep.mubr.msk.bf16.mxu1 %vm6305_vm1, %v6304_v1  ;;  %5650 = vmatpush3.bf16.msra.mxu1 %v2571_v59  ;;  %v6991_v12 = vpop.permute.xlu0 %1781 }
 0x248   : > { %v1726_v21 = vmul.f32 0.2, %v1716_v62  ;;  %v1687_v9 = vpop.f32.mrb[176].mxu0  ;;  %5693 = vmatprep.subr.bf16.mxu1 %v6304_v1  ;;  %v2169_v45 = vrot.slane %v2167_v27, 1  ;;  %v2419_v59 = vsel %vm2224_vm9, %v2387_v44, 0 }
 0x249   : > { %v1892_v28 = vor.u32 %v1891_v20, %v1888_v18  ;;  %v1896_v15 = vshrl.u32 %v5180_v22, 16  ;;  %v1899_v36 = vshll.u32 %v5180_v22, 16  ;;  %v1795_v30 = vmul.f32 %v6961_v7, %v1735_v25  ;;  %v5559_v23 = vpop.f32.mrb[177].mxu0  ;;  %v6997_v25 = vpop.permute.xlu1 %1786 }
 0x24a   : > { %v1736_v39 = vmax.f32 %v1716_v62, %v1726_v21  ;;  %v1702_v41 = vadd.f32 %v1687_v9, %v6888_v34  ;;  %v1690_v43 = vpop.f32.mrb[178].mxu0 }
 0x24b   : > { %v1893_v33 = vsel %vm6916_vm15, %v1884_v26, %v1892_v28  ;;  %v1894_v24 = vrot.slane %v1892_v28, 4  ;;  %v1898_v51 = vrot.slane %v1896_v15, 6  ;;  %v1901_v52 = vrot.slane %v1899_v36, 7  ;;  %v5560_v53 = vpop.f32.mrb[179].mxu0 }
 0x24c   : > { %1965 = vst.msk [vmem:[#allocation2 + $0x14] sm:$0xf] %vm1799_vm8, %v1893_v33  ;;  %v5181_v40 = vpack.c.bf16 %v1795_v30, %v1795_v30  ;;  %v1796_v55 = vmul.f32 %v6970_v47, %v1736_v39  ;;  %v1717_v34 = vadd.f32 %v6895_v32, %v1702_v41  ;;  %v1703_v42 = vadd.f32 %v1690_v43, %v6890_v35  ;;  %v6978_v38 = vld [vmem:[#allocation2 + $0x8] sm:$0xff]  }
 0x24d   : > { %v1902_v58 = vor.u32 %v1901_v52, %v1898_v51  ;;  %v2165_v35 = vshrl.u32 %v6949_v11, 16  ;;  %v2172_v37 = vshll.u32 %v6978_v38, 16  ;;  %v2176_v30 = vshrl.u32 %v6978_v38, 16 }
 0x24e   : > { %v1906_v61 = vshrl.u32 %v5181_v40, 16  ;;  %v1909_v46 = vshll.u32 %v5181_v40, 16  ;;  %v5182_v63 = vpack.c.bf16 %v1796_v55, %v1796_v55  ;;  %v1727_v2 = vmul.f32 0.2, %v1717_v34  ;;  %5612 = vmatmul.mubr.msk.bf16.gmra.mrb[24].mxu1 %vm2208_vm0, %v6978_v38 }
 0x24f   : > { %v1903_v3 = vsel %vm6916_vm15, %v1894_v24, %v1902_v58  ;;  %v1718_v4 = vadd.f32 %v6895_v32, %v1703_v42  ;;  %5615 = vmatprep.mubr.msk.bf16.mxu1 %vm6305_vm1, %v6304_v1  ;;  %v2170_v0 = vor.u32 %v2169_v45, %v2165_v35  ;;  %v2174_v60 = vrot.slane %v2172_v37, 1 }
 0x250   : > { %1966 = vst.msk [vmem:[#allocation2 + $0x18] sm:$0xf] %vm1799_vm8, %v1903_v3  ;;  %v1908_v5 = vrot.slane %v1906_v61, 6  ;;  %v1911_v6 = vrot.slane %v1909_v46, 7  ;;  %v1916_v8 = vshrl.u32 %v5182_v63, 16  ;;  %v1919_v16 = vshll.u32 %v5182_v63, 16 }
 0x251   : > { %v1737_v54 = vmax.f32 %v1717_v34, %v1727_v2  ;;  %v1728_v10 = vmul.f32 0.2, %v1718_v4  ;;  %v1904_v32 = vrot.slane %v1902_v58, 4  ;;  %v2175_v20 = vsel %vm606_vm4, %v2170_v0, %v2174_v60  ;;  %v1973_v46 = vld [vmem:[#allocation2 + $0x2c] sm:$0x3] }
 0x252   : > { %v1912_v29 = vor.u32 %v1911_v6, %v1908_v5  ;;  %v1918_v11 = vrot.slane %v1916_v8, 6  ;;  %v1921_v17 = vrot.slane %v1919_v16, 7  ;;  %5586 = vmatmul.mubr.msk.bf16.vlgmr.msra.gmra.mrb[180].mxu0 %vm2208_vm0, %v2175_v20  ;;  %v2178_v44 = vor.u32 %v2176_v30, %v2174_v60  ;;  %v7043_v16 = vld [vmem:[#allocation2 + $0x8] sm:$0xf]  ;;  %v2505_v0 = vld [vmem:[#allocation2 + $0x4] sm:$0xe] }
 0x253   : > { %v1797_v62 = vmul.f32 %v6991_v12, %v1737_v54  ;;  %v1738_v18 = vmax.f32 %v1718_v4, %v1728_v10  ;;  %v6995_v22 = vld [vmem:[#allocation2 + $0x10] sm:$0xff]   ;;  %5628 = vmatpush3.bf16.msra.mxu0 %v2419_v59  ;;  %5589 = vmatprep.mubr.msk.bf16.mxu0 %vm6305_vm1, %v6304_v1 }
 0x254   : > { %v1913_v26 = vsel %vm6916_vm15, %v1904_v32, %v1912_v29  ;;  %v1914_v21 = vrot.slane %v1912_v29, 4  ;;  %v1922_v9 = vor.u32 %v1921_v17, %v1918_v11  ;;  %v2180_v15 = vshll.u32 %v6995_v22, 16  ;;  %5671 = vmatprep.subr.bf16.mxu0 %v6304_v1  ;;  %v7050_v60 = vld [vmem:[#allocation2 + $0xc] sm:$0xff]   ;;  %v2815_v20 = vld [vmem:[%s7764_s3 + $0x14] sm:$0xf] }
 0x255   : > { %1967 = vst.msk [vmem:[#allocation2 + $0x1c] sm:$0xf] %vm1799_vm8, %v1913_v26  ;;  %v5183_v27 = vpack.c.bf16 %v1797_v62, %v1797_v62  ;;  %v1798_v28 = vmul.f32 %v6997_v25, %v1738_v18  ;;  %v2184_v2 = vshrl.u32 %v6995_v22, 16  ;;  %v7060_v11 = vcombine.low %v2505_v0, %v7043_v16 }
 0x256   : > { %v1923_v36 = vsel %vm6916_vm15, %v1914_v21, %v1922_v9  ;;  %5616 = vmatmul.mubr.msk.bf16.gmra.mrb[28].mxu1 %vm2208_vm0, %v6995_v22  ;;  %v2182_v43 = vrot.slane %v2180_v15, 1  ;;  %v1924_v40 = vrot.slane %v1922_v9, 4  ;;  %v2545_v18 = vrot.slane %v7050_v60, 1 }
 0x257   : > { %1968 = vst.msk [vmem:[#allocation2 + $0x20] sm:$0xf] %vm1799_vm8, %v1923_v36  ;;  %v1926_v23 = vshrl.u32 %v5183_v27, 16  ;;  %v1929_v39 = vshll.u32 %v5183_v27, 16  ;;  %v5184_v41 = vpack.c.bf16 %v1798_v28, %v1798_v28  ;;  %5619 = vmatprep.mubr.msk.bf16.mxu1 %vm6305_vm1, %v6304_v1  ;;  %v2544_v9 = vrot.slane %v7060_v11, 1  ;;  %v7075_v36 = vld [vmem:[#allocation2 + $0x14] sm:$0xff]  }
 0x258   : > { %v2183_v53 = vsel %vm606_vm4, %v2178_v44, %v2182_v43  ;;  %v2186_v37 = vor.u32 %v2184_v2, %v2182_v43  ;;  %v2847_v28 = vsel %vm2224_vm9, %v2815_v20, 0  ;;  %v2823_v20 = vrot.slane %v7075_v36, 2 }
 0x259   : > { %v1928_v33 = vrot.slane %v1926_v23, 6  ;;  %v1931_v24 = vrot.slane %v1929_v39, 7  ;;  %v1936_v51 = vshrl.u32 %v5184_v41, 16  ;;  %v1939_v52 = vshll.u32 %v5184_v41, 16  ;;  %v2388_v41 = vld [vmem:[#allocation2] sm:$0xe] }
 0x25a   : > { %5590 = vmatmul.mubr.msk.bf16.gmra.mrb[184].mxu0 %vm2208_vm0, %v2183_v53  ;;  %v2546_v15 = vsel %vm1274_vm5, %v2544_v9, %v2545_v18  ;;  %v2547_v39 = vrot.slane %v7075_v36, 1  ;;  %v5041_v44 = vcombine.low %v2388_v41, %v6942_v56 }
 0x25b   : > { %v1932_v55 = vor.u32 %v1931_v24, %v1928_v33  ;;  %v1938_v34 = vrot.slane %v1936_v51, 6  ;;  %v1941_v42 = vrot.slane %v1939_v52, 7  ;;  %5593 = vmatprep.mubr.msk.bf16.mxu0 %vm6305_vm1, %v6304_v1  ;;  %v2393_v51 = vrot.slane %v6978_v38, 1  ;;  %v2656_v52 = vld [vmem:[%s7764_s3 + $0x10] sm:$0xf] }
 0x25c   : > { %v7018_v58 = vld [vmem:[#allocation2 + $0x18] sm:$0xff]   ;;  %v2548_v33 = vsel %vm1274_vm5, %v2545_v18, %v2547_v39  ;;  %v2392_v53 = vrot.slane %v5041_v44, 1  ;;  %v2665_v18 = vshll.u32 %v7060_v11, 16 }
 0x25d   : > { %v1933_v45 = vsel %vm6916_vm15, %v1924_v40, %v1932_v55  ;;  %v1934_v59 = vrot.slane %v1932_v55, 4  ;;  %v1942_v61 = vor.u32 %v1941_v42, %v1938_v34  ;;  %v2188_v3 = vshll.u32 %v7018_v58, 16 }
 0x25e   : > { %1969 = vst.msk [vmem:[#allocation2 + $0x24] sm:$0xf] %vm1799_vm8, %v1933_v45  ;;  %5620 = vmatmul.mubr.msk.bf16.gmra.mrb[32].mxu1 %vm2208_vm0, %v7018_v58  ;;  %v2192_v10 = vshrl.u32 %v7018_v58, 16  ;;  %v7088_v24 = vld [vmem:[#allocation2 + $0x1c] sm:$0xff]   ;;  %v2730_v40 = vsel %vm2224_vm9, %v2656_v52, 0  ;;  %v2394_v55 = vsel %vm1274_vm5, %v2392_v53, %v2393_v51  ;;  %v2395_v42 = vrot.slane %v6995_v22, 1 }
 0x25f   : > { %v1943_v4 = vsel %vm6916_vm15, %v1934_v59, %v1942_v61  ;;  %v1944_v35 = vrot.slane %v1942_v61, 4  ;;  %5623 = vmatprep.mubr.msk.bf16.mxu1 %vm6305_vm1, %v6304_v1  ;;  %v2190_v5 = vrot.slane %v2188_v3, 1  ;;  %v2549_v56 = vrot.slane %v7088_v24, 1 }
 0x260   : > { %1970 = vst.msk [vmem:[#allocation2 + $0x28] sm:$0xf] %vm1799_vm8, %v1943_v4  ;;  %v2396_v59 = vsel %vm1274_vm5, %v2393_v51, %v2395_v42  ;;  %v2397_v2 = vrot.slane %v7018_v58, 1  ;;  %v2667_v9 = vrot.slane %v2665_v18, 2  ;;  %v2825_v41 = vrot.slane %v7088_v24, 2 }
 0x261   : > { %v1974_v6 = vsel %vm7026_vm10, %v1944_v35, %v1973_v46  ;;  %v2191_v8 = vsel %vm606_vm4, %v2186_v37, %v2190_v5  ;;  %v2194_v17 = vor.u32 %v2192_v10, %v2190_v5  ;;  %v2550_v38 = vsel %vm1274_vm5, %v2547_v39, %v2549_v56  ;;  %v2816_v37 = vld [vmem:[#allocation2 + $0x4] sm:$0xc] }
 0x262   : > { %1975 = vst [vmem:[#allocation2 + $0x2c] sm:$0x3] %v1974_v6  ;;  %5594 = vmatmul.mubr.msk.bf16.gmra.mrb[188].mxu0 %vm2208_vm0, %v2191_v8  ;;  %v2398_v3 = vsel %vm1274_vm5, %v2395_v42, %v2397_v2  ;;  %v5064_v58 = vcombine.low %v2816_v37, %v7043_v16  ;;  %v2821_v5 = vrot.slane %v7050_v60, 2  ;;  %v3084_v6 = vld [vmem:[%s7764_s3 + $0x1c] sm:$0xf]  ;;  %v2688_v52 = vshrl.u32 %v7088_v24, 16 }
 0x263   : > { %5597 = vmatprep.mubr.msk.bf16.mxu0 %vm6305_vm1, %v6304_v1  ;;  %v2691_v53 = vshll.u32 %v7088_v24, 16  ;;  %v7182_v42 = vld [vmem:[#allocation2 + $0xc] sm:$0xf]  ;;  %v7185_v24 = vld [vmem:[#allocation2 + $0x10] sm:$0xff]  }
 0x264   : > { %v2820_v10 = vrot.slane %v5064_v58, 2  ;;  %v3102_v37 = vshll.u32 %v7185_v24, 16 }
 0x265   : > { %v7045_v54 = vld [vmem:[#allocation2 + $0x20] sm:$0xff]  }
 0x266   : > { %5624 = vmatmul.mubr.msk.bf16.gmra.mrb[36].mxu1 %vm2208_vm0, %v7045_v54  ;;  %v2196_v32 = vshll.u32 %v7045_v54, 16  ;;  %v2200_v27 = vshrl.u32 %v7045_v54, 16  ;;  %v2399_v35 = vrot.slane %v7045_v54, 1  ;;  %v3159_v54 = vsel %vm2224_vm9, %v3084_v6, 0 }
 0x267   : > { %v7055_v29 = vld [vmem:[#allocation2 + $0x28] ss:$0 sps:$4 sm:$0x11]   ;;  %5651 = vmatprep.mubr.msk.bf16.mxu1 %vm6305_vm1, %v6304_v1  ;;  %v2822_v0 = vsel %vm341_vm2, %v2820_v10, %v2821_v5 }
 0x268   : > { %v2198_v62 = vrot.slane %v2196_v32, 1  ;;  %v2204_v21 = vshll.u32 %v7055_v29, 16  ;;  %v7104_v34 = vld [vmem:[#allocation2 + $0x24] sm:$0xff]   ;;  %v2400_v8 = vsel %vm1274_vm5, %v2397_v2, %v2399_v35  ;;  %v2401_v16 = vrot.slane %v7055_v29, 1 }
 0x269   : > { %v2551_v45 = vrot.slane %v7104_v34, 1  ;;  %v6262_v46 = vld [vmem:[#allocation2 + $0x2c] ss:$0 sps:$4 sm:$0x11]   ;;  %v2670_v32 = vshrl.u32 %v7050_v60, 16  ;;  %v2700_v2 = vshll.u32 %v7104_v34, 16 }
 0x26a   : > { %v2199_v26 = vsel %vm606_vm4, %v2194_v17, %v2198_v62  ;;  %v2202_v30 = vor.u32 %v2200_v27, %v2198_v62  ;;  %v2206_v23 = vrot.slane %v2204_v21, 1  ;;  %v2553_v22 = vrot.slane %v6262_v46, 1 }
 0x26b   : > { %5598 = vmatmul.mubr.msk.bf16.gmra.mrb[192].mxu0 %vm2208_vm0, %v2199_v26  ;;  %v2552_v61 = vsel %vm1274_vm5, %v2549_v56, %v2551_v45  ;;  %v2673_v17 = vshll.u32 %v7050_v60, 16  ;;  %v2662_v62 = vshrl.u32 %v7060_v11, 16  ;;  %v2402_v26 = vsel %vm1274_vm5, %v2399_v35, %v2401_v16  ;;  %v7200_v16 = vld [vmem:[#allocation2 + $0x18] sm:$0xff]  }
 0x26c   : > { %5601 = vmatprep.mubr.msk.bf16.mxu0 %vm6305_vm1, %v6304_v1  ;;  %v2207_v43 = vsel %vm606_vm4, %v2202_v30, %v2206_v23  ;;  %v2554_v4 = vsel %vm1274_vm5, %v2551_v45, %v2553_v22  ;;  %v2672_v21 = vrot.slane %v2670_v32, 1  ;;  %v2824_v27 = vsel %vm341_vm2, %v2821_v5, %v2823_v20  ;;  %v2933_v22 = vld [vmem:[#allocation2 + $0x8] sm:$0xc] }
 0x26d   : > { %v2675_v29 = vrot.slane %v2673_v17, 2  ;;  %v2664_v60 = vrot.slane %v2662_v62, 1  ;;  %v2682_v30 = vshll.u32 %v7075_v36, 16  ;;  %v2697_v46 = vshrl.u32 %v7104_v34, 16 }
 0x26e   : > { %5652 = vmatmul.mubr.msk.bf16.vlgmr.msra.gmra.mrb[40].mxu1 %vm2208_vm0, %v2546_v15  ;;  %v2679_v15 = vshrl.u32 %v7075_v36, 16  ;;  %v2826_v36 = vsel %vm341_vm2, %v2823_v20, %v2825_v41  ;;  %v3099_v35 = vshrl.u32 %v7185_v24, 16  ;;  %v2702_v6 = vrot.slane %v2700_v2, 2 }
 0x26f   : > { %5655 = vmatprep.mubr.msk.bf16.mxu1 %vm6305_vm1, %v6304_v1  ;;  %5694 = vmatpush3.bf16.msra.mxu1 %v2847_v28  ;;  %v2676_v11 = vor.u32 %v2675_v29, %v2672_v21  ;;  %v2932_v28 = vld [vmem:[%s7764_s3 + $0x18] sm:$0xf]  ;;  %v2668_v23 = vor.u32 %v2667_v9, %v2664_v60  ;;  %v2699_v5 = vrot.slane %v2697_v46, 1  ;;  %v3108_v21 = vshrl.u32 %v7200_v16, 16 }
 0x270   : > { %5737 = vmatprep.subr.bf16.mxu1 %v6304_v1  ;;  %v2999_v39 = vsel %vm2224_vm9, %v2932_v28, 0  ;;  %v2681_v44 = vrot.slane %v2679_v15, 1  ;;  %v3111_v29 = vshll.u32 %v7200_v16, 16 }
 0x271   : > { %v2703_v32 = vor.u32 %v2702_v6, %v2699_v5  ;;  %v3110_v15 = vrot.slane %v3108_v21, 2 }
 0x273   : > { %5602 = vmatmul.mubr.msk.bf16.gmra.mrb[196].mxu0 %vm2208_vm0, %v2207_v43  ;;  %v2677_v43 = vsel %vm1549_vm7, %v2668_v23, %v2676_v11  ;;  %v7212_v23 = vld [vmem:[#allocation2 + $0x20] sm:$0xff]  }
 0x274   : > { %5629 = vmatprep.mubr.msk.bf16.mxu0 %vm6305_vm1, %v6304_v1 }
 0x276   : > { %5656 = vmatmul.mubr.msk.bf16.gmra.mrb[44].mxu1 %vm2208_vm0, %v2548_v33  ;;  %v2684_v33 = vrot.slane %v2682_v30, 2  ;;  %v3113_v30 = vrot.slane %v3111_v29, 3  ;;  %v3245_v29 = vld [vmem:[#allocation2 + $0x8] sm:$0x8] }
 0x277   : > { %5659 = vmatprep.mubr.msk.bf16.mxu1 %vm6305_vm1, %v6304_v1 }
 0x278   : > { %v2685_v51 = vor.u32 %v2684_v33, %v2681_v44  ;;  %v3120_v44 = vshll.u32 %v7212_v23, 16 }
 0x27a   : > { %v2686_v56 = vsel %vm1549_vm7, %v2676_v11, %v2685_v51 }
 0x27b   : > { %5630 = vmatmul.mubr.msk.bf16.vlgmr.msra.gmra.mrb[200].mxu0 %vm2208_vm0, %v2394_v55  ;;  %v2690_v55 = vrot.slane %v2688_v52, 1  ;;  %v3122_v52 = vrot.slane %v3120_v44, 3 }
 0x27c   : > { %5672 = vmatpush3.bf16.msra.mxu0 %v2730_v40  ;;  %5633 = vmatprep.mubr.msk.bf16.mxu0 %vm6305_vm1, %v6304_v1  ;;  %v2827_v40 = vrot.slane %v7104_v34, 2 }
 0x27d   : > { %5715 = vmatprep.subr.bf16.mxu0 %v6304_v1 }
 0x27e   : > { %5660 = vmatmul.mubr.msk.bf16.gmra.mrb[48].mxu1 %vm2208_vm0, %v2550_v38  ;;  %v2693_v38 = vrot.slane %v2691_v53, 2  ;;  %v2828_v45 = vsel %vm341_vm2, %v2825_v41, %v2827_v40  ;;  %v3114_v41 = vor.u32 %v3113_v30, %v3110_v15  ;;  %v7224_v53 = vld [vmem:[#allocation2 + $0x28] sm:$0xff]  }
 0x27f   : > { %5663 = vmatprep.mubr.msk.bf16.mxu1 %vm6305_vm1, %v6304_v1  ;;  %v3256_v30 = vrot.slane %v7224_v53, 3 }
 0x283   : > { %5634 = vmatmul.mubr.msk.bf16.gmra.mrb[204].mxu0 %vm2208_vm0, %v2396_v59  ;;  %v6264_v59 = vld [vmem:[#allocation2 + $0x2c] ss:$0 sps:$4 sm:$0x33]  }
 0x284   : > { %5637 = vmatprep.mubr.msk.bf16.mxu0 %vm6305_vm1, %v6304_v1  ;;  %v2706_v17 = vshrl.u32 %v6264_v59, 16  ;;  %v2709_v62 = vshll.u32 %v6264_v59, 16 }
 0x286   : > { %5664 = vmatmul.mubr.msk.bf16.gmra.mrb[52].mxu1 %vm2208_vm0, %v2552_v61  ;;  %v2694_v61 = vor.u32 %v2693_v38, %v2690_v55  ;;  %v2708_v9 = vrot.slane %v2706_v17, 1 }
 0x287   : > { %5667 = vmatprep.mubr.msk.bf16.mxu1 %vm6305_vm1, %v6304_v1 }
 0x288   : > { %v2695_v58 = vsel %vm1549_vm7, %v2685_v51, %v2694_v61  ;;  %v2704_v60 = vsel %vm1549_vm7, %v2694_v61, %v2703_v32  ;;  %v3129_v61 = vshll.u32 %v7224_v53, 16 }
 0x28b   : > { %5638 = vmatmul.mubr.msk.bf16.gmra.mrb[208].mxu0 %vm2208_vm0, %v2398_v3  ;;  %v5070_v3 = vcombine.low %v2933_v22, %v7182_v42 }
 0x28c   : > { %5641 = vmatprep.mubr.msk.bf16.mxu0 %vm6305_vm1, %v6304_v1 }
 0x28d   : > { %v3094_v10 = vshll.u32 %v5070_v3, 16  ;;  %v2972_v55 = vrot.slane %v5070_v3, 2 }
 0x28e   : > { %5668 = vmatmul.mubr.msk.bf16.gmra.mrb[56].mxu1 %vm2208_vm0, %v2554_v4  ;;  %v2829_v4 = vrot.slane %v6264_v59, 2  ;;  %v3126_v59 = vshrl.u32 %v7224_v53, 16 }
 0x28f   : > { %5695 = vmatprep.mubr.msk.bf16.mxu1 %vm6305_vm1, %v6304_v1  ;;  %v3096_v20 = vrot.slane %v3094_v10, 3 }
 0x290   : > { %v2830_v34 = vsel %vm341_vm2, %v2827_v40, %v2829_v4  ;;  %v2973_v40 = vrot.slane %v7185_v24, 2  ;;  %v3128_v22 = vrot.slane %v3126_v59, 2  ;;  %v3131_v4 = vrot.slane %v3129_v61, 3 }
 0x292   : > { %v2974_v46 = vsel %vm341_vm2, %v2972_v55, %v2973_v40 }
 0x293   : > { %5642 = vmatmul.mubr.msk.bf16.gmra.mrb[212].mxu0 %vm2208_vm0, %v2400_v8  ;;  %v3091_v8 = vshrl.u32 %v5070_v3, 16  ;;  %v6271_v3 = vld [vmem:[#allocation2 + $0x30] ss:$0 sps:$4 sm:$0x77]  }
 0x294   : > { %5645 = vmatprep.mubr.msk.bf16.mxu0 %vm6305_vm1, %v6304_v1  ;;  %v3138_v5 = vshll.u32 %v6271_v3, 16 }
 0x295   : > { %v3093_v18 = vrot.slane %v3091_v8, 2 }
 0x296   : > { %5696 = vmatmul.mubr.msk.bf16.vlgmr.msra.gmra.mrb[60].mxu1 %vm2208_vm0, %v2822_v0  ;;  %v3104_v0 = vrot.slane %v3102_v37, 3  ;;  %v3132_v37 = vor.u32 %v3131_v4, %v3128_v22 }
 0x297   : > { %5699 = vmatprep.mubr.msk.bf16.mxu1 %vm6305_vm1, %v6304_v1  ;;  %5738 = vmatpush3.bf16.msra.mxu1 %v3159_v54  ;;  %v3101_v54 = vrot.slane %v3099_v35, 2  ;;  %v3097_v11 = vor.u32 %v3096_v20, %v3093_v18  ;;  %v2975_v35 = vrot.slane %v7200_v16, 2  ;;  %v6272_v18 = vld [vmem:[#allocation2 + $0x30] ss:$0 sps:$4 sm:$0x33]  }
 0x298   : > { %5781 = vmatprep.subr.bf16.mxu1 %v6304_v1 }
 0x299   : > { %v2976_v6 = vsel %vm341_vm2, %v2973_v40, %v2975_v35 }
 0x29b   : > { %5646 = vmatmul.mubr.msk.bf16.gmra.mrb[216].mxu0 %vm2208_vm0, %v2402_v26  ;;  %v3105_v26 = vor.u32 %v3104_v0, %v3101_v54  ;;  %v2977_v54 = vrot.slane %v7212_v23, 2 }
 0x29c   : > { %5673 = vmatprep.mubr.msk.bf16.mxu0 %vm6305_vm1, %v6304_v1 }
 0x29d   : > { %v3106_v28 = vsel %vm3089_vm11, %v3097_v11, %v3105_v26 }
 0x29e   : > { %5700 = vmatmul.mubr.msk.bf16.gmra.mrb[64].mxu1 %vm2208_vm0, %v2824_v27  ;;  %v2711_v27 = vrot.slane %v2709_v62, 2  ;;  %v2979_v62 = vrot.slane %v7224_v53, 2 }
 0x29f   : > { %5703 = vmatprep.mubr.msk.bf16.mxu1 %vm6305_vm1, %v6304_v1 }
 0x2a0   : > { %v2980_v20 = vsel %vm341_vm2, %v2977_v54, %v2979_v62 }
 0x2a3   : > { %5674 = vmatmul.mubr.msk.bf16.vlgmr.msra.gmra.mrb[220].mxu0 %vm2208_vm0, %v2677_v43  ;;  %v3117_v43 = vshrl.u32 %v7212_v23, 16 }
 0x2a4   : > { %5716 = vmatpush3.bf16.msra.mxu0 %v2999_v39  ;;  %5677 = vmatprep.mubr.msk.bf16.mxu0 %vm6305_vm1, %v6304_v1  ;;  %v2712_v39 = vor.u32 %v2711_v27, %v2708_v9  ;;  %v3250_v9 = vrot.slane %v7185_v24, 3 }
 0x2a5   : > { %5759 = vmatprep.subr.bf16.mxu0 %v6304_v1  ;;  %v3119_v51 = vrot.slane %v3117_v43, 2 }
 0x2a6   : > { %5704 = vmatmul.mubr.msk.bf16.gmra.mrb[68].mxu1 %vm2208_vm0, %v2826_v36  ;;  %v2713_v33 = vsel %vm1549_vm7, %v2703_v32, %v2712_v39  ;;  %v3115_v36 = vsel %vm3089_vm11, %v3105_v26, %v3114_v41  ;;  %v2978_v32 = vsel %vm341_vm2, %v2975_v35, %v2977_v54  ;;  %v2981_v26 = vrot.slane %v6272_v18, 2 }
 0x2a7   : > { %5707 = vmatprep.mubr.msk.bf16.mxu1 %vm6305_vm1, %v6304_v1  ;;  %v3258_v39 = vrot.slane %v6271_v3, 3 }
 0x2a8   : > { %v2982_v21 = vsel %vm341_vm2, %v2979_v62, %v2981_v26 }
 0x2ab   : > { %5678 = vmatmul.mubr.msk.bf16.gmra.mrb[224].mxu0 %vm2208_vm0, %v2686_v56  ;;  %v3244_v56 = vld [vmem:[%s7764_s3 + $0x20] sm:$0xf] }
 0x2ac   : > { %5681 = vmatprep.mubr.msk.bf16.mxu0 %vm6305_vm1, %v6304_v1  ;;  %v3276_v38 = vsel %vm2224_vm9, %v3244_v56, 0 }
 0x2ae   : > { %5708 = vmatmul.mubr.msk.bf16.gmra.mrb[72].mxu1 %vm2208_vm0, %v2828_v45  ;;  %v3123_v45 = vor.u32 %v3122_v52, %v3119_v51 }
 0x2af   : > { %5711 = vmatprep.mubr.msk.bf16.mxu1 %vm6305_vm1, %v6304_v1 }
 0x2b0   : > { %v3124_v2 = vsel %vm3089_vm11, %v3114_v41, %v3123_v45  ;;  %v3133_v8 = vsel %vm3089_vm11, %v3123_v45, %v3132_v37  ;;  %v3259_v41 = vsel %vm1427_vm6, %v3256_v30, %v3258_v39 }
 0x2b3   : > { %5682 = vmatmul.mubr.msk.bf16.gmra.mrb[228].mxu0 %vm2208_vm0, %v2695_v58  ;;  %v3135_v58 = vshrl.u32 %v6271_v3, 16 }
 0x2b4   : > { %5685 = vmatprep.mubr.msk.bf16.mxu0 %vm6305_vm1, %v6304_v1 }
 0x2b5   : > { %v3137_v10 = vrot.slane %v3135_v58, 2 }
 0x2b6   : > { %5712 = vmatmul.mubr.msk.bf16.gmra.mrb[76].mxu1 %vm2208_vm0, %v2830_v34  ;;  %v3140_v34 = vrot.slane %v3138_v5, 3 }
 0x2b7   : > { %5739 = vmatprep.mubr.msk.bf16.mxu1 %vm6305_vm1, %v6304_v1 }
 0x2b8   : > { %v3141_v0 = vor.u32 %v3140_v34, %v3137_v10 }
 0x2ba   : > { %v3142_v17 = vsel %vm3089_vm11, %v3132_v37, %v3141_v0 }
 0x2bb   : > { %5686 = vmatmul.mubr.msk.bf16.gmra.mrb[232].mxu0 %vm2208_vm0, %v2704_v60  ;;  %v5087_v60 = vcombine.low %v3245_v29, %v7182_v42  ;;  %v3254_v42 = vrot.slane %v7212_v23, 3 }
 0x2bc   : > { %5689 = vmatprep.mubr.msk.bf16.mxu0 %vm6305_vm1, %v6304_v1 }
 0x2bd   : > { %v3249_v27 = vrot.slane %v5087_v60, 3 }
 0x2be   : > { %5740 = vmatmul.mubr.msk.bf16.vlgmr.msra.gmra.mrb[80].mxu1 %vm2208_vm0, %v3106_v28  ;;  %v3252_v28 = vrot.slane %v7200_v16, 3  ;;  %v3257_v16 = vsel %vm1427_vm6, %v3254_v42, %v3256_v30 }
 0x2bf   : > { %5743 = vmatprep.mubr.msk.bf16.mxu1 %vm6305_vm1, %v6304_v1  ;;  %v3251_v11 = vsel %vm1427_vm6, %v3249_v27, %v3250_v9 }
 0x2c0   : > { %v3253_v15 = vsel %vm1427_vm6, %v3250_v9, %v3252_v28  ;;  %v3255_v24 = vsel %vm1427_vm6, %v3252_v28, %v3254_v42 }
 0x2c3   : > { %5690 = vmatmul.mubr.msk.bf16.gmra.mrb[236].mxu0 %vm2208_vm0, %v2713_v33 }
 0x2c4   : > { %5717 = vmatprep.mubr.msk.bf16.mxu0 %vm6305_vm1, %v6304_v1 }
 0x2c6   : > { %5744 = vmatmul.mubr.msk.bf16.gmra.mrb[84].mxu1 %vm2208_vm0, %v3115_v36 }
 0x2c7   : > { %5747 = vmatprep.mubr.msk.bf16.mxu1 %vm6305_vm1, %v6304_v1 }
 0x2cb   : > { %5718 = vmatmul.mubr.msk.bf16.vlgmr.msra.gmra.mrb[240].mxu0 %vm2208_vm0, %v2974_v46 }
 0x2cc   : > { %5760 = vmatpush3.bf16.msra.mxu0 %v3276_v38  ;;  %5721 = vmatprep.mubr.msk.bf16.mxu0 %vm6305_vm1, %v6304_v1 }
 0x2ce   : > { %5748 = vmatmul.mubr.msk.bf16.gmra.mrb[88].mxu1 %vm2208_vm0, %v3124_v2 }
 0x2cf   : > { %5751 = vmatprep.mubr.msk.bf16.mxu1 %vm6305_vm1, %v6304_v1 }
 0x2d3   : > { %5722 = vmatmul.mubr.msk.bf16.gmra.mrb[244].mxu0 %vm2208_vm0, %v2976_v6 }
 0x2d4   : > { %5725 = vmatprep.mubr.msk.bf16.mxu0 %vm6305_vm1, %v6304_v1 }
 0x2d6   : > { %5752 = vmatmul.mubr.msk.bf16.gmra.mrb[92].mxu1 %vm2208_vm0, %v3133_v8 }
 0x2d7   : > { %5755 = vmatprep.mubr.msk.bf16.mxu1 %vm6305_vm1, %v6304_v1 }
 0x2db   : > { %5726 = vmatmul.mubr.msk.bf16.gmra.mrb[248].mxu0 %vm2208_vm0, %v2978_v32 }
 0x2dc   : > { %5729 = vmatprep.mubr.msk.bf16.mxu0 %vm6305_vm1, %v6304_v1 }
 0x2de   : > { %5756 = vmatmul.mubr.msk.bf16.gmra.mrb[96].mxu1 %vm2208_vm0, %v3142_v17 }
 0x2df   : > { %5783 = vmatprep.mubr.msk.bf16.mxu1 %vm6305_vm1, %v6304_v1 }
 0x2e3   : > { %5730 = vmatmul.mubr.msk.bf16.gmra.mrb[252].mxu0 %vm2208_vm0, %v2980_v20 }
 0x2e4   : > { %5733 = vmatprep.mubr.msk.bf16.mxu0 %vm6305_vm1, %v6304_v1 }
 0x2eb   : > { %5734 = vmatmul.mubr.msk.bf16.gmra.mrb[0].mxu0 %vm2208_vm0, %v2982_v21 }
 0x2ec   : > { %5761 = vmatprep.mubr.msk.bf16.mxu0 %vm6305_vm1, %v6304_v1 }
 0x2f3   : > { %5762 = vmatmul.mubr.msk.bf16.vlgmr.msra.gmra.mrb[4].mxu0 %vm2208_vm0, %v3251_v11 }
 0x2f4   : > { %5765 = vmatprep.mubr.msk.bf16.mxu0 %vm6305_vm1, %v6304_v1 }
 0x2fb   : > { %5766 = vmatmul.mubr.msk.bf16.gmra.mrb[8].mxu0 %vm2208_vm0, %v3253_v15 }
 0x2fc   : > { %5769 = vmatprep.mubr.msk.bf16.mxu0 %vm6305_vm1, %v6304_v1 }
 0x303   : > { %5770 = vmatmul.mubr.msk.bf16.gmra.mrb[12].mxu0 %vm2208_vm0, %v3255_v24  ;;  %v3565_v24 = vld [vmem:[%s7765_s4 + $0x4] sm:$0xf] }
 0x304   : > { %5773 = vmatprep.mubr.msk.bf16.mxu0 %vm6305_vm1, %v6304_v1 }
 0x30b   : > { %5774 = vmatmul.mubr.msk.bf16.gmra.mrb[16].mxu0 %vm2208_vm0, %v3257_v16  ;;  %v3655_v16 = vsel %vm2224_vm9, %v3565_v24, 0 }
 0x30c   : > { %5777 = vmatprep.mubr.msk.bf16.mxu0 %vm6305_vm1, %v6304_v1  ;;  %5782 = vmatpush3.bf16.msra.mxu1 %v3655_v16 }
 0x30d   : > { %5803 = vmatprep.subr.bf16.mxu1 %v6304_v1 }
 0x313   : > { %5778 = vmatmul.mubr.msk.bf16.gmra.mrb[20].mxu0 %vm2208_vm0, %v3259_v41 }
 0x319   : > { %v2348_v23 = vpop.f32.mrb[20].mxu1 }
 0x31a   : > { %v5609_v43 = vpop.f32.mrb[21].mxu1 }
 0x31b   : > { %v2351_v44 = vpop.f32.mrb[22].mxu1 }
 0x31c   : > { %v5610_v33 = vpop.f32.mrb[23].mxu1 }
 0x321   : > { %v2356_v36 = vpop.f32.mrb[24].mxu1 }
 0x322   : > { %v5613_v51 = vpop.f32.mrb[25].mxu1 }
 0x323   : > { %v2359_v52 = vpop.f32.mrb[26].mxu1 }
 0x324   : > { %v5614_v53 = vpop.f32.mrb[27].mxu1 }
 0x325   : > { %v2262_v40 = vpop.f32.mrb[180].mxu0 }
 0x326   : > { %v2349_v56 = vadd.f32 %v2348_v23, %v2262_v40  ;;  %v5587_v55 = vpop.f32.mrb[181].mxu0 }
 0x327   : > { %v2265_v38 = vpop.f32.mrb[182].mxu0 }
 0x328   : > { %v2352_v59 = vadd.f32 %v2351_v44, %v2265_v38  ;;  %v5588_v61 = vpop.f32.mrb[183].mxu0 }
 0x329   : > { %v2364_v45 = vpop.f32.mrb[28].mxu1 }
 0x32a   : > { %v5617_v46 = vpop.f32.mrb[29].mxu1 }
 0x32b   : > { %v2367_v2 = vpop.f32.mrb[30].mxu1 }
 0x32c   : > { %v5618_v22 = vpop.f32.mrb[31].mxu1 }
 0x32d   : > { %v2270_v4 = vpop.f32.mrb[184].mxu0 }
 0x32e   : > { %v2357_v3 = vadd.f32 %v2356_v36, %v2270_v4  ;;  %v5591_v35 = vpop.f32.mrb[185].mxu0 }
 0x32f   : > { %v2273_v37 = vpop.f32.mrb[186].mxu0 }
 0x330   : > { %v2360_v5 = vadd.f32 %v2359_v52, %v2273_v37  ;;  %v5592_v6 = vpop.f32.mrb[187].mxu0 }
 0x331   : > { %v2372_v58 = vpop.f32.mrb[32].mxu1 }
 0x332   : > { %v5621_v8 = vpop.f32.mrb[33].mxu1 }
 0x333   : > { %v2375_v10 = vpop.f32.mrb[34].mxu1 }
 0x334   : > { %v5622_v34 = vpop.f32.mrb[35].mxu1 }
 0x335   : > { %v2278_v54 = vpop.f32.mrb[188].mxu0 }
 0x336   : > { %v2365_v0 = vadd.f32 %v2364_v45, %v2278_v54  ;;  %v5595_v32 = vpop.f32.mrb[189].mxu0 }
 0x337   : > { %v2281_v17 = vpop.f32.mrb[190].mxu0 }
 0x338   : > { %v2368_v62 = vadd.f32 %v2367_v2, %v2281_v17  ;;  %v5596_v18 = vpop.f32.mrb[191].mxu0 }
 0x339   : > { %v2380_v20 = vpop.f32.mrb[36].mxu1 }
 0x33a   : > { %v5625_v26 = vpop.f32.mrb[37].mxu1 }
 0x33b   : > { %v2383_v21 = vpop.f32.mrb[38].mxu1 }
 0x33c   : > { %v5626_v29 = vpop.f32.mrb[39].mxu1 }
 0x33e   : > { %v2286_v60 = vpop.f32.mrb[192].mxu0 }
 0x33f   : > { %v2373_v9 = vadd.f32 %v2372_v58, %v2286_v60  ;;  %v5599_v27 = vpop.f32.mrb[193].mxu0 }
 0x340   : > { %v2289_v11 = vpop.f32.mrb[194].mxu0 }
 0x341   : > { %v2376_v28 = vadd.f32 %v2375_v10, %v2289_v11  ;;  %v5600_v15 = vpop.f32.mrb[195].mxu0  ;;  %v2607_v42 = vpop.f32.mrb[40].mxu1 }
 0x342   : > { %v5653_v30 = vpop.f32.mrb[41].mxu1 }
 0x343   : > { %v2610_v39 = vpop.f32.mrb[42].mxu1 }
 0x344   : > { %v5654_v41 = vpop.f32.mrb[43].mxu1 }
 0x346   : > { %v2294_v23 = vpop.f32.mrb[196].mxu0 }
 0x347   : > { %v2381_v43 = vadd.f32 %v2380_v20, %v2294_v23  ;;  %v5603_v44 = vpop.f32.mrb[197].mxu0 }
 0x348   : > { %v2297_v33 = vpop.f32.mrb[198].mxu0 }
 0x349   : > { %v2384_v36 = vadd.f32 %v2383_v21, %v2297_v33  ;;  %v5604_v51 = vpop.f32.mrb[199].mxu0  ;;  %v2615_v52 = vpop.f32.mrb[44].mxu1 }
 0x34a   : > { %v5657_v53 = vpop.f32.mrb[45].mxu1 }
 0x34b   : > { %v2618_v40 = vpop.f32.mrb[46].mxu1 }
 0x34c   : > { %v5658_v55 = vpop.f32.mrb[47].mxu1 }
 0x34e   : > { %v2455_v38 = vpop.f32.mrb[200].mxu0 }
 0x34f   : > { %v2494_v45 = vadd.f32 %v2455_v38, %v2349_v56  ;;  %v5631_v61 = vpop.f32.mrb[201].mxu0 }
 0x350   : > { %v2458_v46 = vpop.f32.mrb[202].mxu0 }
 0x351   : > { %v2495_v2 = vadd.f32 %v2458_v46, %v2352_v59  ;;  %v5632_v22 = vpop.f32.mrb[203].mxu0  ;;  %v2623_v4 = vpop.f32.mrb[48].mxu1  ;;  %v2646_v35 = vadd.f32 %v2607_v42, %v2494_v45 }
 0x352   : > { %v5661_v37 = vpop.f32.mrb[49].mxu1 }
 0x353   : > { %v2626_v58 = vpop.f32.mrb[50].mxu1  ;;  %v2647_v6 = vadd.f32 %v2610_v39, %v2495_v2 }
 0x354   : > { %v5662_v8 = vpop.f32.mrb[51].mxu1 }
 0x356   : > { %v2463_v10 = vpop.f32.mrb[204].mxu0 }
 0x357   : > { %v2496_v34 = vadd.f32 %v2463_v10, %v2357_v3  ;;  %v5635_v54 = vpop.f32.mrb[205].mxu0 }
 0x358   : > { %v2466_v32 = vpop.f32.mrb[206].mxu0 }
 0x359   : > { %v2497_v17 = vadd.f32 %v2466_v32, %v2360_v5  ;;  %v5636_v18 = vpop.f32.mrb[207].mxu0  ;;  %v2631_v20 = vpop.f32.mrb[52].mxu1  ;;  %v2648_v26 = vadd.f32 %v2615_v52, %v2496_v34 }
 0x35a   : > { %v5665_v21 = vpop.f32.mrb[53].mxu1 }
 0x35b   : > { %v2634_v56 = vpop.f32.mrb[54].mxu1  ;;  %v2649_v29 = vadd.f32 %v2618_v40, %v2497_v17 }
 0x35c   : > { %v5666_v60 = vpop.f32.mrb[55].mxu1 }
 0x35e   : > { %v2471_v59 = vpop.f32.mrb[208].mxu0 }
 0x35f   : > { %v2498_v27 = vadd.f32 %v2471_v59, %v2365_v0  ;;  %v5639_v11 = vpop.f32.mrb[209].mxu0 }
 0x360   : > { %v2474_v15 = vpop.f32.mrb[210].mxu0 }
 0x361   : > { %v2499_v42 = vadd.f32 %v2474_v15, %v2368_v62  ;;  %v5640_v24 = vpop.f32.mrb[211].mxu0  ;;  %v2639_v30 = vpop.f32.mrb[56].mxu1  ;;  %v2650_v16 = vadd.f32 %v2623_v4, %v2498_v27 }
 0x362   : > { %v5669_v39 = vpop.f32.mrb[57].mxu1 }
 0x363   : > { %v2642_v3 = vpop.f32.mrb[58].mxu1  ;;  %v2651_v41 = vadd.f32 %v2626_v58, %v2499_v42 }
 0x364   : > { %v5670_v23 = vpop.f32.mrb[59].mxu1 }
 0x366   : > { %v2479_v5 = vpop.f32.mrb[212].mxu0 }
 0x367   : > { %v2500_v44 = vadd.f32 %v2479_v5, %v2373_v9  ;;  %v5643_v33 = vpop.f32.mrb[213].mxu0 }
 0x368   : > { %v2482_v51 = vpop.f32.mrb[214].mxu0 }
 0x369   : > { %v2501_v52 = vadd.f32 %v2482_v51, %v2376_v28  ;;  %v5644_v53 = vpop.f32.mrb[215].mxu0  ;;  %v2883_v40 = vpop.f32.mrb[60].mxu1  ;;  %v2652_v55 = vadd.f32 %v2631_v20, %v2500_v44 }
 0x36a   : > { %v5697_v38 = vpop.f32.mrb[61].mxu1 }
 0x36b   : > { %v2886_v0 = vpop.f32.mrb[62].mxu1  ;;  %v2653_v45 = vadd.f32 %v2634_v56, %v2501_v52 }
 0x36c   : > { %v5698_v61 = vpop.f32.mrb[63].mxu1 }
 0x36e   : > { %v2487_v62 = vpop.f32.mrb[216].mxu0 }
 0x36f   : > { %v2502_v46 = vadd.f32 %v2487_v62, %v2381_v43  ;;  %v5647_v2 = vpop.f32.mrb[217].mxu0 }
 0x370   : > { %v2490_v22 = vpop.f32.mrb[218].mxu0 }
 0x371   : > { %v2503_v4 = vadd.f32 %v2490_v22, %v2384_v36  ;;  %v5648_v37 = vpop.f32.mrb[219].mxu0  ;;  %v2891_v58 = vpop.f32.mrb[64].mxu1  ;;  %v2654_v8 = vadd.f32 %v2639_v30, %v2502_v46 }
 0x372   : > { %v5701_v10 = vpop.f32.mrb[65].mxu1 }
 0x373   : > { %v2894_v9 = vpop.f32.mrb[66].mxu1  ;;  %v2655_v34 = vadd.f32 %v2642_v3, %v2503_v4 }
 0x374   : > { %v5702_v54 = vpop.f32.mrb[67].mxu1 }
 0x376   : > { %v2766_v28 = vpop.f32.mrb[220].mxu0 }
 0x377   : > { %v2805_v32 = vadd.f32 %v2766_v28, %v2646_v35  ;;  %v5675_v17 = vpop.f32.mrb[221].mxu0 }
 0x378   : > { %v2769_v18 = vpop.f32.mrb[222].mxu0 }
 0x379   : > { %v2806_v20 = vadd.f32 %v2769_v18, %v2647_v6  ;;  %v5676_v21 = vpop.f32.mrb[223].mxu0  ;;  %v2899_v56 = vpop.f32.mrb[68].mxu1  ;;  %v2922_v60 = vadd.f32 %v2883_v40, %v2805_v32 }
 0x37a   : > { %v5705_v59 = vpop.f32.mrb[69].mxu1 }
 0x37b   : > { %v2902_v43 = vpop.f32.mrb[70].mxu1  ;;  %v2923_v27 = vadd.f32 %v2886_v0, %v2806_v20 }
 0x37c   : > { %v5706_v11 = vpop.f32.mrb[71].mxu1 }
 0x37e   : > { %v2774_v36 = vpop.f32.mrb[224].mxu0 }
 0x37f   : > { %v2807_v15 = vadd.f32 %v2774_v36, %v2648_v26  ;;  %v5679_v42 = vpop.f32.mrb[225].mxu0 }
 0x380   : > { %v2777_v24 = vpop.f32.mrb[226].mxu0 }
 0x381   : > { %v2808_v30 = vadd.f32 %v2777_v24, %v2649_v29  ;;  %v5680_v39 = vpop.f32.mrb[227].mxu0  ;;  %v2907_v3 = vpop.f32.mrb[72].mxu1  ;;  %v2924_v23 = vadd.f32 %v2891_v58, %v2807_v15 }
 0x382   : > { %v5709_v5 = vpop.f32.mrb[73].mxu1 }
 0x383   : > { %v2910_v35 = vpop.f32.mrb[74].mxu1  ;;  %v2925_v44 = vadd.f32 %v2894_v9, %v2808_v30 }
 0x384   : > { %v5710_v33 = vpop.f32.mrb[75].mxu1 }
 0x386   : > { %v2782_v6 = vpop.f32.mrb[228].mxu0 }
 0x387   : > { %v2809_v51 = vadd.f32 %v2782_v6, %v2650_v16  ;;  %v5683_v52 = vpop.f32.mrb[229].mxu0 }
 0x388   : > { %v2785_v53 = vpop.f32.mrb[230].mxu0 }
 0x389   : > { %v2810_v40 = vadd.f32 %v2785_v53, %v2651_v41  ;;  %v5684_v38 = vpop.f32.mrb[231].mxu0  ;;  %v2915_v0 = vpop.f32.mrb[76].mxu1  ;;  %v2926_v61 = vadd.f32 %v2899_v56, %v2809_v51 }
 0x38a   : > { %v5713_v62 = vpop.f32.mrb[77].mxu1 }
 0x38b   : > { %v2918_v26 = vpop.f32.mrb[78].mxu1  ;;  %v2927_v46 = vadd.f32 %v2902_v43, %v2810_v40 }
 0x38c   : > { %v5714_v2 = vpop.f32.mrb[79].mxu1 }
 0x38e   : > { %v2790_v29 = vpop.f32.mrb[232].mxu0 }
 0x38f   : > { %v2811_v22 = vadd.f32 %v2790_v29, %v2652_v55  ;;  %v5687_v4 = vpop.f32.mrb[233].mxu0 }
 0x390   : > { %v2793_v37 = vpop.f32.mrb[234].mxu0 }
 0x391   : > { %v2812_v58 = vadd.f32 %v2793_v37, %v2653_v45  ;;  %v5688_v10 = vpop.f32.mrb[235].mxu0  ;;  %v3195_v9 = vpop.f32.mrb[80].mxu1  ;;  %v2928_v54 = vadd.f32 %v2907_v3, %v2811_v22 }
 0x392   : > { %v5741_v28 = vpop.f32.mrb[81].mxu1 }
 0x393   : > { %v3198_v16 = vpop.f32.mrb[82].mxu1  ;;  %v2929_v32 = vadd.f32 %v2910_v35, %v2812_v58 }
 0x394   : > { %v5742_v17 = vpop.f32.mrb[83].mxu1 }
 0x396   : > { %v2798_v41 = vpop.f32.mrb[236].mxu0 }
 0x397   : > { %v2813_v18 = vadd.f32 %v2798_v41, %v2654_v8  ;;  %v5691_v20 = vpop.f32.mrb[237].mxu0 }
 0x398   : > { %v2801_v21 = vpop.f32.mrb[238].mxu0 }
 0x399   : > { %v2814_v56 = vadd.f32 %v2801_v21, %v2655_v34  ;;  %v5692_v59 = vpop.f32.mrb[239].mxu0  ;;  %v3203_v43 = vpop.f32.mrb[84].mxu1  ;;  %v2930_v11 = vadd.f32 %v2915_v0, %v2813_v18 }
 0x39a   : > { %v5745_v36 = vpop.f32.mrb[85].mxu1 }
 0x39b   : > { %v3206_v55 = vpop.f32.mrb[86].mxu1  ;;  %v2931_v15 = vadd.f32 %v2918_v26, %v2814_v56 }
 0x39c   : > { %v5746_v42 = vpop.f32.mrb[87].mxu1 }
 0x39e   : > { %v3035_v45 = vpop.f32.mrb[240].mxu0 }
 0x39f   : > { %v3074_v24 = vadd.f32 %v3035_v45, %v2922_v60  ;;  %v5719_v30 = vpop.f32.mrb[241].mxu0 }
 0x3a0   : > { %v3038_v39 = vpop.f32.mrb[242].mxu0 }
 0x3a1   : > { %v3075_v3 = vadd.f32 %v3038_v39, %v2923_v27  ;;  %v5720_v5 = vpop.f32.mrb[243].mxu0  ;;  %v3211_v35 = vpop.f32.mrb[88].mxu1  ;;  %v3234_v33 = vadd.f32 %v3195_v9, %v3074_v24 }
 0x3a2   : > { %v5749_v6 = vpop.f32.mrb[89].mxu1 }
 0x3a3   : > { %v3214_v8 = vpop.f32.mrb[90].mxu1  ;;  %v3235_v51 = vadd.f32 %v3198_v16, %v3075_v3 }
 0x3a4   : > { %v5750_v52 = vpop.f32.mrb[91].mxu1 }
 0x3a6   : > { %v3043_v34 = vpop.f32.mrb[244].mxu0 }
 0x3a7   : > { %v3076_v53 = vadd.f32 %v3043_v34, %v2924_v23  ;;  %v5723_v40 = vpop.f32.mrb[245].mxu0 }
 0x3a8   : > { %v3046_v38 = vpop.f32.mrb[246].mxu0 }
 0x3a9   : > { %v3077_v0 = vadd.f32 %v3046_v38, %v2925_v44  ;;  %v5724_v62 = vpop.f32.mrb[247].mxu0  ;;  %v3219_v26 = vpop.f32.mrb[92].mxu1  ;;  %v3236_v2 = vadd.f32 %v3203_v43, %v3076_v53 }
 0x3aa   : > { %v5753_v29 = vpop.f32.mrb[93].mxu1 }
 0x3ab   : > { %v3222_v60 = vpop.f32.mrb[94].mxu1  ;;  %v3237_v22 = vadd.f32 %v3206_v55, %v3077_v0 }
 0x3ac   : > { %v5754_v4 = vpop.f32.mrb[95].mxu1 }
 0x3ae   : > { %v3051_v27 = vpop.f32.mrb[248].mxu0 }
 0x3af   : > { %v3078_v37 = vadd.f32 %v3051_v27, %v2926_v61  ;;  %v5727_v58 = vpop.f32.mrb[249].mxu0 }
 0x3b0   : > { %v3054_v10 = vpop.f32.mrb[250].mxu0 }
 0x3b1   : > { %v3079_v9 = vadd.f32 %v3054_v10, %v2927_v46  ;;  %v5728_v28 = vpop.f32.mrb[251].mxu0  ;;  %v3227_v16 = vpop.f32.mrb[96].mxu1  ;;  %v3238_v17 = vadd.f32 %v3211_v35, %v3078_v37 }
 0x3b2   : > { %v5757_v41 = vpop.f32.mrb[97].mxu1 }
 0x3b3   : > { %v3230_v23 = vpop.f32.mrb[98].mxu1  ;;  %v7299_v18 = vadd.f32 %v3214_v8, %v3079_v9  ;;  %v3539_v9 = vld [vmem:[#allocation3 + $0x4] sm:$0xe] }
 0x3b4   : > { %v5758_v44 = vpop.f32.mrb[99].mxu1 }
 0x3b6   : > { %v3059_v20 = vpop.f32.mrb[252].mxu0 }
 0x3b7   : > { %v3080_v21 = vadd.f32 %v3059_v20, %v2928_v54  ;;  %v5731_v56 = vpop.f32.mrb[253].mxu0  ;;  %v7312_v54 = vld [vmem:[%s7766_s5 + $0x2] ss:$0 sm:$0xff] }
 0x3b8   : > { %v3062_v59 = vpop.f32.mrb[254].mxu0 }
 0x3b9   : > { %v3081_v43 = vadd.f32 %v3062_v59, %v2929_v32  ;;  %v5732_v36 = vpop.f32.mrb[255].mxu0  ;;  %v7301_v55 = vadd.f32 %v3219_v26, %v3080_v21 }
 0x3bb   : > { %v7303_v61 = vadd.f32 %v3222_v60, %v3081_v43 }
 0x3be   : > { %v3067_v42 = vpop.f32.mrb[0].mxu0 }
 0x3bf   : > { %v3082_v46 = vadd.f32 %v3067_v42, %v2930_v11  ;;  %v5735_v45 = vpop.f32.mrb[1].mxu0 }
 0x3c0   : > { %v3070_v24 = vpop.f32.mrb[2].mxu0 }
 0x3c1   : > { %v3083_v30 = vadd.f32 %v3070_v24, %v2931_v15  ;;  %v5736_v39 = vpop.f32.mrb[3].mxu0  ;;  %v7305_v3 = vadd.f32 %v3227_v16, %v3082_v46 }
 0x3c3   : > { %v7307_v5 = vadd.f32 %v3230_v23, %v3083_v30 }
 0x3c6   : > { %v3312_v35 = vpop.f32.mrb[4].mxu0 }
 0x3c7   : > { %v3351_v32 = vadd.f32 %v3312_v35, %v3234_v33  ;;  %v5763_v6 = vpop.f32.mrb[5].mxu0 }
 0x3c8   : > { %v3315_v8 = vpop.f32.mrb[6].mxu0 }
 0x3c9   : > { %v3366_v52 = vadd.f32 %v7312_v54, %v3351_v32  ;;  %v3352_v11 = vadd.f32 %v3315_v8, %v3235_v51  ;;  %v5764_v34 = vpop.f32.mrb[7].mxu0 }
 0x3cb   : > { %v3376_v15 = vmul.f32 %v3366_v52, %v6898_v48  ;;  %v3367_v53 = vadd.f32 %v7312_v54, %v3352_v11  ;;  %v3555_v52 = vld [vmem:[#allocation3] sm:$0xf] }
 0x3cd   : > { %v5185_v40 = vpack.c.bf16 %v3376_v15, %v3376_v15  ;;  %v3377_v38 = vmul.f32 %v3367_v53, %v6902_v57 }
 0x3ce   : > { %v3320_v0 = vpop.f32.mrb[8].mxu0 }
 0x3cf   : > { %v3430_v62 = vshrl.u32 %v5185_v40, 16  ;;  %v3433_v26 = vshll.u32 %v5185_v40, 16  ;;  %v5186_v29 = vpack.c.bf16 %v3377_v38, %v3377_v38  ;;  %v3353_v60 = vadd.f32 %v3320_v0, %v3236_v2  ;;  %v5767_v4 = vpop.f32.mrb[9].mxu0 }
 0x3d0   : > { %v3323_v33 = vpop.f32.mrb[10].mxu0 }
 0x3d1   : > { %v3432_v27 = vrot.slane %v3430_v62, 6  ;;  %v3435_v37 = vrot.slane %v3433_v26, 7  ;;  %v3439_v58 = vshrl.u32 %v5186_v29, 16  ;;  %v3442_v10 = vshll.u32 %v5186_v29, 16  ;;  %v5768_v51 = vpop.f32.mrb[11].mxu0 }
 0x3d2   : > { %v3368_v48 = vadd.f32 %v7312_v54, %v3353_v60  ;;  %v3354_v28 = vadd.f32 %v3323_v33, %v3237_v22 }
 0x3d3   : > { %v3436_v16 = vor.u32 %v3435_v37, %v3432_v27  ;;  %v3441_v41 = vrot.slane %v3439_v58, 6  ;;  %v3444_v23 = vrot.slane %v3442_v10, 7 }
 0x3d4   : > { %v3378_v57 = vmul.f32 %v3368_v48, %v6906_v50  ;;  %v3369_v44 = vadd.f32 %v7312_v54, %v3354_v28 }
 0x3d5   : > { %v3437_v20 = vrot.slane %v3436_v16, 4  ;;  %v3540_v2 = vsel %vm6909_vm14, %v3436_v16, %v3539_v9  ;;  %v3445_v21 = vor.u32 %v3444_v23, %v3441_v41 }
 0x3d6   : > { %3541 = vst [vmem:[#allocation3 + $0x4] sm:$0xe] %v3540_v2  ;;  %v5187_v56 = vpack.c.bf16 %v3378_v57, %v3378_v57  ;;  %v3379_v59 = vmul.f32 %v3369_v44, %v6923_v31  ;;  %v3328_v43 = vpop.f32.mrb[12].mxu0 }
 0x3d7   : > { %v3446_v22 = vsel %vm6916_vm15, %v3437_v20, %v3445_v21  ;;  %v3355_v36 = vadd.f32 %v3328_v43, %v3238_v17  ;;  %v5771_v42 = vpop.f32.mrb[13].mxu0  ;;  %v3447_v11 = vrot.slane %v3445_v21, 4 }
 0x3d8   : > { %3542 = vst.msk [vmem:[#allocation3 + $0x8] sm:$0xf] %vm1799_vm8, %v3446_v22  ;;  %v3449_v50 = vshrl.u32 %v5187_v56, 16  ;;  %v3452_v46 = vshll.u32 %v5187_v56, 16  ;;  %v5188_v45 = vpack.c.bf16 %v3379_v59, %v3379_v59  ;;  %v3331_v24 = vpop.f32.mrb[14].mxu0 }
 0x3d9   : > { %v3370_v14 = vadd.f32 %v7312_v54, %v3355_v36  ;;  %v3356_v30 = vadd.f32 %v3331_v24, %v7299_v18  ;;  %v5772_v39 = vpop.f32.mrb[15].mxu0  ;;  %v3554_v22 = vld [vmem:[%s7765_s4] sm:$0xf] }
 0x3da   : > { %v3451_v35 = vrot.slane %v3449_v50, 6  ;;  %v3454_v32 = vrot.slane %v3452_v46, 7  ;;  %v3459_v31 = vshrl.u32 %v5188_v45, 16  ;;  %v3462_v6 = vshll.u32 %v5188_v45, 16 }
 0x3db   : > { %v3380_v8 = vmul.f32 %v3370_v14, %v6935_v49  ;;  %v3371_v17 = vadd.f32 %v7312_v54, %v3356_v30 }
 0x3dc   : > { %v3455_v34 = vor.u32 %v3454_v32, %v3451_v35  ;;  %v3461_v15 = vrot.slane %v3459_v31, 6  ;;  %v3464_v53 = vrot.slane %v3462_v6, 7  ;;  %v3741_v32 = vsel %vm2224_vm9, %v3554_v22, 0 }
 0x3dd   : > { %v5189_v40 = vpack.c.bf16 %v3380_v8, %v3380_v8  ;;  %v3381_v38 = vmul.f32 %v3371_v17, %v6944_v13  ;;  %v3556_v0 = vld [vmem:[#allocation3 + $0x4] sm:$0xf] }
 0x3de   : > { %v3456_v18 = vsel %vm6916_vm15, %v3447_v11, %v3455_v34  ;;  %v3457_v62 = vrot.slane %v3455_v34, 4  ;;  %v3465_v26 = vor.u32 %v3464_v53, %v3461_v15  ;;  %v3336_v29 = vpop.f32.mrb[16].mxu0  ;;  %v7334_v60 = vcombine.low %v3555_v52, %v3556_v0 }
 0x3df   : > { %3543 = vst.msk [vmem:[#allocation3 + $0xc] sm:$0xf] %vm1799_vm8, %v3456_v18  ;;  %v3469_v49 = vshrl.u32 %v5189_v40, 16  ;;  %v3472_v4 = vshll.u32 %v5189_v40, 16  ;;  %v5190_v33 = vpack.c.bf16 %v3381_v38, %v3381_v38  ;;  %v3357_v27 = vadd.f32 %v3336_v29, %v7301_v55  ;;  %v5775_v37 = vpop.f32.mrb[17].mxu0 }
 0x3e0   : > { %v3466_v13 = vsel %vm6916_vm15, %v3457_v62, %v3465_v26  ;;  %v3339_v58 = vpop.f32.mrb[18].mxu0  ;;  %v3598_v10 = vshll.u32 %v7334_v60, 16  ;;  %v3467_v41 = vrot.slane %v3465_v26, 4  ;;  %v3817_v55 = vld [vmem:[#allocation3] sm:$0xe]  ;;  %v3596_v43 = vshrl.u32 %v7334_v60, 16 }
 0x3e1   : > { %3544 = vst.msk [vmem:[#allocation3 + $0x10] sm:$0xf] %vm1799_vm8, %v3466_v13  ;;  %v3471_v51 = vrot.slane %v3469_v49, 6  ;;  %v3474_v9 = vrot.slane %v3472_v4, 7  ;;  %v3479_v48 = vshrl.u32 %v5190_v33, 16  ;;  %v3482_v28 = vshll.u32 %v5190_v33, 16 }
 0x3e2   : > { %v5776_v16 = vpop.f32.mrb[19].mxu0  ;;  %v3372_v23 = vadd.f32 %v7312_v54, %v3357_v27  ;;  %v3358_v57 = vadd.f32 %v3339_v58, %v7303_v61  ;;  %v3600_v21 = vrot.slane %v3598_v10, 1  ;;  %v5120_v50 = vcombine.low %v3817_v55, %v3556_v0 }
 0x3e3   : > { %v3475_v44 = vor.u32 %v3474_v9, %v3471_v51  ;;  %v3481_v20 = vrot.slane %v3479_v48, 6  ;;  %v3484_v2 = vrot.slane %v3482_v28, 7 }
 0x3e4   : > { %v3382_v56 = vmul.f32 %v3372_v23, %v6961_v7  ;;  %v3373_v59 = vadd.f32 %v7312_v54, %v3358_v57  ;;  %v3601_v35 = vor.u32 %v3600_v21, %v3596_v43  ;;  %v3821_v15 = vrot.slane %v5120_v50, 1 }
 0x3e5   : > { %v3476_v36 = vsel %vm6916_vm15, %v3467_v41, %v3475_v44  ;;  %v3477_v42 = vrot.slane %v3475_v44, 4  ;;  %v3485_v61 = vor.u32 %v3484_v2, %v3481_v20 }
 0x3e6   : > { %3545 = vst.msk [vmem:[#allocation3 + $0x14] sm:$0xf] %vm1799_vm8, %v3476_v36  ;;  %v5191_v46 = vpack.c.bf16 %v3382_v56, %v3382_v56  ;;  %v3383_v45 = vmul.f32 %v3373_v59, %v6970_v47  ;;  %v3344_v7 = vpop.f32.mrb[20].mxu0  ;;  %v7354_v24 = vld [vmem:[#allocation3 + $0x8] sm:$0xff]  }
 0x3e7   : > { %v3486_v14 = vsel %vm6916_vm15, %v3477_v42, %v3485_v61  ;;  %v3359_v30 = vadd.f32 %v3344_v7, %v7305_v3  ;;  %v5779_v39 = vpop.f32.mrb[21].mxu0  ;;  %v3603_v47 = vshll.u32 %v7354_v24, 16  ;;  %v3822_v3 = vrot.slane %v7354_v24, 1 }
 0x3e8   : > { %3546 = vst.msk [vmem:[#allocation3 + $0x18] sm:$0xf] %vm1799_vm8, %v3486_v14  ;;  %v3489_v31 = vshrl.u32 %v5191_v46, 16  ;;  %v3492_v6 = vshll.u32 %v5191_v46, 16  ;;  %v5192_v8 = vpack.c.bf16 %v3383_v45, %v3383_v45  ;;  %v3347_v17 = vpop.f32.mrb[22].mxu0  ;;  %v3487_v49 = vrot.slane %v3485_v61, 4 }
 0x3e9   : > { %v3374_v52 = vadd.f32 %v7312_v54, %v3359_v30  ;;  %v3360_v11 = vadd.f32 %v3347_v17, %v7307_v5  ;;  %v5780_v34 = vpop.f32.mrb[23].mxu0  ;;  %v3605_v26 = vrot.slane %v3603_v47, 1  ;;  %v7368_v29 = vsel %vm1274_vm5, %v3821_v15, %v3822_v3  ;;  %v3551_v46 = vld [vmem:[#allocation3 + $0x2c] sm:$0x3]  ;;  %v7401_v30 = vld [vmem:[#allocation3 + $0x8] sm:$0xf] }
 0x3ea   : > { %v3491_v53 = vrot.slane %v3489_v31, 6  ;;  %v3494_v40 = vrot.slane %v3492_v6, 7  ;;  %v3499_v38 = vshrl.u32 %v5192_v8, 16  ;;  %v3502_v0 = vshll.u32 %v5192_v8, 16  ;;  %v4245_v6 = vld [vmem:[#allocation3 + $0x4] sm:$0xc] }
 0x3eb   : > { %v3384_v18 = vmul.f32 %v3374_v52, %v6991_v12  ;;  %v3375_v62 = vadd.f32 %v7312_v54, %v3360_v11  ;;  %v3606_v13 = vsel %vm606_vm4, %v3601_v35, %v3605_v26  ;;  %v3607_v16 = vshrl.u32 %v7354_v24, 16  ;;  %v7412_v47 = vld [vmem:[#allocation3 + $0xc] sm:$0xff]  }
 0x3ec   : > { %v3495_v4 = vor.u32 %v3494_v40, %v3491_v53  ;;  %v3501_v33 = vrot.slane %v3499_v38, 6  ;;  %v3504_v5 = vrot.slane %v3502_v0, 7  ;;  %5784 = vmatmul.mubr.msk.bf16.vlgmr.msra.gmra.mrb[0].mxu1 %vm2208_vm0, %v3606_v13  ;;  %v5143_v11 = vcombine.low %v4245_v6, %v7401_v30 }
 0x3ed   : > { %v5193_v27 = vpack.c.bf16 %v3384_v18, %v3384_v18  ;;  %v3385_v37 = vmul.f32 %v3375_v62, %v6997_v25  ;;  %v7372_v58 = vld [vmem:[#allocation3 + $0x10] sm:$0xff]   ;;  %5804 = vmatpush3.bf16.msra.mxu1 %v3741_v32  ;;  %5787 = vmatprep.mubr.msk.bf16.mxu1 %vm6305_vm1, %v6304_v1  ;;  %v3609_v20 = vor.u32 %v3607_v16, %v3605_v26  ;;  %v4250_v40 = vrot.slane %v7412_v47, 2 }
 0x3ee   : > { %v3496_v12 = vsel %vm6916_vm15, %v3487_v49, %v3495_v4  ;;  %v3497_v10 = vrot.slane %v3495_v4, 4  ;;  %v3505_v54 = vor.u32 %v3504_v5, %v3501_v33  ;;  %v3611_v25 = vshll.u32 %v7372_v58, 16  ;;  %5825 = vmatprep.subr.bf16.mxu1 %v6304_v1 }
 0x3ef   : > { %3547 = vst.msk [vmem:[#allocation3 + $0x1c] sm:$0xf] %vm1799_vm8, %v3496_v12  ;;  %v3509_v51 = vshrl.u32 %v5193_v27, 16  ;;  %v3512_v9 = vshll.u32 %v5193_v27, 16  ;;  %v5194_v48 = vpack.c.bf16 %v3385_v37, %v3385_v37  ;;  %v3824_v41 = vrot.slane %v7372_v58, 1  ;;  %v7414_v52 = vld [vmem:[#allocation3 + $0x14] sm:$0xff]  }
 0x3f0   : > { %v3506_v28 = vsel %vm6916_vm15, %v3497_v10, %v3505_v54  ;;  %v3613_v2 = vrot.slane %v3611_v25, 1  ;;  %v3507_v56 = vrot.slane %v3505_v54, 4  ;;  %v3615_v39 = vshrl.u32 %v7372_v58, 16 }
 0x3f1   : > { %3548 = vst.msk [vmem:[#allocation3 + $0x20] sm:$0xf] %vm1799_vm8, %v3506_v28  ;;  %v3511_v23 = vrot.slane %v3509_v51, 6  ;;  %v3514_v57 = vrot.slane %v3512_v9, 7  ;;  %v3519_v55 = vshrl.u32 %v5194_v48, 16  ;;  %v3522_v44 = vshll.u32 %v5194_v48, 16 }
 0x3f2   : > { %v7388_v21 = vsel %vm1274_vm5, %v3822_v3, %v3824_v41  ;;  %v3614_v36 = vsel %vm606_vm4, %v3609_v20, %v3613_v2  ;;  %v3617_v19 = vor.u32 %v3615_v39, %v3613_v2  ;;  %v4249_v53 = vrot.slane %v5143_v11, 2 }
 0x3f3   : > { %v3515_v59 = vor.u32 %v3514_v57, %v3511_v23  ;;  %v3521_v43 = vrot.slane %v3519_v55, 6  ;;  %v3524_v22 = vrot.slane %v3522_v44, 7  ;;  %v4252_v38 = vrot.slane %v7414_v52, 2  ;;  %v4673_v23 = vld [vmem:[#allocation3 + $0x8] sm:$0x8]  ;;  %v7453_v55 = vld [vmem:[#allocation3 + $0x10] sm:$0xff]  }
 0x3f4   : > { %5788 = vmatmul.mubr.msk.bf16.gmra.mrb[4].mxu1 %vm2208_vm0, %v3614_v36  ;;  %v7427_v26 = vsel %vm341_vm2, %v4249_v53, %v4250_v40  ;;  %v4102_v53 = vshll.u32 %v7412_v47, 16 }
 0x3f5   : > { %v3516_v42 = vsel %vm6916_vm15, %v3507_v56, %v3515_v59  ;;  %v3517_v61 = vrot.slane %v3515_v59, 4  ;;  %v3525_v50 = vor.u32 %v3524_v22, %v3521_v43  ;;  %5791 = vmatprep.mubr.msk.bf16.mxu1 %vm6305_vm1, %v6304_v1  ;;  %v7430_v49 = vsel %vm341_vm2, %v4250_v40, %v4252_v38  ;;  %v3816_v59 = vld [vmem:[%s7765_s4 + $0x8] sm:$0xf] }
 0x3f6   : > { %3549 = vst.msk [vmem:[#allocation3 + $0x24] sm:$0xf] %vm1799_vm8, %v3516_v42  ;;  %v7395_v45 = vld [vmem:[#allocation3 + $0x18] sm:$0xff]   ;;  %v4678_v22 = vrot.slane %v7453_v55, 3 }
 0x3f7   : > { %v3526_v7 = vsel %vm6916_vm15, %v3517_v61, %v3525_v50  ;;  %v3527_v14 = vrot.slane %v3525_v50, 4  ;;  %v3619_v35 = vshll.u32 %v7395_v45, 16  ;;  %v3826_v32 = vrot.slane %v7395_v45, 1  ;;  %v7455_v44 = vld [vmem:[#allocation3 + $0x18] sm:$0xff]  }
 0x3f8   : > { %3550 = vst.msk [vmem:[#allocation3 + $0x28] sm:$0xf] %vm1799_vm8, %v3526_v7  ;;  %v7418_v15 = vld [vmem:[#allocation3 + $0x1c] sm:$0xff]   ;;  %v3623_v63 = vshrl.u32 %v7395_v45, 16  ;;  %v4680_v36 = vrot.slane %v7455_v44, 3  ;;  %v3848_v7 = vsel %vm2224_vm9, %v3816_v59, 0 }
 0x3f9   : > { %v3552_v31 = vsel %vm7026_vm10, %v3527_v14, %v3551_v46  ;;  %v3621_v8 = vrot.slane %v3619_v35, 1  ;;  %v7410_v17 = vsel %vm1274_vm5, %v3824_v41, %v3826_v32  ;;  %v4254_v27 = vrot.slane %v7418_v15, 2  ;;  %v7450_v41 = vld [vmem:[#allocation3 + $0xc] sm:$0xf] }
 0x3fa   : > { %3553 = vst [vmem:[#allocation3 + $0x2c] sm:$0x3] %v3552_v31  ;;  %v5166_v20 = vcombine.low %v4673_v23, %v7450_v41  ;;  %v7475_v50 = vsel %vm1427_vm6, %v4678_v22, %v4680_v36  ;;  %v4117_v23 = vshrl.u32 %v7418_v15, 16 }
 0x3fb   : > { %v3622_v34 = vsel %vm606_vm4, %v3617_v19, %v3621_v8  ;;  %v3625_v4 = vor.u32 %v3623_v63, %v3621_v8  ;;  %v7439_v51 = vsel %vm341_vm2, %v4252_v38, %v4254_v27  ;;  %v3978_v19 = vrot.slane %v7418_v15, 1 }
 0x3fc   : > { %5792 = vmatmul.mubr.msk.bf16.gmra.mrb[8].mxu1 %vm2208_vm0, %v3622_v34  ;;  %v4677_v43 = vrot.slane %v5166_v20, 3  ;;  %v4099_v63 = vshrl.u32 %v7412_v47, 16  ;;  %v4119_v20 = vrot.slane %v4117_v23, 1 }
 0x3fd   : > { %v6277_v3 = vld [vmem:[#allocation3 + $0x20] sm:$0xff]   ;;  %5795 = vmatprep.mubr.msk.bf16.mxu1 %vm6305_vm1, %v6304_v1 }
 0x3fe   : > { %v3627_v0 = vshll.u32 %v6277_v3, 16  ;;  %v3828_v62 = vrot.slane %v6277_v3, 1  ;;  %v3631_v48 = vshrl.u32 %v6277_v3, 16  ;;  %v7459_v2 = vld [vmem:[#allocation3 + $0x20] sm:$0xff]   ;;  %v7472_v61 = vsel %vm1427_vm6, %v4677_v43, %v4678_v22 }
 0x3ff   : > { %v6278_v18 = vld [vmem:[#allocation3 + $0x28] ss:$0 sps:$4 sm:$0x11]   ;;  %v4682_v42 = vrot.slane %v7459_v2, 3 }
 0x400   : > { %v3629_v33 = vrot.slane %v3627_v0, 1  ;;  %v3830_v5 = vrot.slane %v6278_v18, 1  ;;  %v3829_v37 = vsel %vm1274_vm5, %v3826_v32, %v3828_v62  ;;  %v7434_v13 = vld [vmem:[#allocation3 + $0x24] sm:$0xff]   ;;  %v3635_v54 = vshll.u32 %v6278_v18, 16 }
 0x401   : > { %v4256_v9 = vrot.slane %v7434_v13, 2  ;;  %v7463_v56 = vld [vmem:[#allocation3 + $0x28] sm:$0xff]   ;;  %v7480_v14 = vsel %vm1427_vm6, %v4680_v36, %v4682_v42  ;;  %v4101_v18 = vrot.slane %v4099_v63, 1  ;;  %v4126_v22 = vshrl.u32 %v7434_v13, 16 }
 0x402   : > { %v3630_v12 = vsel %vm606_vm4, %v3625_v4, %v3629_v33  ;;  %v3831_v10 = vsel %vm1274_vm5, %v3828_v62, %v3830_v5  ;;  %v3633_v28 = vor.u32 %v3631_v48, %v3629_v33  ;;  %v3637_v16 = vrot.slane %v3635_v54, 1  ;;  %v6285_v34 = vld [vmem:[#allocation3 + $0x2c] ss:$0 sps:$4 sm:$0x11]  }
 0x403   : > { %v7448_v25 = vsel %vm341_vm2, %v4254_v27, %v4256_v9  ;;  %v4684_v46 = vrot.slane %v7463_v56, 3  ;;  %v4104_v62 = vrot.slane %v4102_v53, 2  ;;  %v4244_v27 = vld [vmem:[%s7765_s4 + $0x14] sm:$0xf]  ;;  %v4129_v36 = vshll.u32 %v7434_v13, 16 }
 0x404   : > { %5796 = vmatmul.mubr.msk.bf16.gmra.mrb[12].mxu1 %vm2208_vm0, %v3630_v12  ;;  %v3638_v57 = vsel %vm606_vm4, %v3633_v28, %v3637_v16  ;;  %v4408_v63 = vrot.slane %v7463_v56, 2 }
 0x405   : > { %5799 = vmatprep.mubr.msk.bf16.mxu1 %vm6305_vm1, %v6304_v1  ;;  %v7485_v39 = vsel %vm1427_vm6, %v4682_v42, %v4684_v46  ;;  %v4105_v5 = vor.u32 %v4104_v62, %v4101_v18  ;;  %v4530_v18 = vshll.u32 %v7453_v55, 16 }
 0x40c   : > { %5800 = vmatmul.mubr.msk.bf16.gmra.mrb[16].mxu1 %vm2208_vm0, %v3638_v57 }
 0x40d   : > { %5805 = vmatprep.mubr.msk.bf16.mxu1 %vm6305_vm1, %v6304_v1 }
 0x414   : > { %5806 = vmatmul.mubr.msk.bf16.vlgmr.msra.gmra.mrb[0].mxu1 %vm2208_vm0, %v7334_v60  ;;  %v3933_v60 = vld [vmem:[%s7765_s4 + $0xc] sm:$0xf] }
 0x415   : > { %5826 = vmatpush3.bf16.msra.mxu1 %v3848_v7  ;;  %5809 = vmatprep.mubr.msk.bf16.mxu1 %vm6305_vm1, %v6304_v1  ;;  %v4128_v7 = vrot.slane %v4126_v22, 1 }
 0x416   : > { %5847 = vmatprep.subr.bf16.mxu1 %v6304_v1 }
 0x41c   : > { %5810 = vmatmul.mubr.msk.bf16.gmra.mrb[4].mxu1 %vm2208_vm0, %v7354_v24  ;;  %v4000_v24 = vsel %vm2224_vm9, %v3933_v60, 0  ;;  %v4131_v60 = vrot.slane %v4129_v36, 2 }
 0x41d   : > { %5813 = vmatprep.mubr.msk.bf16.mxu1 %vm6305_vm1, %v6304_v1 }
 0x424   : > { %5814 = vmatmul.mubr.msk.bf16.gmra.mrb[8].mxu1 %vm2208_vm0, %v7372_v58 }
 0x425   : > { %5817 = vmatprep.mubr.msk.bf16.mxu1 %vm6305_vm1, %v6304_v1 }
 0x42c   : > { %5818 = vmatmul.mubr.msk.bf16.gmra.mrb[12].mxu1 %vm2208_vm0, %v7395_v45  ;;  %v4085_v45 = vld [vmem:[%s7765_s4 + $0x10] sm:$0xf] }
 0x42d   : > { %5821 = vmatprep.mubr.msk.bf16.mxu1 %vm6305_vm1, %v6304_v1  ;;  %v4159_v32 = vsel %vm2224_vm9, %v4085_v45, 0 }
 0x434   : > { %5822 = vmatmul.mubr.msk.bf16.gmra.mrb[16].mxu1 %vm2208_vm0, %v6277_v3  ;;  %v3982_v3 = vrot.slane %v6285_v34, 1  ;;  %v4406_v34 = vrot.slane %v7459_v2, 2 }
 0x435   : > { %5827 = vmatprep.mubr.msk.bf16.mxu1 %vm6305_vm1, %v6304_v1 }
 0x436   : > { %v4409_v53 = vsel %vm341_vm2, %v4406_v34, %v4408_v63 }
 0x43c   : > { %5828 = vmatmul.mubr.msk.bf16.vlgmr.msra.gmra.mrb[0].mxu1 %vm2208_vm0, %v7368_v29  ;;  %v3934_v29 = vld [vmem:[#allocation3 + $0x4] sm:$0xe] }
 0x43d   : > { %5848 = vmatpush3.bf16.msra.mxu1 %v4000_v24  ;;  %5831 = vmatprep.mubr.msk.bf16.mxu1 %vm6305_vm1, %v6304_v1  ;;  %v5126_v58 = vcombine.low %v3934_v29, %v7401_v30  ;;  %v3976_v30 = vrot.slane %v7414_v52, 1  ;;  %v6286_v24 = vld [vmem:[#allocation3 + $0x2c] ss:$0 sps:$4 sm:$0x33]  }
 0x43e   : > { %5869 = vmatprep.subr.bf16.mxu1 %v6304_v1  ;;  %v4135_v29 = vshrl.u32 %v6286_v24, 16 }
 0x43f   : > { %v3973_v35 = vrot.slane %v5126_v58, 1  ;;  %v3979_v8 = vsel %vm1274_vm5, %v3976_v30, %v3978_v19  ;;  %v4091_v40 = vshrl.u32 %v5126_v58, 16  ;;  %v4094_v38 = vshll.u32 %v5126_v58, 16 }
 0x440   : > { %v4138_v58 = vshll.u32 %v6286_v24, 16  ;;  %v4137_v45 = vrot.slane %v4135_v29, 1  ;;  %v6294_v29 = vld [vmem:[#allocation3 + $0x30] ss:$0 sps:$4 sm:$0x77]  }
 0x441   : > { %v4093_v4 = vrot.slane %v4091_v40, 1  ;;  %v4096_v33 = vrot.slane %v4094_v38, 2  ;;  %v6293_v40 = vld [vmem:[#allocation3 + $0x30] ss:$0 sps:$4 sm:$0x33]  }
 0x442   : > { %v4410_v38 = vrot.slane %v6293_v40, 2 }
 0x443   : > { %v4097_v12 = vor.u32 %v4096_v33, %v4093_v4 }
 0x444   : > { %5832 = vmatmul.mubr.msk.bf16.gmra.mrb[4].mxu1 %vm2208_vm0, %v7388_v21  ;;  %v3974_v21 = vrot.slane %v7412_v47, 1  ;;  %v4108_v47 = vshrl.u32 %v7414_v52, 16  ;;  %v4411_v33 = vsel %vm341_vm2, %v4408_v63, %v4410_v38 }
 0x445   : > { %5835 = vmatprep.mubr.msk.bf16.mxu1 %vm6305_vm1, %v6304_v1  ;;  %v4106_v54 = vsel %vm1549_vm7, %v4097_v12, %v4105_v5 }
 0x446   : > { %v3975_v31 = vsel %vm1274_vm5, %v3973_v35, %v3974_v21  ;;  %v3977_v6 = vsel %vm1274_vm5, %v3974_v21, %v3976_v30  ;;  %v4110_v48 = vrot.slane %v4108_v47, 1  ;;  %v4140_v35 = vrot.slane %v4138_v58, 2  ;;  %v4361_v30 = vld [vmem:[%s7765_s4 + $0x18] sm:$0xf] }
 0x447   : > { %v4563_v58 = vshrl.u32 %v6294_v29, 16 }
 0x44c   : > { %5836 = vmatmul.mubr.msk.bf16.gmra.mrb[8].mxu1 %vm2208_vm0, %v7410_v17  ;;  %v3980_v17 = vrot.slane %v7434_v13, 1 }
 0x44d   : > { %5839 = vmatprep.mubr.msk.bf16.mxu1 %vm6305_vm1, %v6304_v1 }
 0x44e   : > { %v3981_v11 = vsel %vm1274_vm5, %v3978_v19, %v3980_v17  ;;  %v3983_v0 = vsel %vm1274_vm5, %v3980_v17, %v3982_v3  ;;  %v4362_v19 = vld [vmem:[#allocation3 + $0x8] sm:$0xc] }
 0x454   : > { %5840 = vmatmul.mubr.msk.bf16.gmra.mrb[12].mxu1 %vm2208_vm0, %v3829_v37  ;;  %v4111_v37 = vshll.u32 %v7414_v52, 16  ;;  %v4120_v52 = vshll.u32 %v7418_v15, 16  ;;  %v4132_v15 = vor.u32 %v4131_v60, %v4128_v7  ;;  %v4557_v7 = vshll.u32 %v7463_v56, 16 }
 0x455   : > { %5843 = vmatprep.mubr.msk.bf16.mxu1 %vm6305_vm1, %v6304_v1 }
 0x456   : > { %v4113_v28 = vrot.slane %v4111_v37, 2  ;;  %v4122_v59 = vrot.slane %v4120_v52, 2 }
 0x458   : > { %v4114_v16 = vor.u32 %v4113_v28, %v4110_v48  ;;  %v4123_v43 = vor.u32 %v4122_v59, %v4119_v20  ;;  %v4545_v20 = vshrl.u32 %v7459_v2, 16  ;;  %v4548_v59 = vshll.u32 %v7459_v2, 16 }
 0x45a   : > { %v4115_v57 = vsel %vm1549_vm7, %v4105_v5, %v4114_v16  ;;  %v4124_v42 = vsel %vm1549_vm7, %v4114_v16, %v4123_v43  ;;  %v4133_v21 = vsel %vm1549_vm7, %v4123_v43, %v4132_v15  ;;  %v4547_v43 = vrot.slane %v4545_v20, 2 }
 0x45b   : > { %v4550_v22 = vrot.slane %v4548_v59, 3 }
 0x45c   : > { %5844 = vmatmul.mubr.msk.bf16.gmra.mrb[16].mxu1 %vm2208_vm0, %v3831_v10  ;;  %v4276_v10 = vsel %vm2224_vm9, %v4244_v27, 0  ;;  %v4532_v27 = vrot.slane %v4530_v18, 3 }
 0x45d   : > { %5849 = vmatprep.mubr.msk.bf16.mxu1 %vm6305_vm1, %v6304_v1  ;;  %v4551_v36 = vor.u32 %v4550_v22, %v4547_v43 }
 0x464   : > { %5850 = vmatmul.mubr.msk.bf16.vlgmr.msra.gmra.mrb[0].mxu1 %vm2208_vm0, %v3975_v31 }
 0x465   : > { %5870 = vmatpush3.bf16.msra.mxu1 %v4159_v32  ;;  %5853 = vmatprep.mubr.msk.bf16.mxu1 %vm6305_vm1, %v6304_v1  ;;  %v4141_v32 = vor.u32 %v4140_v35, %v4137_v45  ;;  %v4565_v35 = vrot.slane %v4563_v58, 2 }
 0x466   : > { %5891 = vmatprep.subr.bf16.mxu1 %v6304_v1 }
 0x467   : > { %v4142_v31 = vsel %vm1549_vm7, %v4132_v15, %v4141_v32  ;;  %v4559_v15 = vrot.slane %v4557_v7, 3 }
 0x46c   : > { %5854 = vmatmul.mubr.msk.bf16.gmra.mrb[4].mxu1 %vm2208_vm0, %v3977_v6  ;;  %v4428_v6 = vsel %vm2224_vm9, %v4361_v30, 0 }
 0x46d   : > { %5857 = vmatprep.mubr.msk.bf16.mxu1 %vm6305_vm1, %v6304_v1 }
 0x474   : > { %5858 = vmatmul.mubr.msk.bf16.gmra.mrb[8].mxu1 %vm2208_vm0, %v3979_v8  ;;  %v4402_v8 = vrot.slane %v7453_v55, 2 }
 0x475   : > { %5861 = vmatprep.mubr.msk.bf16.mxu1 %vm6305_vm1, %v6304_v1 }
 0x47c   : > { %5862 = vmatmul.mubr.msk.bf16.gmra.mrb[12].mxu1 %vm2208_vm0, %v3981_v11 }
 0x47d   : > { %5865 = vmatprep.mubr.msk.bf16.mxu1 %vm6305_vm1, %v6304_v1 }
 0x484   : > { %5866 = vmatmul.mubr.msk.bf16.gmra.mrb[16].mxu1 %vm2208_vm0, %v3983_v0  ;;  %v4527_v0 = vshrl.u32 %v7453_v55, 16  ;;  %v4536_v55 = vshrl.u32 %v7455_v44, 16 }
 0x485   : > { %5871 = vmatprep.mubr.msk.bf16.mxu1 %vm6305_vm1, %v6304_v1 }
 0x486   : > { %v4529_v5 = vrot.slane %v4527_v0, 2  ;;  %v4538_v23 = vrot.slane %v4536_v55, 2 }
 0x488   : > { %v4533_v12 = vor.u32 %v4532_v27, %v4529_v5 }
 0x48c   : > { %5872 = vmatmul.mubr.msk.bf16.vlgmr.msra.gmra.mrb[0].mxu1 %vm2208_vm0, %v4106_v54  ;;  %v4539_v54 = vshll.u32 %v7455_v44, 16 }
 0x48d   : > { %5892 = vmatpush3.bf16.msra.mxu1 %v4276_v10  ;;  %5875 = vmatprep.mubr.msk.bf16.mxu1 %vm6305_vm1, %v6304_v1  ;;  %v4672_v10 = vld [vmem:[%s7765_s4 + $0x20] sm:$0xf] }
 0x48e   : > { %5913 = vmatprep.subr.bf16.mxu1 %v6304_v1  ;;  %v4704_v28 = vsel %vm2224_vm9, %v4672_v10, 0  ;;  %v4541_v52 = vrot.slane %v4539_v54, 3 }
 0x494   : > { %5876 = vmatmul.mubr.msk.bf16.gmra.mrb[4].mxu1 %vm2208_vm0, %v4115_v57  ;;  %v4542_v57 = vor.u32 %v4541_v52, %v4538_v23 }
 0x495   : > { %5879 = vmatprep.mubr.msk.bf16.mxu1 %vm6305_vm1, %v6304_v1 }
 0x496   : > { %v4552_v60 = vsel %vm3089_vm11, %v4542_v57, %v4551_v36 }
 0x49c   : > { %5880 = vmatmul.mubr.msk.bf16.gmra.mrb[8].mxu1 %vm2208_vm0, %v4124_v42  ;;  %v4554_v42 = vshrl.u32 %v7463_v56, 16 }
 0x49d   : > { %5883 = vmatprep.mubr.msk.bf16.mxu1 %vm6305_vm1, %v6304_v1 }
 0x4a4   : > { %5884 = vmatmul.mubr.msk.bf16.gmra.mrb[12].mxu1 %vm2208_vm0, %v4133_v21  ;;  %v4566_v21 = vshll.u32 %v6294_v29, 16 }
 0x4a5   : > { %5887 = vmatprep.mubr.msk.bf16.mxu1 %vm6305_vm1, %v6304_v1 }
 0x4a6   : > { %v4568_v32 = vrot.slane %v4566_v21, 3 }
 0x4ac   : > { %5888 = vmatmul.mubr.msk.bf16.gmra.mrb[16].mxu1 %vm2208_vm0, %v4142_v31  ;;  %v4569_v31 = vor.u32 %v4568_v32, %v4565_v35 }
 0x4ad   : > { %5893 = vmatprep.mubr.msk.bf16.mxu1 %vm6305_vm1, %v6304_v1 }
 0x4b4   : > { %5894 = vmatmul.mubr.msk.bf16.vlgmr.msra.gmra.mrb[0].mxu1 %vm2208_vm0, %v7427_v26  ;;  %v4258_v26 = vrot.slane %v6286_v24, 2  ;;  %v4556_v24 = vrot.slane %v4554_v42, 2 }
 0x4b5   : > { %5914 = vmatpush3.bf16.msra.mxu1 %v4428_v6  ;;  %5897 = vmatprep.mubr.msk.bf16.mxu1 %vm6305_vm1, %v6304_v1 }
 0x4b6   : > { %5935 = vmatprep.subr.bf16.mxu1 %v6304_v1  ;;  %v4560_v2 = vor.u32 %v4559_v15, %v4556_v24 }
 0x4b8   : > { %v4561_v45 = vsel %vm3089_vm11, %v4551_v36, %v4560_v2  ;;  %v4570_v30 = vsel %vm3089_vm11, %v4560_v2, %v4569_v31 }
 0x4bc   : > { %5898 = vmatmul.mubr.msk.bf16.gmra.mrb[4].mxu1 %vm2208_vm0, %v7430_v49  ;;  %v4259_v49 = vsel %vm341_vm2, %v4256_v9, %v4258_v26  ;;  %v4404_v9 = vrot.slane %v7455_v44, 2  ;;  %v4543_v44 = vsel %vm3089_vm11, %v4533_v12, %v4542_v57 }
 0x4bd   : > { %5901 = vmatprep.mubr.msk.bf16.mxu1 %vm6305_vm1, %v6304_v1 }
 0x4be   : > { %v4407_v3 = vsel %vm341_vm2, %v4404_v9, %v4406_v34 }
 0x4c4   : > { %5902 = vmatmul.mubr.msk.bf16.gmra.mrb[8].mxu1 %vm2208_vm0, %v7439_v51  ;;  %v5149_v51 = vcombine.low %v4362_v19, %v7450_v41  ;;  %v4405_v41 = vsel %vm341_vm2, %v4402_v8, %v4404_v9 }
 0x4c5   : > { %5905 = vmatprep.mubr.msk.bf16.mxu1 %vm6305_vm1, %v6304_v1 }
 0x4c6   : > { %v4401_v17 = vrot.slane %v5149_v51, 2  ;;  %v4519_v62 = vshrl.u32 %v5149_v51, 16  ;;  %v4522_v4 = vshll.u32 %v5149_v51, 16 }
 0x4c8   : > { %v4403_v13 = vsel %vm341_vm2, %v4401_v17, %v4402_v8  ;;  %v4521_v47 = vrot.slane %v4519_v62, 2  ;;  %v4524_v37 = vrot.slane %v4522_v4, 3 }
 0x4ca   : > { %v4525_v48 = vor.u32 %v4524_v37, %v4521_v47 }
 0x4cc   : > { %5906 = vmatmul.mubr.msk.bf16.gmra.mrb[12].mxu1 %vm2208_vm0, %v7448_v25  ;;  %v4513_v25 = vld [vmem:[%s7765_s4 + $0x1c] sm:$0xf]  ;;  %v4534_v16 = vsel %vm3089_vm11, %v4525_v48, %v4533_v12 }
 0x4cd   : > { %5909 = vmatprep.mubr.msk.bf16.mxu1 %vm6305_vm1, %v6304_v1  ;;  %v4587_v11 = vsel %vm2224_vm9, %v4513_v25, 0 }
 0x4d4   : > { %5910 = vmatmul.mubr.msk.bf16.gmra.mrb[16].mxu1 %vm2208_vm0, %v4259_v49 }
 0x4d5   : > { %5915 = vmatprep.mubr.msk.bf16.mxu1 %vm6305_vm1, %v6304_v1 }
 0x4dc   : > { %5916 = vmatmul.mubr.msk.bf16.vlgmr.msra.gmra.mrb[0].mxu1 %vm2208_vm0, %v4403_v13 }
 0x4dd   : > { %5936 = vmatpush3.bf16.msra.mxu1 %v4587_v11  ;;  %5919 = vmatprep.mubr.msk.bf16.mxu1 %vm6305_vm1, %v6304_v1 }
 0x4de   : > { %5957 = vmatprep.subr.bf16.mxu1 %v6304_v1 }
 0x4e4   : > { %5920 = vmatmul.mubr.msk.bf16.gmra.mrb[4].mxu1 %vm2208_vm0, %v4405_v41 }
 0x4e5   : > { %5923 = vmatprep.mubr.msk.bf16.mxu1 %vm6305_vm1, %v6304_v1 }
 0x4ec   : > { %5924 = vmatmul.mubr.msk.bf16.gmra.mrb[8].mxu1 %vm2208_vm0, %v4407_v3 }
 0x4ed   : > { %5927 = vmatprep.mubr.msk.bf16.mxu1 %vm6305_vm1, %v6304_v1 }
 0x4f4   : > { %5928 = vmatmul.mubr.msk.bf16.gmra.mrb[12].mxu1 %vm2208_vm0, %v4409_v53 }
 0x4f5   : > { %5931 = vmatprep.mubr.msk.bf16.mxu1 %vm6305_vm1, %v6304_v1 }
 0x4fc   : > { %5932 = vmatmul.mubr.msk.bf16.gmra.mrb[16].mxu1 %vm2208_vm0, %v4411_v33 }
 0x4fd   : > { %5937 = vmatprep.mubr.msk.bf16.mxu1 %vm6305_vm1, %v6304_v1 }
 0x504   : > { %5938 = vmatmul.mubr.msk.bf16.vlgmr.msra.gmra.mrb[0].mxu1 %vm2208_vm0, %v4534_v16 }
 0x505   : > { %5958 = vmatpush3.bf16.msra.mxu1 %v4704_v28  ;;  %5941 = vmatprep.mubr.msk.bf16.mxu1 %vm6305_vm1, %v6304_v1 }
 0x50c   : > { %5942 = vmatmul.mubr.msk.bf16.gmra.mrb[4].mxu1 %vm2208_vm0, %v4543_v44 }
 0x50d   : > { %5945 = vmatprep.mubr.msk.bf16.mxu1 %vm6305_vm1, %v6304_v1 }
 0x514   : > { %5946 = vmatmul.mubr.msk.bf16.gmra.mrb[8].mxu1 %vm2208_vm0, %v4552_v60 }
 0x515   : > { %5949 = vmatprep.mubr.msk.bf16.mxu1 %vm6305_vm1, %v6304_v1 }
 0x51c   : > { %5950 = vmatmul.mubr.msk.bf16.gmra.mrb[12].mxu1 %vm2208_vm0, %v4561_v45 }
 0x51d   : > { %5953 = vmatprep.mubr.msk.bf16.mxu1 %vm6305_vm1, %v6304_v1 }
 0x524   : > { %5954 = vmatmul.mubr.msk.bf16.gmra.mrb[16].mxu1 %vm2208_vm0, %v4570_v30 }
 0x525   : > { %5959 = vmatprep.mubr.msk.bf16.mxu1 %vm6305_vm1, %v6304_v1 }
 0x52c   : > { %5960 = vmatmul.mubr.msk.bf16.vlgmr.msra.gmra.mrb[0].mxu1 %vm2208_vm0, %v7472_v61  ;;  %v4686_v61 = vrot.slane %v6294_v29, 3 }
 0x52d   : > { %5963 = vmatprep.mubr.msk.bf16.mxu1 %vm6305_vm1, %v6304_v1 }
 0x534   : > { %5964 = vmatmul.mubr.msk.bf16.gmra.mrb[4].mxu1 %vm2208_vm0, %v7475_v50  ;;  %v4687_v50 = vsel %vm1427_vm6, %v4684_v46, %v4686_v61 }
 0x535   : > { %5967 = vmatprep.mubr.msk.bf16.mxu1 %vm6305_vm1, %v6304_v1 }
 0x53c   : > { %5968 = vmatmul.mubr.msk.bf16.gmra.mrb[8].mxu1 %vm2208_vm0, %v7480_v14  ;;  %v7705_v14 = vld [vmem:[%s7766_s5 + $0x1] ss:$0 sm:$0xff] }
 0x53d   : > { %5971 = vmatprep.mubr.msk.bf16.mxu1 %vm6305_vm1, %v6304_v1 }
 0x544   : > { %5972 = vmatmul.mubr.msk.bf16.gmra.mrb[12].mxu1 %vm2208_vm0, %v7485_v39  ;;  %v7710_v39 = vld [vmem:[%s7766_s5 + $0x3] ss:$0 sm:$0xff] }
 0x545   : > { %5975 = vmatprep.mubr.msk.bf16.mxu1 %vm6305_vm1, %v6304_v1 }
 0x54c   : > { %5976 = vmatmul.mubr.msk.bf16.gmra.mrb[16].mxu1 %vm2208_vm0, %v4687_v50 }
 0x5ff   : > { %v4740_v6 = vpop.f32.mrb[0].mxu1 }
 0x600   : > { %v5979_v1 = vadd.f32 %v7705_v14, %v4740_v6  ;;  %v5961_v26 = vpop.f32.mrb[1].mxu1 }
 0x601   : > { %v4743_v56 = vpop.f32.mrb[2].mxu1 }
 0x602   : > { %v5980_v46 = vadd.f32 %v5979_v1, %v7710_v39  ;;  %v5981_v49 = vadd.f32 %v7705_v14, %v4743_v56  ;;  %v5962_v19 = vpop.f32.mrb[3].mxu1 }
 0x604   : > { %v4814_v51 = vmul.f32 0.2, %v5980_v46  ;;  %v5982_v8 = vadd.f32 %v5981_v49, %v7710_v39 }
 0x606   : > { %v4824_v25 = vmax.f32 %v5980_v46, %v4814_v51  ;;  %v4815_v17 = vmul.f32 0.2, %v5982_v8 }
 0x607   : > { %v4748_v11 = vpop.f32.mrb[4].mxu1 }
 0x608   : > { %4834 = vst.msk [vmem:[%s7720_s11] sm:$0xff] %vm2208_vm0, %v4824_v25  ;;  %v4825_v13 = vmax.f32 %v5982_v8, %v4815_v17  ;;  %v5983_v9 = vadd.f32 %v7705_v14, %v4748_v11  ;;  %v5965_v41 = vpop.f32.mrb[5].mxu1 }
 0x609   : > { %v4751_v34 = vpop.f32.mrb[6].mxu1 }
 0x60a   : > { %4835 = vst.msk [vmem:[%s7720_s11 + $0x8] sm:$0xff] %vm2208_vm0, %v4825_v13  ;;  %v5984_v3 = vadd.f32 %v5983_v9, %v7710_v39  ;;  %v5985_v63 = vadd.f32 %v7705_v14, %v4751_v34  ;;  %v5966_v53 = vpop.f32.mrb[7].mxu1 }
 0x60c   : > { %v4816_v40 = vmul.f32 0.2, %v5984_v3  ;;  %v5986_v38 = vadd.f32 %v5985_v63, %v7710_v39 }
 0x60e   : > { %v4826_v0 = vmax.f32 %v5984_v3, %v4816_v40  ;;  %v4817_v18 = vmul.f32 0.2, %v5986_v38 }
 0x60f   : > { %v4756_v62 = vpop.f32.mrb[8].mxu1 }
 0x610   : > { %4836 = vst.msk [vmem:[%s7720_s11 + $0x10] sm:$0xff] %vm2208_vm0, %v4826_v0  ;;  %v4827_v4 = vmax.f32 %v5986_v38, %v4817_v18  ;;  %v5987_v33 = vadd.f32 %v7705_v14, %v4756_v62  ;;  %v5969_v5 = vpop.f32.mrb[9].mxu1 }
 0x611   : > { %v4759_v27 = vpop.f32.mrb[10].mxu1 }
 0x612   : > { %4837 = vst.msk [vmem:[%s7720_s11 + $0x18] sm:$0xff] %vm2208_vm0, %v4827_v4  ;;  %v5988_v47 = vadd.f32 %v5987_v33, %v7710_v39  ;;  %v5989_v37 = vadd.f32 %v7705_v14, %v4759_v27  ;;  %v5970_v12 = vpop.f32.mrb[11].mxu1 }
 0x614   : > { %v4818_v10 = vmul.f32 0.2, %v5988_v47  ;;  %v5990_v55 = vadd.f32 %v5989_v37, %v7710_v39 }
 0x616   : > { %v4828_v54 = vmax.f32 %v5988_v47, %v4818_v10  ;;  %v4819_v48 = vmul.f32 0.2, %v5990_v55 }
 0x617   : > { %v4764_v28 = vpop.f32.mrb[12].mxu1 }
 0x618   : > { %4838 = vst.msk [vmem:[%s7720_s11 + $0x20] sm:$0xff] %vm2208_vm0, %v4828_v54  ;;  %v4829_v16 = vmax.f32 %v5990_v55, %v4819_v48  ;;  %v5991_v23 = vadd.f32 %v7705_v14, %v4764_v28  ;;  %v5973_v52 = vpop.f32.mrb[13].mxu1 }
 0x619   : > { %v4767_v57 = vpop.f32.mrb[14].mxu1 }
 0x61a   : > { %4839 = vst.msk [vmem:[%s7720_s11 + $0x28] sm:$0xff] %vm2208_vm0, %v4829_v16  ;;  %v5992_v20 = vadd.f32 %v5991_v23, %v7710_v39  ;;  %v5993_v59 = vadd.f32 %v7705_v14, %v4767_v57  ;;  %v5974_v44 = vpop.f32.mrb[15].mxu1 }
 0x61c   : > { %v4820_v43 = vmul.f32 0.2, %v5992_v20  ;;  %v5994_v22 = vadd.f32 %v5993_v59, %v7710_v39 }
 0x61e   : > { %v4830_v36 = vmax.f32 %v5992_v20, %v4820_v43  ;;  %v4821_v42 = vmul.f32 0.2, %v5994_v22 }
 0x61f   : > { %v4772_v7 = vpop.f32.mrb[16].mxu1 }
 0x620   : > { %4840 = vst.msk [vmem:[%s7720_s11 + $0x30] sm:$0xff] %vm2208_vm0, %v4830_v36  ;;  %v4831_v60 = vmax.f32 %v5994_v22, %v4821_v42  ;;  %v5995_v24 = vadd.f32 %v7705_v14, %v4772_v7  ;;  %v5977_v15 = vpop.f32.mrb[17].mxu1 }
 0x621   : > { %v4775_v29 = vpop.f32.mrb[18].mxu1 }
 0x622   : > { %4841 = vst.msk [vmem:[%s7720_s11 + $0x38] sm:$0xff] %vm2208_vm0, %v4831_v60  ;;  %v5996_v2 = vadd.f32 %v5995_v24, %v7710_v39  ;;  %v5997_v58 = vadd.f32 %v7705_v14, %v4775_v29  ;;  %v5978_v21 = vpop.f32.mrb[19].mxu1 }
 0x624   : > { %v4822_v45 = vmul.f32 0.2, %v5996_v2  ;;  %v5998_v35 = vadd.f32 %v5997_v58, %v7710_v39 }
 0x626   : > { %v4832_v32 = vmax.f32 %v5996_v2, %v4822_v45  ;;  %v4823_v31 = vmul.f32 0.2, %v5998_v35 }
 0x628   : > { %4842 = vst.msk [vmem:[%s7720_s11 + $0x40] sm:$0xff] %vm2208_vm0, %v4832_v32  ;;  %v4833_v30 = vmax.f32 %v5998_v35, %v4823_v31 }
 0x62a   : > { %4843 = vst.msk [vmem:[%s7720_s11 + $0x48] sm:$0xff] %vm2208_vm0, %v4833_v30 }
 0x62b PF: > { %s17_s24 = sadd.s32 1, %s6302_s24  }
 0x62c   : > { %p14_p4 = scmp.ge.s32.totalorder %s17_s24, 4  }
 0x62e   :  { %16 = sbr.rel (!%p14_p4) target bundleno = 1 (0x1), region = 78 }

</bundles_post_ra>
